<compile_context>
chip_gen: v5e
topology: v5e:2x2
jax: 0.10.0
libtpu: 0.0.40
codegen_flags: <defaults>
</compile_context>

<pallas_src>
import functools
import math

import jax
import jax.numpy as jnp
from jax import lax
from jax.experimental import pallas as pl
from jax.experimental.pallas import tpu as pltpu

LANE = 128
# Conservative cross-generation budget for keeping A_hat fully resident in VMEM
# (v7x has only 64 MiB physical / 32 MiB scoped default).
_SMALL_A_HAT_BYTES = 8 * 1024 * 1024   # bf16 A_hat up to ~2048 x 2048


def _round_up(v, m):
    return (v + m - 1) // m * m


def _vmem_limit_bytes():
    """Explicit scoped-VMEM limit (review: v5e default is only 16 MiB)."""
    try:
        info = pltpu.get_tpu_info()
        cap = getattr(info, "vmem_capacity_bytes", None)
        if cap:
            return int(min(96 * 1024 * 1024, cap * 3 // 4))
    except Exception:
        pass
    return None


def _cparams(dimension_semantics):
    kwargs = dict(dimension_semantics=dimension_semantics)
    limit = _vmem_limit_bytes()
    if limit is not None:
        kwargs["vmem_limit_bytes"] = limit
    return pltpu.CompilerParams(**kwargs)


# ---------------------------------------------------------------------------
# Kernel 1 (tiled path): lane-dense projection  O = X @ W1   (bf16 in, bf16 out)
# ---------------------------------------------------------------------------
def _proj_kernel(x_ref, w_ref, o_ref):
    o_ref[...] = jnp.dot(
        x_ref[...], w_ref[...], preferred_element_type=jnp.float32
    ).astype(o_ref.dtype)


def _project(x, w, *, tile_m, out_dtype):
    n, f = x.shape
    fo = w.shape[1]
    return pl.pallas_call(
        _proj_kernel,
        out_shape=jax.ShapeDtypeStruct((n, fo), out_dtype),
        grid_spec=pltpu.PrefetchScalarGridSpec(
            num_scalar_prefetch=0,
            grid=(pl.cdiv(n, tile_m),),
            in_specs=[
                pl.BlockSpec((tile_m, f), lambda i: (i, 0)),   # X row tile (bf16)
                pl.BlockSpec((f, fo), lambda i: (0, 0)),       # W1 resident
            ],
            out_specs=pl.BlockSpec((tile_m, fo), lambda i: (i, 0)),
        ),
        compiler_params=_cparams(("parallel",)),
    )(x, w)


# ---------------------------------------------------------------------------
# Kernel 2 (tiled path): fused layer-1 aggregation + ReLU + layer-2 projection
#   H1W2 = relu( A_hat @ XW1 + b1 ) @ W2
# A_hat streamed in (tile_m, tile_k) bf16 tiles; XW1 / b1 / W2 resident in VMEM.
# ---------------------------------------------------------------------------
def _agg_relu_proj_kernel(a_ref, v_ref, b1_ref, w2_ref, o_ref, acc_ref, *, tk):
    k = pl.program_id(1)

    @pl.when(k == 0)
    def _init():
        acc_ref[...] = jnp.zeros_like(acc_ref)

    row0 = pl.multiple_of(k * tk, tk)
    v_blk = v_ref[pl.ds(row0, tk), :]                       # slice of resident XW1
    acc_ref[...] += jnp.dot(a_ref[...], v_blk, preferred_element_type=jnp.float32)

    @pl.when(k == pl.num_programs(1) - 1)
    def _finalize():
        h1 = jnp.maximum(acc_ref[...] + b1_ref[...], 0.0)   # fused bias + ReLU (f32)
        # Fused layer-2 projection (128x128 MXU pass) -- avoids an HBM round-trip
        # of the (N,128) H1 intermediate plus an extra pallas_call.
        o_ref[...] = jnp.dot(
            h1.astype(w2_ref.dtype), w2_ref[...], preferred_element_type=jnp.float32
        ).astype(o_ref.dtype)


def _aggregate_relu_proj(a_hat, v, b1, w2, *, tile_m, tile_k):
    n_pad = a_hat.shape[0]
    h_pad = v.shape[1]
    c_pad = w2.shape[1]
    kern = functools.partial(_agg_relu_proj_kernel, tk=tile_k)
    return pl.pallas_call(
        kern,
        out_shape=jax.ShapeDtypeStruct((n_pad, c_pad), jnp.bfloat16),
        grid_spec=pltpu.PrefetchScalarGridSpec(
            num_scalar_prefetch=0,
            grid=(pl.cdiv(n_pad, tile_m), pl.cdiv(n_pad, tile_k)),  # reduction last
            in_specs=[
                pl.BlockSpec((tile_m, tile_k), lambda i, k: (i, k)),  # A_hat stream (bf16)
                pl.BlockSpec((n_pad, h_pad), lambda i, k: (0, 0)),    # XW1 resident
                pl.BlockSpec((1, h_pad), lambda i, k: (0, 0)),        # b1 resident
                pl.BlockSpec((h_pad, c_pad), lambda i, k: (0, 0)),    # W2 resident
            ],
            out_specs=pl.BlockSpec((tile_m, c_pad), lambda i, k: (i, 0)),
            scratch_shapes=[pltpu.VMEM((tile_m, h_pad), jnp.float32)],  # f32 accumulator
        ),
        compiler_params=_cparams(("parallel", "arbitrary")),
    )(a_hat, v, b1, w2)


# ---------------------------------------------------------------------------
# Kernel 3 (tiled path): layer-2 aggregation + bias + masked softmax.
# Accumulates directly into the f32 output block (no scratch).
# ---------------------------------------------------------------------------
def _agg_softmax_kernel(a_ref, v_ref, b2_ref, o_ref, *, tk, num_valid):
    k = pl.program_id(1)

    @pl.when(k == 0)
    def _init():
        o_ref[...] = jnp.zeros_like(o_ref)

    row0 = pl.multiple_of(k * tk, tk)
    v_blk = v_ref[pl.ds(row0, tk), :]                       # slice of resident H1W2
    o_ref[...] += jnp.dot(a_ref[...], v_blk, preferred_element_type=jnp.float32)

    @pl.when(k == pl.num_programs(1) - 1)
    def _finalize():
        h = o_ref[...] + b2_ref[...]                        # fused bias (f32)
        lane = lax.broadcasted_iota(jnp.int32, h.shape, 1)
        valid = lane < num_valid
        h = jnp.where(valid, h, -jnp.inf)
        m = jnp.max(h, axis=-1, keepdims=True)
        e = jnp.where(valid, jnp.exp(h - m), 0.0)
        s = jnp.sum(e, axis=-1, keepdims=True)
        o_ref[...] = e / s                                  # exact normalization


def _aggregate_softmax(a_hat, v, b2, *, num_valid, tile_m, tile_k):
    n_pad = a_hat.shape[0]
    c_pad = v.shape[1]
    kern = functools.partial(_agg_softmax_kernel, tk=tile_k, num_valid=num_valid)
    return pl.pallas_call(
        kern,
        out_shape=jax.ShapeDtypeStruct((n_pad, c_pad), jnp.float32),
        grid_spec=pltpu.PrefetchScalarGridSpec(
            num_scalar_prefetch=0,
            grid=(pl.cdiv(n_pad, tile_m), pl.cdiv(n_pad, tile_k)),
            in_specs=[
                pl.BlockSpec((tile_m, tile_k), lambda i, k: (i, k)),  # A_hat stream (bf16)
                pl.BlockSpec((n_pad, c_pad), lambda i, k: (0, 0)),    # H1W2 resident
                pl.BlockSpec((1, c_pad), lambda i, k: (0, 0)),        # b2 resident
            ],
            out_specs=pl.BlockSpec((tile_m, c_pad), lambda i, k: (i, 0)),
        ),
        compiler_params=_cparams(("parallel", "arbitrary")),
    )(a_hat, v, b2)


# ---------------------------------------------------------------------------
# Kernel 4 (small-graph path): both layers in ONE pallas_call, A_hat resident.
# ---------------------------------------------------------------------------
def _fused_small_kernel(a_ref, x_ref, w1_ref, b1_ref, w2_ref, b2_ref, o_ref, *, num_valid):
    a = a_ref[...]                                                       # (n, n) bf16
    xw1 = jnp.dot(x_ref[...], w1_ref[...], preferred_element_type=jnp.float32)
    h1 = jnp.maximum(
        jnp.dot(a, xw1.astype(a.dtype), preferred_element_type=jnp.float32)
        + b1_ref[...], 0.0)
    h1w2 = jnp.dot(h1.astype(w2_ref.dtype), w2_ref[...],
                   preferred_element_type=jnp.float32)
    logits = jnp.dot(a, h1w2.astype(a.dtype), preferred_element_type=jnp.float32) \
        + b2_ref[...]
    lane = lax.broadcasted_iota(jnp.int32, logits.shape, 1)
    valid = lane < num_valid
    h = jnp.where(valid, logits, -jnp.inf)
    m = jnp.max(h, axis=-1, keepdims=True)
    e = jnp.where(valid, jnp.exp(h - m), 0.0)
    s = jnp.sum(e, axis=-1, keepdims=True)
    o_ref[...] = (e / s).astype(o_ref.dtype)


def _forward_fused_small(a_hat, x_p, w1_p, b1_p, w2_p, b2_p, *, num_classes):
    n_pad = a_hat.shape[0]
    c_pad = w2_p.shape[1]
    kern = functools.partial(_fused_small_kernel, num_valid=num_classes)
    return pl.pallas_call(
        kern,
        out_shape=jax.ShapeDtypeStruct((n_pad, c_pad), jnp.float32),
        grid_spec=pltpu.PrefetchScalarGridSpec(
            num_scalar_prefetch=0,
            grid=(1,),
            in_specs=[
                pl.BlockSpec(a_hat.shape, lambda i: (0, 0)),
                pl.BlockSpec(x_p.shape, lambda i: (0, 0)),
                pl.BlockSpec(w1_p.shape, lambda i: (0, 0)),
                pl.BlockSpec(b1_p.shape, lambda i: (0, 0)),
                pl.BlockSpec(w2_p.shape, lambda i: (0, 0)),
                pl.BlockSpec(b2_p.shape, lambda i: (0, 0)),
            ],
            out_specs=pl.BlockSpec((n_pad, c_pad), lambda i: (0, 0)),
        ),
        compiler_params=_cparams(("arbitrary",)),
    )(a_hat, x_p, w1_p, b1_p, w2_p, b2_p)


# ---------------------------------------------------------------------------
# Glue: dense symmetrically-normalized adjacency from edge_index (plain JAX)
# ---------------------------------------------------------------------------
def build_normalized_adjacency(edge_index, num_nodes):
    src, dst = edge_index[0], edge_index[1]
    a = jnp.zeros((num_nodes, num_nodes), jnp.float32)
    a = a.at[dst, src].set(1.0)                       # message j -> i
    diag = jnp.arange(num_nodes)
    a = a.at[diag, diag].set(1.0)                     # add self-loops
    deg = jnp.sum(a, axis=1)
    d_inv_sqrt = jnp.where(deg > 0, lax.rsqrt(deg), 0.0)
    return d_inv_sqrt[:, None] * a * d_inv_sqrt[None, :]


# ---------------------------------------------------------------------------
# Full forward pass (matches twoLayerConvolutionalNetwork.forward at eval time)
# ---------------------------------------------------------------------------
def two_layer_gcn_forward(x, edge_index, params, *, tile_m=512, tile_k=1024,
                          force_tiled=False):
    w1, b1, w2, b2 = params
    n, f = x.shape
    hidden = w1.shape[1]
    num_classes = w2.shape[1]

    f_pad = _round_up(max(f, LANE), LANE)
    h_pad = _round_up(max(hidden, LANE), LANE)
    c_pad = _round_up(max(num_classes, LANE), LANE)

    n_small = _round_up(n, LANE)
    use_fused = (not force_tiled) and (n_small * n_small * 2 <= _SMALL_A_HAT_BYTES)

    if use_fused:
        n_pad = n_small
    else:
        assert tile_m % LANE == 0 and tile_k % LANE == 0, \
            "tile_m / tile_k must be multiples of 128"
        tile_m = min(tile_m, n_small)
        tile_k = min(tile_k, n_small)
        # Pad to lcm so mismatched tiles never silently drop rows/columns.
        # NOTE(v7x): pick tile_m so n_pad // tile_m is even for 2-TC balance.
        n_pad = _round_up(n, math.lcm(tile_m, tile_k))

    # Normalized adjacency, padded, streamed/held in bf16 (dominant HBM traffic).
    a_hat = build_normalized_adjacency(edge_index, n)
    a_hat = jnp.pad(a_hat, ((0, n_pad - n), (0, n_pad - n))).astype(jnp.bfloat16)

    # Zero-pad features / weights / biases to 128-lane granules; bf16 operands.
    x_p = jnp.pad(x.astype(jnp.float32),
                  ((0, n_pad - n), (0, f_pad - f))).astype(jnp.bfloat16)
    w1_p = jnp.pad(w1.astype(jnp.float32),
                   ((0, f_pad - f), (0, h_pad - hidden))).astype(jnp.bfloat16)
    b1_p = jnp.pad(b1.astype(jnp.float32), (0, h_pad - hidden)).reshape(1, h_pad)
    w2_p = jnp.pad(w2.astype(jnp.float32),
                   ((0, h_pad - hidden), (0, c_pad - num_classes))).astype(jnp.bfloat16)
    b2_p = jnp.pad(b2.astype(jnp.float32), (0, c_pad - num_classes)).reshape(1, c_pad)

    if use_fused:
        # Small graph: A_hat resident in VMEM, both layers in a single kernel.
        out = _forward_fused_small(a_hat, x_p, w1_p, b1_p, w2_p, b2_p,
                                   num_classes=num_classes)
    else:
        # Large graph: stream A_hat twice (once per layer) in big bf16 tiles.
        xw1 = _project(x_p, w1_p, tile_m=tile_m, out_dtype=jnp.bfloat16)
        # dropout(training=False) is the identity at inference: nothing to emit.
        h1w2 = _aggregate_relu_proj(a_hat, xw1, b1_p, w2_p,
                                    tile_m=tile_m, tile_k=tile_k)
        out = _aggregate_softmax(a_hat, h1w2, b2_p, num_valid=num_classes,
                                 tile_m=tile_m, tile_k=tile_k)

    return out[:n, :num_classes]


# ---------------------------------------------------------------------------
# Demo / self-check
# ---------------------------------------------------------------------------
if __name__ == "__main__":
    N, F_IN, HIDDEN, NUM_CLASSES = 300, 12, 16, 7

    key = jax.random.PRNGKey(0)
    k_adj, k_x, k_w1, k_b1, k_w2, k_b2 = jax.random.split(key, 6)

    # Deterministic random undirected graph (~3% density), no explicit self-loops.
    dense = jax.random.bernoulli(k_adj, 0.03, (N, N)).astype(jnp.int32)
    upper = jnp.triu(dense, k=1)
    adj = (upper + upper.T) > 0
    src, dst = jnp.nonzero(adj)
    edge_index = jnp.stack([src, dst]).astype(jnp.int32)

    x = jax.random.normal(k_x, (N, F_IN), jnp.float32)
    w1 = jax.random.normal(k_w1, (F_IN, HIDDEN), jnp.float32) / jnp.sqrt(F_IN)
    b1 = jax.random.normal(k_b1, (HIDDEN,), jnp.float32) * 0.1
    w2 = jax.random.normal(k_w2, (HIDDEN, NUM_CLASSES), jnp.float32) / jnp.sqrt(HIDDEN)
    b2 = jax.random.normal(k_b2, (NUM_CLASSES,), jnp.float32) * 0.1
    params = (w1, b1, w2, b2)

    # Path 1: single fused kernel (A_hat resident) -- default for this graph size.
    out_fused = jax.block_until_ready(two_layer_gcn_forward(x, edge_index, params))
    # Path 2: tiled streaming kernels; small 128-tiles here purely to exercise the
    # multi-tile accumulation grid on the tiny demo graph (production defaults are
    # tile_m=512, tile_k=1024 for HBM-streamed A_hat).
    out_tiled = jax.block_until_ready(
        two_layer_gcn_forward(x, edge_index, params, tile_m=128, tile_k=128,
                              force_tiled=True))

    assert out_fused.shape == (N, NUM_CLASSES)
    assert out_tiled.shape == (N, NUM_CLASSES)

    # Pure-JAX reference under the same bf16 quantization contract
    # (adjacency, X, W1, W2 in bf16; f32 accumulation and biases).
    bf = lambda a: a.astype(jnp.bfloat16).astype(jnp.float32)
    a_ref = bf(build_normalized_adjacency(edge_index, N))
    h_ref = jnp.maximum(a_ref @ (bf(x) @ bf(w1)) + b1, 0.0)
    logits_ref = a_ref @ (h_ref @ bf(w2)) + b2
    ref = jax.nn.softmax(logits_ref, axis=1)

    err_fused = float(jnp.max(jnp.abs(out_fused - ref)))
    err_tiled = float(jnp.max(jnp.abs(out_tiled - ref)))
    if not (err_fused < 3e-2 and err_tiled < 3e-2):
        raise SystemExit(
            f"mismatch vs reference: fused max|err|={err_fused}, tiled max|err|={err_tiled}")

    print("KERNEL_OK")
</pallas_src>

<mosaic_0001>
module attributes {stable_mosaic.version = 11 : i64} {
  func.func @_fused_small_kernel(%arg0: i32, %arg1: memref<384x384xbf16, #tpu.memory_space<vmem>>, %arg2: memref<384x128xbf16, #tpu.memory_space<vmem>>, %arg3: memref<128x128xbf16, #tpu.memory_space<vmem>>, %arg4: memref<1x128xf32, #tpu.memory_space<vmem>>, %arg5: memref<128x128xbf16, #tpu.memory_space<vmem>>, %arg6: memref<1x128xf32, #tpu.memory_space<vmem>>, %arg7: memref<384x128xf32, #tpu.memory_space<vmem>>) attributes {dimension_semantics = [#tpu.dimension_semantics<arbitrary>], iteration_bounds = array<i64: 1>, scalar_prefetch = 0 : i64, scratch_operands = 0 : i64, tpu.core_type = #tpu.core_type<tc>, window_params = [{pipeline_mode = #tpu.pipeline_mode<synchronous>, transform_indices = @transform_0, window_bounds = array<i64: 384, 384>}, {pipeline_mode = #tpu.pipeline_mode<synchronous>, transform_indices = @transform_1, window_bounds = array<i64: 384, 128>}, {pipeline_mode = #tpu.pipeline_mode<synchronous>, transform_indices = @transform_2, window_bounds = array<i64: 128, 128>}, {pipeline_mode = #tpu.pipeline_mode<synchronous>, transform_indices = @transform_3, window_bounds = array<i64: 1, 128>}, {pipeline_mode = #tpu.pipeline_mode<synchronous>, transform_indices = @transform_4, window_bounds = array<i64: 128, 128>}, {pipeline_mode = #tpu.pipeline_mode<synchronous>, transform_indices = @transform_5, window_bounds = array<i64: 1, 128>}, {pipeline_mode = #tpu.pipeline_mode<synchronous>, transform_indices = @transform_6, window_bounds = array<i64: 384, 128>}]} {
    %c0 = arith.constant 0 : index
    %c0_0 = arith.constant 0 : index
    %0 = vector.load %arg1[%c0, %c0_0] : memref<384x384xbf16, #tpu.memory_space<vmem>>, vector<384x384xbf16>
    %c0_1 = arith.constant 0 : index
    %c0_2 = arith.constant 0 : index
    %1 = vector.load %arg2[%c0_1, %c0_2] : memref<384x128xbf16, #tpu.memory_space<vmem>>, vector<384x128xbf16>
    %c0_3 = arith.constant 0 : index
    %c0_4 = arith.constant 0 : index
    %2 = vector.load %arg3[%c0_3, %c0_4] : memref<128x128xbf16, #tpu.memory_space<vmem>>, vector<128x128xbf16>
    %cst = arith.constant dense<0.000000e+00> : vector<384x128xf32>
    %3 = tpu.matmul %1, %2, %cst {dimension_numbers = #tpu.dot_dimension_numbers<[1], [0], [0], [1], [0, 0, 1, 1], [], []>} : vector<384x128xbf16>, vector<128x128xbf16>, vector<384x128xf32> -> vector<384x128xf32>
    %4 = arith.truncf %3 : vector<384x128xf32> to vector<384x128xbf16>
    %cst_5 = arith.constant dense<0.000000e+00> : vector<384x128xf32>
    %5 = tpu.matmul %0, %4, %cst_5 {dimension_numbers = #tpu.dot_dimension_numbers<[1], [0], [0], [1], [0, 0, 1, 1], [], []>} : vector<384x384xbf16>, vector<384x128xbf16>, vector<384x128xf32> -> vector<384x128xf32>
    %c0_6 = arith.constant 0 : index
    %c0_7 = arith.constant 0 : index
    %6 = vector.load %arg4[%c0_6, %c0_7] : memref<1x128xf32, #tpu.memory_space<vmem>>, vector<1x128xf32>
    %7 = vector.broadcast %6 : vector<1x128xf32> to vector<384x128xf32>
    %8 = arith.addf %5, %7 : vector<384x128xf32>
    %cst_8 = arith.constant 0.000000e+00 : f32
    %9 = vector.broadcast %cst_8 : f32 to vector<384x128xf32>
    %10 = arith.maximumf %8, %9 : vector<384x128xf32>
    %11 = arith.truncf %10 : vector<384x128xf32> to vector<384x128xbf16>
    %c0_9 = arith.constant 0 : index
    %c0_10 = arith.constant 0 : index
    %12 = vector.load %arg5[%c0_9, %c0_10] : memref<128x128xbf16, #tpu.memory_space<vmem>>, vector<128x128xbf16>
    %cst_11 = arith.constant dense<0.000000e+00> : vector<384x128xf32>
    %13 = tpu.matmul %11, %12, %cst_11 {dimension_numbers = #tpu.dot_dimension_numbers<[1], [0], [0], [1], [0, 0, 1, 1], [], []>} : vector<384x128xbf16>, vector<128x128xbf16>, vector<384x128xf32> -> vector<384x128xf32>
    %14 = arith.truncf %13 : vector<384x128xf32> to vector<384x128xbf16>
    %cst_12 = arith.constant dense<0.000000e+00> : vector<384x128xf32>
    %15 = tpu.matmul %0, %14, %cst_12 {dimension_numbers = #tpu.dot_dimension_numbers<[1], [0], [0], [1], [0, 0, 1, 1], [], []>} : vector<384x384xbf16>, vector<384x128xbf16>, vector<384x128xf32> -> vector<384x128xf32>
    %c0_13 = arith.constant 0 : index
    %c0_14 = arith.constant 0 : index
    %16 = vector.load %arg6[%c0_13, %c0_14] : memref<1x128xf32, #tpu.memory_space<vmem>>, vector<1x128xf32>
    %17 = vector.broadcast %16 : vector<1x128xf32> to vector<384x128xf32>
    %18 = arith.addf %15, %17 : vector<384x128xf32>
    %19 = tpu.iota {dimensions = array<i32: 1>} : vector<384x128xi32>
    %c7_i32 = arith.constant 7 : i32
    %20 = vector.broadcast %c7_i32 : i32 to vector<384x128xi32>
    %21 = arith.cmpi slt, %19, %20 : vector<384x128xi32>
    %cst_15 = arith.constant 0xFF800000 : f32
    %22 = vector.broadcast %cst_15 : f32 to vector<384x128xf32>
    %23 = arith.select %21, %18, %22 : vector<384x128xi1>, vector<384x128xf32>
    %cst_16 = arith.constant dense<0xFF800000> : vector<384xf32>
    %24 = vector.multi_reduction <maximumf>, %23, %cst_16 [1] : vector<384x128xf32> to vector<384xf32>
    %25 = vector.shape_cast %24 : vector<384xf32> to vector<384x1xf32>
    %26 = vector.broadcast %25 : vector<384x1xf32> to vector<384x128xf32>
    %27 = arith.subf %23, %26 : vector<384x128xf32>
    %28 = math.exp %27 : vector<384x128xf32>
    %cst_17 = arith.constant 0.000000e+00 : f32
    %29 = vector.broadcast %cst_17 : f32 to vector<384x128xf32>
    %30 = arith.select %21, %28, %29 : vector<384x128xi1>, vector<384x128xf32>
    %cst_18 = arith.constant dense<0.000000e+00> : vector<384xf32>
    %31 = vector.multi_reduction <add>, %30, %cst_18 [1] : vector<384x128xf32> to vector<384xf32>
    %32 = vector.shape_cast %31 : vector<384xf32> to vector<384x1xf32>
    %33 = vector.broadcast %32 : vector<384x1xf32> to vector<384x128xf32>
    %34 = arith.divf %30, %33 : vector<384x128xf32>
    %c0_19 = arith.constant 0 : index
    %c0_20 = arith.constant 0 : index
    %35 = vector.load %arg7[%c0_19, %c0_20] : memref<384x128xf32, #tpu.memory_space<vmem>>, vector<384x128xf32>
    tpu.vector_store %arg7[%c0_19, %c0_20], %34 {strides = array<i32>} : memref<384x128xf32, #tpu.memory_space<vmem>>, vector<384x128xf32>,
    return
  }
  func.func @transform_0(%arg0: i32) -> (i32, i32) {
    %c0_i32 = arith.constant 0 : i32
    %c0_i32_0 = arith.constant 0 : i32
    %c0_i32_1 = arith.constant 0 : i32
    return %c0_i32, %c0_i32_0 : i32, i32
  }
  func.func @transform_1(%arg0: i32) -> (i32, i32) {
    %c0_i32 = arith.constant 0 : i32
    %c0_i32_0 = arith.constant 0 : i32
    %c0_i32_1 = arith.constant 0 : i32
    return %c0_i32, %c0_i32_0 : i32, i32
  }
  func.func @transform_2(%arg0: i32) -> (i32, i32) {
    %c0_i32 = arith.constant 0 : i32
    %c0_i32_0 = arith.constant 0 : i32
    %c0_i32_1 = arith.constant 0 : i32
    return %c0_i32, %c0_i32_0 : i32, i32
  }
  func.func @transform_3(%arg0: i32) -> (i32, i32) {
    %c0_i32 = arith.constant 0 : i32
    %c0_i32_0 = arith.constant 0 : i32
    %c0_i32_1 = arith.constant 0 : i32
    return %c0_i32, %c0_i32_0 : i32, i32
  }
  func.func @transform_4(%arg0: i32) -> (i32, i32) {
    %c0_i32 = arith.constant 0 : i32
    %c0_i32_0 = arith.constant 0 : i32
    %c0_i32_1 = arith.constant 0 : i32
    return %c0_i32, %c0_i32_0 : i32, i32
  }
  func.func @transform_5(%arg0: i32) -> (i32, i32) {
    %c0_i32 = arith.constant 0 : i32
    %c0_i32_0 = arith.constant 0 : i32
    %c0_i32_1 = arith.constant 0 : i32
    return %c0_i32, %c0_i32_0 : i32, i32
  }
  func.func @transform_6(%arg0: i32) -> (i32, i32) {
    %c0_i32 = arith.constant 0 : i32
    %c0_i32_0 = arith.constant 0 : i32
    %c0_i32_1 = arith.constant 0 : i32
    return %c0_i32, %c0_i32_0 : i32, i32
  }
}

</mosaic_0001>

<bundles_post_ra>
// kernel: tpu_custom_call.1
= control target key start
LH: loop header
LB: loop body
LE: loop exit
PB: predicated region body
PF: predicated region fallthrough
CT: control target
= control target key end

     0   :  { %11 = vsyncpa [#allocation3], 0  ;;  %s5688_s0 = inlined_call_operand.hbm [shape: bf16[384,384], index: 0, kind: input, shape index: {}]   ;;  %s5689_s1 = inlined_call_operand.hbm [shape: bf16[384,128], index: 1, kind: input, shape index: {}]   ;;  %s5690_s2 = inlined_call_operand.hbm [shape: bf16[128,128], index: 2, kind: input, shape index: {}]   ;;  %s5691_s3 = inlined_call_operand.vmem [shape: f32[1,128], index: 3, kind: input, shape index: {}]   ;;  %s5692_s4 = inlined_call_operand.hbm [shape: bf16[128,128], index: 4, kind: input, shape index: {}]   ;;  %s5693_s5 = inlined_call_operand.vmem [shape: f32[1,128], index: 5, kind: input, shape index: {}]   ;;  %s5694_s6 = inlined_call_operand.hbm [shape: f32[384,128], index: 6, kind: output, shape index: {}]  }
   0x1   :  { %12 = vsyncpa [#allocation6], 0 }
   0x2   :  { %13 = vsyncpa [#allocation9], 0  ;;  %s32_s23 = sshll.u32 %s5689_s1, 4  ;;  %s33_s23 = int_to_ptr.hbm [resolvable:$true] %s32_s23 }
   0x3   :  { %14 = vsyncpa [#allocation4], 0  ;;  %s4166_s24 = smov [#allocation5]   ;;  %s19_s28 = sshll.u32 %s5688_s0, 4  ;;  %s20_s28 = int_to_ptr.hbm [resolvable:$true] %s19_s28 }
   0x4   :  { %s34_s25 = sshll.u32 %s4166_s24, 4  ;;  %s4167_s29 = smov 64   ;;  %s35_s25 = int_to_ptr.vmem [resolvable:$true] %s34_s25 }
   0x5   :  { %s4168_s30 = smov 4   ;;  %s4169_s7 = smov [#allocation2]  }
   0x6   :  { %40 = dma.hbm_to_vmem [thread:$0]  %s33_s23, 3072, %s35_s25, [#allocation6], %s4167_s29, %s4167_s29, %s4168_s30  }
   0x7   :  { %s21_s8 = sshll.u32 %s4169_s7, 4  ;;  %s4170_s9 = smov 192   ;;  %s22_s8 = int_to_ptr.vmem [resolvable:$true] %s21_s8 }
   0x8   :  { %s4171_s10 = smov 12   ;;  %s45_s12 = sshll.u32 %s5690_s2, 4  ;;  %s46_s12 = int_to_ptr.hbm [resolvable:$true] %s45_s12 }
   0x9   :  { %27 = dma.hbm_to_vmem [thread:$0]  %s20_s28, 9216, %s22_s8, [#allocation3], %s4170_s9, %s4170_s9, %s4171_s10  }
   0xa   :  { %s4172_s13 = smov [#allocation7]   ;;  %s60_s16 = sshll.u32 %s5692_s4, 4  ;;  %s61_s16 = int_to_ptr.hbm [resolvable:$true] %s60_s16 }
   0xb   :  { %s47_s14 = sshll.u32 %s4172_s13, 4  ;;  %s4173_s17 = smov [#allocation8]   ;;  %s48_s14 = int_to_ptr.vmem [resolvable:$true] %s47_s14 }
   0xc   :  { %53 = dma.hbm_to_vmem [thread:$0]  %s46_s12, 1024, %s48_s14, [#allocation6], %s4167_s29, %s4167_s29, %s4168_s30  }
   0xd   :  { %s62_s18 = sshll.u32 %s4173_s17, 4  ;;  %s63_s18 = int_to_ptr.vmem [resolvable:$true] %s62_s18 }
   0xe   :  { %68 = dma.hbm_to_vmem [thread:$0]  %s61_s16, 1024, %s63_s18, [#allocation9], %s4167_s29, %s4167_s29, %s4168_s30  }
   0xf   :  { %4158 = dma.done.wait [#allocation3], 9216  }
  0x10   :  { %4159 = vsyncadd [#allocation3], 4294958080 }
  0x11   :  { %4160 = dma.done.wait [#allocation6], 4096  }
  0x12   :  { %4161 = vsyncadd [#allocation6], 4294963200 }
  0x13   :  { %4162 = dma.done.wait [#allocation9], 1024  }
  0x14   :  { %4163 = vsyncadd [#allocation9], 4294966272  ;;  %v3822_v0 = vld [vmem:[#allocation7 + $0x38] sm:$0xff]  ;;  %v3821_v1 = vld [vmem:[#allocation7 + $0x30] sm:$0xff]  ;;  %s3256_s27 = sshll.u32 %s5694_s6, 4  ;;  %s4175_s28 = smov 128   ;;  %s3257_s27 = int_to_ptr.hbm [resolvable:$true] %s3256_s27 }
  0x15   :  { %439 = vmatpush.bf16.msra.mxu0 %v3822_v0  ;;  %v3820_v2 = vld [vmem:[#allocation7 + $0x28] sm:$0xff]  ;;  %v3819_v3 = vld [vmem:[#allocation7 + $0x20] sm:$0xff]  ;;  %v3818_v4 = vld [vmem:[#allocation7 + $0x18] sm:$0xff]  ;;  %s4176_s29 = smov 8  }
  0x16   :  { %v3817_v5 = vld [vmem:[#allocation7 + $0x10] sm:$0xff]  ;;  %v3816_v6 = vld [vmem:[#allocation7 + $0x8] sm:$0xff]  ;;  %v3815_v7 = vld [vmem:[#allocation7] sm:$0xff] }
  0x17   :  { %v3791_v8 = vld [vmem:[#allocation5] sm:$0xff]  ;;  %v3792_v9 = vld [vmem:[#allocation5 + $0x8] sm:$0xff]  ;;  %v3793_v10 = vld [vmem:[#allocation5 + $0x10] sm:$0xff] }
  0x18   :  { %v3794_v11 = vld [vmem:[#allocation5 + $0x18] sm:$0xff]  ;;  %v3795_v12 = vld [vmem:[#allocation5 + $0x20] sm:$0xff]  ;;  %v3796_v13 = vld [vmem:[#allocation5 + $0x28] sm:$0xff] }
  0x19   :  { %440 = vmatpush.bf16.msra.mxu0 %v3821_v1  ;;  %v3797_v14 = vld [vmem:[#allocation5 + $0x30] sm:$0xff]  ;;  %v3798_v15 = vld [vmem:[#allocation5 + $0x38] sm:$0xff]  ;;  %v3799_v16 = vld [vmem:[#allocation5 + $0x40] sm:$0xff] }
  0x1a   :  { %v3800_v20 = vld [vmem:[#allocation5 + $0x48] sm:$0xff]  ;;  %v3801_v24 = vld [vmem:[#allocation5 + $0x50] sm:$0xff]  ;;  %v3802_v28 = vld [vmem:[#allocation5 + $0x58] sm:$0xff] }
  0x1b   :  { %v3803_v32 = vld [vmem:[#allocation5 + $0x60] sm:$0xff]  ;;  %v3804_v35 = vld [vmem:[#allocation5 + $0x68] sm:$0xff]  ;;  %v3805_v38 = vld [vmem:[#allocation5 + $0x70] sm:$0xff] }
  0x1c   :  { %v3806_v41 = vld [vmem:[#allocation5 + $0x78] sm:$0xff]  ;;  %v3807_v46 = vld [vmem:[#allocation5 + $0x80] sm:$0xff]  ;;  %v3808_v52 = vld [vmem:[#allocation5 + $0x88] sm:$0xff] }
  0x1d   :  { %441 = vmatpush.bf16.msra.mxu0 %v3820_v2  ;;  %v3809_v56 = vld [vmem:[#allocation5 + $0x90] sm:$0xff]  ;;  %v3810_v60 = vld [vmem:[#allocation5 + $0x98] sm:$0xff]  ;;  %v3811_v0 = vld [vmem:[#allocation5 + $0xa0] sm:$0xff] }
  0x21   :  { %442 = vmatpush.bf16.msra.mxu0 %v3819_v3  ;;  %v3812_v3 = vld [vmem:[#allocation5 + $0xa8] sm:$0xff] }
  0x25   :  { %443 = vmatpush.bf16.msra.mxu0 %v3818_v4 }
  0x29   :  { %444 = vmatpush.bf16.msra.mxu0 %v3817_v5 }
  0x2d   :  { %445 = vmatpush.bf16.msra.mxu0 %v3816_v6  ;;  %v3813_v6 = vld [vmem:[#allocation5 + $0xb0] sm:$0xff] }
  0x31   :  { %446 = vmatpush.bf16.msra.mxu0 %v3815_v7 }
  0x34   :  { %447 = vmatmul.bf16.vlgmr.msra.gmra.mxu0 %v3791_v8 }
  0x44   :  { %452 = vmatmul.bf16.gmra.mxu0 %v3792_v9  ;;  %v3814_v9 = vld [vmem:[#allocation5 + $0xb8] sm:$0xff] }
  0x54   :  { %457 = vmatmul.bf16.gmra.mxu0 %v3793_v10 }
  0x64   :  { %462 = vmatmul.bf16.gmra.mxu0 %v3794_v11 }
  0x74   :  { %467 = vmatmul.bf16.gmra.mxu0 %v3795_v12 }
  0x84   :  { %472 = vmatmul.bf16.gmra.mxu0 %v3796_v13 }
  0x94   :  { %477 = vmatmul.bf16.gmra.mxu0 %v3797_v14 }
  0xa4   :  { %482 = vmatmul.bf16.gmra.mxu0 %v3798_v15 }
  0xb1   :  { %v448_v17 = vpop.f32.mrf.mxu0 }
  0xb4   :  { %487 = vmatmul.bf16.gmra.mxu0 %v3799_v16 }
  0xb9   :  { %v450_v18 = vpop.f32.mrf.mxu0 }
  0xba   :  { %v568_v19 = vpack.c.bf16 %v450_v18, %v448_v17 }
  0xc1   :  { %v453_v21 = vpop.f32.mrf.mxu0 }
  0xc4   :  { %492 = vmatmul.bf16.gmra.mxu0 %v3800_v20 }
  0xc9   :  { %v455_v22 = vpop.f32.mrf.mxu0 }
  0xca   :  { %v569_v23 = vpack.c.bf16 %v455_v22, %v453_v21 }
  0xd1   :  { %v458_v25 = vpop.f32.mrf.mxu0 }
  0xd4   :  { %497 = vmatmul.bf16.gmra.mxu0 %v3801_v24 }
  0xd9   :  { %v460_v26 = vpop.f32.mrf.mxu0 }
  0xda   :  { %v570_v27 = vpack.c.bf16 %v460_v26, %v458_v25 }
  0xe1   :  { %v463_v29 = vpop.f32.mrf.mxu0 }
  0xe4   :  { %502 = vmatmul.bf16.gmra.mxu0 %v3802_v28 }
  0xe9   :  { %v465_v30 = vpop.f32.mrf.mxu0 }
  0xea   :  { %v571_v31 = vpack.c.bf16 %v465_v30, %v463_v29  ;;  %v3719_v30 = vld [vmem:[#allocation2 + $0x4] sm:$0xf] }
  0xf1   :  { %v468_v33 = vpop.f32.mrf.mxu0 }
  0xf4   :  { %507 = vmatmul.bf16.gmra.mxu0 %v3803_v32 }
  0xf9   :  { %v470_v34 = vpop.f32.mrf.mxu0 }
  0xfa   :  { %v572_v49 = vpack.c.bf16 %v470_v34, %v468_v33  ;;  %v3401_v34 = vld [vmem:[#allocation2] sm:$0xf] }
 0x101   :  { %v473_v36 = vpop.f32.mrf.mxu0 }
 0x104   :  { %512 = vmatmul.bf16.gmra.mxu0 %v3804_v35  ;;  %v3720_v35 = vld [vmem:[#allocation2 + $0x8] sm:$0xf0] }
 0x109   :  { %v475_v37 = vpop.f32.mrf.mxu0 }
 0x10a   :  { %v573_v48 = vpack.c.bf16 %v475_v37, %v473_v36  ;;  %v4229_v36 = vor.u32 %v3720_v35, %v3401_v34  ;;  %v3740_v34 = vld [vmem:[#allocation2 + $0xac] sm:$0xf]  ;;  %v3487_v35 = vld [vmem:[#allocation2 + $0xb4] sm:$0xf0] }
 0x111   :  { %v478_v39 = vpop.f32.mrf.mxu0 }
 0x114   :  { %517 = vmatmul.bf16.gmra.mxu0 %v3805_v38 }
 0x119   :  { %v480_v40 = vpop.f32.mrf.mxu0 }
 0x11a   :  { %v574_v45 = vpack.c.bf16 %v480_v40, %v478_v39  ;;  %v3722_v39 = vld [vmem:[#allocation2 + $0x1c] sm:$0xf]  ;;  %v3415_v40 = vld [vmem:[#allocation2 + $0x24] sm:$0xf0] }
 0x121   :  { %v483_v42 = vpop.f32.mrf.mxu0 }
 0x124   :  { %522 = vmatmul.bf16.gmra.mxu0 %v3806_v41  ;;  %v4232_v41 = vor.u32 %v3722_v39, %v3415_v40  ;;  %v3741_v39 = vld [vmem:[#allocation2 + $0xb0] sm:$0xf0] }
 0x129   :  { %v485_v43 = vpop.f32.mrf.mxu0 }
 0x12a   :  { %v575_v44 = vpack.c.bf16 %v485_v43, %v483_v42  ;;  %v3413_v43 = vld [vmem:[#allocation2 + $0x18] sm:$0xf] }
 0x12c   :  { %980 = vmatpush.bf16.msra.mxu1 %v575_v44  ;;  %v3723_v44 = vld [vmem:[#allocation2 + $0x20] sm:$0xf0] }
 0x130   :  { %981 = vmatpush.bf16.msra.mxu1 %v574_v45  ;;  %v4235_v45 = vor.u32 %v3723_v44, %v3413_v43  ;;  %v3736_v43 = vld [vmem:[#allocation2 + $0x88] sm:$0xf0] }
 0x131   :  { %v488_v47 = vpop.f32.mrf.mxu0 }
 0x134   :  { %527 = vmatmul.bf16.gmra.mxu0 %v3807_v46  ;;  %982 = vmatpush.bf16.msra.mxu1 %v573_v48 }
 0x138   :  { %983 = vmatpush.bf16.msra.mxu1 %v572_v49  ;;  %v3725_v49 = vld [vmem:[#allocation2 + $0x34] sm:$0xf] }
 0x139   :  { %v490_v50 = vpop.f32.mrf.mxu0 }
 0x13a   :  { %v576_v51 = vpack.c.bf16 %v490_v50, %v488_v47  ;;  %v3427_v50 = vld [vmem:[#allocation2 + $0x3c] sm:$0xf0] }
 0x13c   :  { %984 = vmatpush.bf16.msra.mxu1 %v571_v31  ;;  %v3403_v31 = vld [vmem:[#allocation2 + $0xc] sm:$0xf0] }
 0x13d   :  { %v4226_v32 = vor.u32 %v3719_v30, %v3403_v31  ;;  %v3457_v30 = vld [vmem:[#allocation2 + $0x68] sm:$0xf]  ;;  %v3733_v31 = vld [vmem:[#allocation2 + $0x70] sm:$0xf0] }
 0x140   :  { %985 = vmatpush.bf16.msra.mxu1 %v570_v27 }
 0x141   :  { %v493_v53 = vpop.f32.mrf.mxu0 }
 0x144   :  { %532 = vmatmul.bf16.gmra.mxu0 %v3808_v52  ;;  %986 = vmatpush.bf16.msra.mxu1 %v569_v23 }
 0x148   :  { %987 = vmatpush.bf16.msra.mxu1 %v568_v19 }
 0x149   :  { %v495_v54 = vpop.f32.mrf.mxu0 }
 0x14a   :  { %v577_v55 = vpack.c.bf16 %v495_v54, %v493_v53  ;;  %v3425_v53 = vld [vmem:[#allocation2 + $0x30] sm:$0xf]  ;;  %v3726_v54 = vld [vmem:[#allocation2 + $0x38] sm:$0xf0] }
 0x14b   :  { %988 = vmatmul.bf16.vlgmr.msra.gmra.mxu1 %v4229_v36 }
 0x151   :  { %v498_v57 = vpop.f32.mrf.mxu0 }
 0x154   :  { %537 = vmatmul.bf16.gmra.mxu0 %v3809_v56 }
 0x159   :  { %v500_v58 = vpop.f32.mrf.mxu0 }
 0x15a   :  { %v578_v59 = vpack.c.bf16 %v500_v58, %v498_v57  ;;  %v3409_v57 = vld [vmem:[#allocation2 + $0x8] sm:$0xf]  ;;  %v3721_v58 = vld [vmem:[#allocation2 + $0x10] sm:$0xf0] }
 0x15b   :  { %993 = vmatmul.bf16.gmra.mxu1 %v4235_v45 }
 0x161   :  { %v503_v61 = vpop.f32.mrf.mxu0 }
 0x164   :  { %542 = vmatmul.bf16.gmra.mxu0 %v3810_v60  ;;  %v4245_v60 = vor.u32 %v3721_v58, %v3409_v57  ;;  %v3481_v58 = vld [vmem:[#allocation2 + $0x98] sm:$0xf] }
 0x169   :  { %v505_v62 = vpop.f32.mrf.mxu0 }
 0x16a   :  { %v579_v63 = vpack.c.bf16 %v505_v62, %v503_v61  ;;  %v3728_v61 = vld [vmem:[#allocation2 + $0x4c] sm:$0xf]  ;;  %v3439_v62 = vld [vmem:[#allocation2 + $0x54] sm:$0xf0] }
 0x171   :  { %v508_v1 = vpop.f32.mrf.mxu0 }
 0x174   :  { %547 = vmatmul.bf16.gmra.mxu0 %v3811_v0  ;;  %v3437_v0 = vld [vmem:[#allocation2 + $0x48] sm:$0xf] }
 0x179   :  { %v510_v2 = vpop.f32.mrf.mxu0 }
 0x17a   :  { %v580_v16 = vpack.c.bf16 %v510_v2, %v508_v1  ;;  %v3729_v1 = vld [vmem:[#allocation2 + $0x50] sm:$0xf0] }
 0x17b   :  { %v4251_v2 = vor.u32 %v3729_v1, %v3437_v0 }
 0x181   :  { %v513_v4 = vpop.f32.mrf.mxu0 }
 0x184   :  { %552 = vmatmul.bf16.gmra.mxu0 %v3812_v3  ;;  %v3421_v3 = vld [vmem:[#allocation2 + $0x20] sm:$0xf] }
 0x189   :  { %v515_v5 = vpop.f32.mrf.mxu0 }
 0x18a   :  { %v581_v15 = vpack.c.bf16 %v515_v5, %v513_v4  ;;  %v3724_v4 = vld [vmem:[#allocation2 + $0x28] sm:$0xf0] }
 0x18b   :  { %v4254_v5 = vor.u32 %v3724_v4, %v3421_v3  ;;  %v3826_v4 = vld [vmem:[#allocation8 + $0x18] sm:$0xff] }
 0x18d   :  { %5745 = vst [vmem:[#allocation15_spill] sm:$0xff] %v4254_v5 }
 0x191   :  { %v518_v7 = vpop.f32.mrf.mxu0 }
 0x194   :  { %557 = vmatmul.bf16.gmra.mxu0 %v3813_v6  ;;  %v3731_v6 = vld [vmem:[#allocation2 + $0x64] sm:$0xf] }
 0x199   :  { %v520_v8 = vpop.f32.mrf.mxu0 }
 0x19a   :  { %v582_v13 = vpack.c.bf16 %v520_v8, %v518_v7  ;;  %v3451_v7 = vld [vmem:[#allocation2 + $0x6c] sm:$0xf0] }
 0x19b   :  { %v4257_v8 = vor.u32 %v3731_v6, %v3451_v7  ;;  %v3746_v6 = vld [vmem:[#allocation2 + $0xdc] sm:$0xf]  ;;  %v3511_v7 = vld [vmem:[#allocation2 + $0xe4] sm:$0xf0] }
 0x1a1   :  { %v523_v10 = vpop.f32.mrf.mxu0 }
 0x1a4   :  { %562 = vmatmul.bf16.gmra.mxu0 %v3814_v9  ;;  %v3449_v9 = vld [vmem:[#allocation2 + $0x60] sm:$0xf] }
 0x1a9   :  { %v525_v11 = vpop.f32.mrf.mxu0 }
 0x1aa   :  { %v583_v12 = vpack.c.bf16 %v525_v11, %v523_v10  ;;  %v3732_v10 = vld [vmem:[#allocation2 + $0x68] sm:$0xf0] }
 0x1ab   :  { %v4260_v11 = vor.u32 %v3732_v10, %v3449_v9  ;;  %v4302_v9 = vor.u32 %v3746_v6, %v3511_v7  ;;  %v3825_v10 = vld [vmem:[#allocation8 + $0x10] sm:$0xff] }
 0x1ac   :  { %1109 = vmatpush.bf16.msra.mxu2 %v583_v12  ;;  %v3433_v12 = vld [vmem:[#allocation2 + $0x38] sm:$0xf] }
 0x1ad   :  { %5751 = vst [vmem:[#allocation21_spill] sm:$0xff] %v4302_v9 }
 0x1b0   :  { %1110 = vmatpush.bf16.msra.mxu2 %v582_v13  ;;  %v3727_v13 = vld [vmem:[#allocation2 + $0x40] sm:$0xf0] }
 0x1b1   :  { %v4224_v14 = vpop.f32.mrf.mxu0 }
 0x1b4   :  { %1111 = vmatpush.bf16.msra.mxu2 %v581_v15  ;;  %v3734_v15 = vld [vmem:[#allocation2 + $0x7c] sm:$0xf] }
 0x1b8   :  { %1112 = vmatpush.bf16.msra.mxu2 %v580_v16  ;;  %v3463_v16 = vld [vmem:[#allocation2 + $0x84] sm:$0xf0] }
 0x1b9   :  { %v530_v17 = vpop.f32.mrf.mxu0 }
 0x1bc   :  { %1113 = vmatpush.bf16.msra.mxu2 %v579_v63  ;;  %v4248_v63 = vor.u32 %v3728_v61, %v3439_v62  ;;  %v3827_v62 = vld [vmem:[#allocation8 + $0x20] sm:$0xff] }
 0x1c0   :  { %1114 = vmatpush.bf16.msra.mxu2 %v578_v59  ;;  %v584_v59 = vpack.c.bf16 %v530_v17, %v4224_v14  ;;  %v4263_v14 = vor.u32 %v3727_v13, %v3433_v12  ;;  %v4266_v17 = vor.u32 %v3734_v15, %v3463_v16  ;;  %v3509_v12 = vld [vmem:[#allocation2 + $0xd8] sm:$0xf]  ;;  %v3747_v13 = vld [vmem:[#allocation2 + $0xe0] sm:$0xf0] }
 0x1c1   :  { %v533_v18 = vpop.f32.mrf.mxu0  ;;  %v4305_v16 = vor.u32 %v3747_v13, %v3509_v12  ;;  %v3753_v12 = vld [vmem:[#allocation2 + $0x110] sm:$0xf0] }
 0x1c2   :  { %5746 = vst [vmem:[#allocation16_spill] sm:$0xff] %v4263_v14 }
 0x1c4   :  { %1115 = vmatpush.bf16.msra.mxu2 %v577_v55  ;;  %v4241_v55 = vor.u32 %v3726_v54, %v3425_v53  ;;  %v3744_v53 = vld [vmem:[#allocation2 + $0xc8] sm:$0xf0] }
 0x1c6   :  { %998 = vmatmul.bf16.gmra.mxu1 %v4241_v55 }
 0x1c8   :  { %1116 = vmatpush.bf16.msra.mxu2 %v576_v51  ;;  %v4238_v51 = vor.u32 %v3725_v49, %v3427_v50  ;;  %v3829_v50 = vld [vmem:[#allocation8 + $0x30] sm:$0xff]  ;;  %v989_v57 = vpop.f32.mrf.mxu1 }
 0x1c9   :  { %v535_v19 = vpop.f32.mrf.mxu0 }
 0x1ca   :  { %v585_v56 = vpack.c.bf16 %v535_v19, %v533_v18  ;;  %v3461_v18 = vld [vmem:[#allocation2 + $0x78] sm:$0xf]  ;;  %v3735_v19 = vld [vmem:[#allocation2 + $0x80] sm:$0xf0] }
 0x1cb   :  { %1117 = vmatmul.bf16.vlgmr.msra.gmra.mxu2 %v4226_v32 }
 0x1d0   :  { %v991_v1 = vpop.f32.mrf.mxu1 }
 0x1d1   :  { %v538_v20 = vpop.f32.mrf.mxu0 }
 0x1d6   :  { %1003 = vmatmul.bf16.gmra.mxu1 %v4251_v2 }
 0x1d8   :  { %v994_v15 = vpop.f32.mrf.mxu1 }
 0x1d9   :  { %v540_v21 = vpop.f32.mrf.mxu0 }
 0x1da   :  { %v586_v52 = vpack.c.bf16 %v540_v21, %v538_v20  ;;  %v4269_v20 = vor.u32 %v3735_v19, %v3461_v18  ;;  %v3445_v21 = vld [vmem:[#allocation2 + $0x50] sm:$0xf]  ;;  %v3742_v19 = vld [vmem:[#allocation2 + $0xb8] sm:$0xf0] }
 0x1db   :  { %1122 = vmatmul.bf16.gmra.mxu2 %v4232_v41  ;;  %v3493_v18 = vld [vmem:[#allocation2 + $0xb0] sm:$0xf] }
 0x1e1   :  { %v543_v22 = vpop.f32.mrf.mxu0 }
 0x1e6   :  { %1008 = vmatmul.bf16.gmra.mxu1 %v4260_v11 }
 0x1e9   :  { %v545_v23 = vpop.f32.mrf.mxu0 }
 0x1ea   :  { %v587_v48 = vpack.c.bf16 %v545_v23, %v543_v22  ;;  %v3730_v22 = vld [vmem:[#allocation2 + $0x58] sm:$0xf0] }
 0x1eb   :  { %1127 = vmatmul.bf16.gmra.mxu2 %v4238_v51  ;;  %v4272_v23 = vor.u32 %v3730_v22, %v3445_v21  ;;  %v3824_v22 = vld [vmem:[#allocation8 + $0x8] sm:$0xff] }
 0x1ed   :  { %5747 = vst [vmem:[#allocation17_spill] sm:$0xff] %v4272_v23 }
 0x1f1   :  { %v548_v24 = vpop.f32.mrf.mxu0 }
 0x1f6   :  { %1013 = vmatmul.bf16.gmra.mxu1 %v4269_v20 }
 0x1f9   :  { %v550_v25 = vpop.f32.mrf.mxu0 }
 0x1fa   :  { %v588_v47 = vpack.c.bf16 %v550_v25, %v548_v24  ;;  %v3737_v24 = vld [vmem:[#allocation2 + $0x94] sm:$0xf]  ;;  %v3475_v25 = vld [vmem:[#allocation2 + $0x9c] sm:$0xf0] }
 0x1fb   :  { %1132 = vmatmul.bf16.gmra.mxu2 %v4248_v63 }
 0x201   :  { %v553_v26 = vpop.f32.mrf.mxu0 }
 0x209   :  { %v555_v27 = vpop.f32.mrf.mxu0 }
 0x20a   :  { %v589_v46 = vpack.c.bf16 %v555_v27, %v553_v26  ;;  %v4275_v26 = vor.u32 %v3737_v24, %v3475_v25  ;;  %v3473_v27 = vld [vmem:[#allocation2 + $0x90] sm:$0xf]  ;;  %v4308_v24 = vor.u32 %v3742_v19, %v3493_v18  ;;  %v3823_v25 = vld [vmem:[#allocation8] sm:$0xff] }
 0x20b   :  { %1137 = vmatmul.bf16.gmra.mxu2 %v4257_v8  ;;  %v3517_v19 = vld [vmem:[#allocation2 + $0xe0] sm:$0xf] }
 0x20c   :  { %5752 = vst [vmem:[#allocation22_spill] sm:$0xff] %v4308_v24 }
 0x211   :  { %v558_v28 = vpop.f32.mrf.mxu0 }
 0x219   :  { %v560_v29 = vpop.f32.mrf.mxu0 }
 0x21a   :  { %v590_v42 = vpack.c.bf16 %v560_v29, %v558_v28  ;;  %v3738_v28 = vld [vmem:[#allocation2 + $0x98] sm:$0xf0] }
 0x21b   :  { %1142 = vmatmul.bf16.gmra.mxu2 %v4266_v17  ;;  %v4278_v29 = vor.u32 %v3738_v28, %v3473_v27  ;;  %v996_v27 = vpop.f32.mrf.mxu1 }
 0x21d   :  { %1018 = vmatmul.bf16.gmra.mxu1 %v4278_v29 }
 0x221   :  { %v563_v33 = vpop.f32.mrf.mxu0 }
 0x229   :  { %v565_v37 = vpop.f32.mrf.mxu0 }
 0x22a   :  { %v591_v38 = vpack.c.bf16 %v565_v37, %v563_v33  ;;  %v4281_v33 = vor.u32 %v3733_v31, %v3457_v30  ;;  %v4284_v37 = vor.u32 %v3740_v34, %v3487_v35  ;;  %v3749_v30 = vld [vmem:[#allocation2 + $0xf4] sm:$0xf]  ;;  %v3523_v31 = vld [vmem:[#allocation2 + $0xfc] sm:$0xf0]  ;;  %v3521_v35 = vld [vmem:[#allocation2 + $0xf0] sm:$0xf] }
 0x22b   :  { %1147 = vmatmul.bf16.gmra.mxu2 %v4275_v26  ;;  %v4311_v34 = vor.u32 %v3749_v30, %v3523_v31 }
 0x22c   :  { %1238 = vmatpush.bf16.msra.mxu3 %v591_v38  ;;  %5748 = vst [vmem:[#allocation18_spill] sm:$0xff] %v4281_v33  ;;  %v3485_v38 = vld [vmem:[#allocation2 + $0xa8] sm:$0xf] }
 0x22d   :  { %v4287_v40 = vor.u32 %v3741_v39, %v3485_v38  ;;  %5753 = vst [vmem:[#allocation23_spill] sm:$0xff] %v4311_v34  ;;  %v3750_v38 = vld [vmem:[#allocation2 + $0xf8] sm:$0xf0] }
 0x22f   :  { %1023 = vmatmul.bf16.gmra.mxu1 %v4287_v40 }
 0x230   :  { %1239 = vmatpush.bf16.msra.mxu3 %v590_v42  ;;  %v3469_v42 = vld [vmem:[#allocation2 + $0x80] sm:$0xf] }
 0x231   :  { %v4290_v44 = vor.u32 %v3736_v43, %v3469_v42  ;;  %v4316_v42 = vor.u32 %v3750_v38, %v3521_v35  ;;  %v3505_v43 = vld [vmem:[#allocation2 + $0xc8] sm:$0xf] }
 0x233   :  { %5749 = vst [vmem:[#allocation19_spill] sm:$0xff] %v4290_v44 }
 0x234   :  { %1240 = vmatpush.bf16.msra.mxu3 %v589_v46  ;;  %v3830_v46 = vld [vmem:[#allocation8 + $0x38] sm:$0xff] }
 0x235   :  { %1503 = vmatpush.bf16.msrb.mxu0 %v3830_v46  ;;  %v3745_v46 = vld [vmem:[#allocation2 + $0xd0] sm:$0xf0] }
 0x238   :  { %1241 = vmatpush.bf16.msra.mxu3 %v588_v47  ;;  %v3743_v47 = vld [vmem:[#allocation2 + $0xc4] sm:$0xf] }
 0x239   :  { %1504 = vmatpush.bf16.msrb.mxu0 %v3829_v50  ;;  %v4326_v50 = vld [vmem:[%s5691_s3] ss:$0 sm:$0xff] }
 0x23a   :  { %v992_v7 = vadd.f32 %v4326_v50, %v991_v1 }
 0x23b   :  { %1152 = vmatmul.bf16.gmra.mxu2 %v4284_v37 }
 0x23c   :  { %1242 = vmatpush.bf16.msra.mxu3 %v587_v48  ;;  %v3499_v48 = vld [vmem:[#allocation2 + $0xcc] sm:$0xf0] }
 0x23d   :  { %v4293_v49 = vor.u32 %v3743_v47, %v3499_v48  ;;  %v4321_v48 = vor.u32 %v3745_v46, %v3505_v43 }
 0x23f   :  { %5754 = vst [vmem:[#allocation24_spill] sm:$0xff] %v4321_v48 }
 0x240   :  { %1243 = vmatpush.bf16.msra.mxu3 %v586_v52  ;;  %v3497_v52 = vld [vmem:[#allocation2 + $0xc0] sm:$0xf] }
 0x241   :  { %v4296_v54 = vor.u32 %v3744_v53, %v3497_v52 }
 0x243   :  { %1028 = vmatmul.bf16.gmra.mxu1 %v4296_v54  ;;  %v4314_v39 = vpop.f32.mrf.mxu1 }
 0x244   :  { %1244 = vmatpush.bf16.msra.mxu3 %v585_v56  ;;  %v3828_v56 = vld [vmem:[#allocation8 + $0x28] sm:$0xff] }
 0x245   :  { %1505 = vmatpush.bf16.msrb.mxu0 %v3828_v56  ;;  %v990_v56 = vadd.f32 %v4326_v50, %v989_v57 }
 0x248   :  { %1245 = vmatpush.bf16.msra.mxu3 %v584_v59  ;;  %v3739_v59 = vld [vmem:[#allocation2 + $0xa0] sm:$0xf0] }
 0x249   :  { %v4299_v0 = vor.u32 %v3739_v59, %v3481_v58  ;;  %1506 = vmatpush.bf16.msrb.mxu0 %v3827_v62  ;;  %v3752_v59 = vld [vmem:[#allocation2 + $0x10c] sm:$0xf]  ;;  %v3535_v62 = vld [vmem:[#allocation2 + $0x114] sm:$0xf0] }
 0x24b   :  { %1246 = vmatmul.bf16.vlgmr.msra.gmra.mxu3 %v4245_v60  ;;  %1157 = vmatmul.bf16.gmra.mxu2 %v4293_v49  ;;  %5750 = vst [vmem:[#allocation20_spill] sm:$0xff] %v4299_v0  ;;  %v4328_v52 = vpop.f32.mrf.mxu1 }
 0x24d   :  { %1507 = vmatpush.bf16.msrb.mxu0 %v3826_v4  ;;  %v4334_v4 = vor.u32 %v3752_v59, %v3535_v62  ;;  %v995_v59 = vadd.f32 %v4326_v50, %v994_v15  ;;  %v3547_v62 = vld [vmem:[#allocation2 + $0x12c] sm:$0xf0] }
 0x24e   :  { %v1118_v61 = vpop.f32.mrf.mxu2 }
 0x24f   :  { %5755 = vst [vmem:[#allocation25_spill] sm:$0xff] %v4334_v4  ;;  %v1119_v6 = vadd.f32 %v1118_v61, %v990_v56 }
 0x251   :  { %1508 = vmatpush.bf16.msrb.mxu0 %v3825_v10  ;;  %v3533_v10 = vld [vmem:[#allocation2 + $0x108] sm:$0xf] }
 0x252   :  { %v4340_v18 = vor.u32 %v3753_v12, %v3533_v10  ;;  %v997_v10 = vadd.f32 %v4326_v50, %v996_v27  ;;  %v3545_v12 = vld [vmem:[#allocation2 + $0x120] sm:$0xf] }
 0x253   :  { %1033 = vmatmul.bf16.gmra.mxu1 %v4305_v16  ;;  %v4338_v13 = vpop.f32.mrf.mxu1 }
 0x255   :  { %1509 = vmatpush.bf16.msrb.mxu0 %v3824_v22  ;;  %v3748_v22 = vld [vmem:[#allocation2 + $0xe8] sm:$0xf0] }
 0x256   :  { %v1120_v3 = vpop.f32.mrf.mxu2  ;;  %v4345_v35 = vor.u32 %v3748_v22, %v3517_v19  ;;  %v3756_v19 = vld [vmem:[#allocation2 + $0x128] sm:$0xf0] }
 0x257   :  { %v1121_v57 = vadd.f32 %v1120_v3, %v992_v7 }
 0x258   :  { %5756 = vst [vmem:[#allocation26_spill] sm:$0xff] %v4345_v35 }
 0x259   :  { %1510 = vmatpush.bf16.msrb.mxu0 %v3823_v25 }
 0x25b   :  { %1251 = vmatmul.bf16.gmra.mxu3 %v4254_v5  ;;  %1162 = vmatmul.bf16.gmra.mxu2 %v4302_v9  ;;  %v4347_v43 = vpop.f32.mrf.mxu1 }
 0x25e   :  { %v1123_v21 = vpop.f32.mrf.mxu2 }
 0x25f   :  { %v1124_v7 = vadd.f32 %v1123_v21, %v995_v59 }
 0x263   :  { %1038 = vmatmul.bf16.gmra.mxu1 %v4316_v42  ;;  %v4357_v22 = vpop.f32.mrf.mxu1 }
 0x266   :  { %v1125_v28 = vpop.f32.mrf.mxu2 }
 0x26b   :  { %1256 = vmatmul.bf16.gmra.mxu3 %v4263_v14  ;;  %1167 = vmatmul.bf16.gmra.mxu2 %v4311_v34 }
 0x26e   :  { %v4318_v47 = vpop.f32.mrf.mxu2 }
 0x273   :  { %1043 = vmatmul.bf16.gmra.mxu1 %v4340_v18 }
 0x276   :  { %v4331_v53 = vpop.f32.mrf.mxu2 }
 0x27b   :  { %1261 = vmatmul.bf16.gmra.mxu3 %v4272_v23  ;;  %1172 = vmatmul.bf16.gmra.mxu2 %v4334_v4 }
 0x27e   :  { %v4342_v25 = vpop.f32.mrf.mxu2 }
 0x286   :  { %v4350_v56 = vpop.f32.mrf.mxu2 }
 0x28b   :  { %1266 = vmatmul.bf16.gmra.mxu3 %v4281_v33 }
 0x28e   :  { %v4361_v15 = vpop.f32.mrf.mxu2 }
 0x29b   :  { %1271 = vmatmul.bf16.gmra.mxu3 %v4290_v44 }
 0x2ab   :  { %1276 = vmatmul.bf16.gmra.mxu3 %v4299_v0 }
 0x2bb   :  { %1281 = vmatmul.bf16.gmra.mxu3 %v4308_v24 }
 0x2cb   :  { %1286 = vmatmul.bf16.gmra.mxu3 %v4321_v48  ;;  %v1005_v48 = vadd.f32 %v4326_v50, %v4338_v13  ;;  %v3553_v13 = vld [vmem:[#allocation2 + $0x128] sm:$0xf] }
 0x2ce   :  { %v1247_v58 = vpop.f32.mrf.mxu3 }
 0x2cf   :  { %v1248_v30 = vadd.f32 %v1247_v58, %v1119_v6  ;;  %v3755_v58 = vld [vmem:[#allocation2 + $0x124] sm:$0xf] }
 0x2d0   :  { %v4353_v6 = vor.u32 %v3755_v58, %v3547_v62  ;;  %v4366_v58 = vpop.f32.mrf.mxu1 }
 0x2d1   :  { %v1367_v1 = vmax.f32 %v1248_v30, 0.0  ;;  %v3529_v30 = vld [vmem:[#allocation2 + $0xf8] sm:$0xf] }
 0x2d2   :  { %5757 = vst [vmem:[#allocation27_spill] sm:$0xff] %v4353_v6  ;;  %1177 = vmatmul.bf16.gmra.mxu2 %v4353_v6 }
 0x2d6   :  { %v1249_v31 = vpop.f32.mrf.mxu3 }
 0x2d7   :  { %v1250_v61 = vadd.f32 %v1249_v31, %v1121_v57  ;;  %v4359_v57 = vor.u32 %v3756_v19, %v3545_v12  ;;  %v3751_v31 = vld [vmem:[#allocation2 + $0x100] sm:$0xf0]  ;;  %v4369_v12 = vpop.f32.mrf.mxu2  ;;  %v1000_v19 = vadd.f32 %v4326_v50, %v4314_v39  ;;  %v3541_v39 = vld [vmem:[#allocation2 + $0x110] sm:$0xf] }
 0x2d9   :  { %v1368_v38 = vmax.f32 %v1250_v61, 0.0  ;;  %5758 = vst [vmem:[#allocation28_spill] sm:$0xff] %v4359_v57  ;;  %v1126_v61 = vadd.f32 %v1125_v28, %v997_v10  ;;  %1048 = vmatmul.bf16.gmra.mxu1 %v4359_v57 }
 0x2db   :  { %v1415_v46 = vpack.c.bf16 %v1368_v38, %v1367_v1  ;;  %1291 = vmatmul.bf16.gmra.mxu3 %v4345_v35 }
 0x2dd   :  { %1511 = vmatmul.bf16.vlgmr.msrb.gmra.mxu0 %v1415_v46  ;;  %v4364_v46 = vor.u32 %v3751_v31, %v3529_v30  ;;  %v1129_v30 = vadd.f32 %v4318_v47, %v1000_v19  ;;  %v1002_v31 = vadd.f32 %v4326_v50, %v4328_v52 }
 0x2de   :  { %v1252_v3 = vpop.f32.mrf.mxu3 }
 0x2df   :  { %v1253_v1 = vadd.f32 %v1252_v3, %v1124_v7  ;;  %5759 = vst [vmem:[#allocation29_spill] sm:$0xff] %v4364_v46  ;;  %v3758_v3 = vld [vmem:[#allocation2 + $0x13c] sm:$0xf]  ;;  %v3559_v7 = vld [vmem:[#allocation2 + $0x144] sm:$0xf0] }
 0x2e0   :  { %v4373_v10 = vor.u32 %v3758_v3, %v3559_v7 }
 0x2e1   :  { %v1369_v27 = vmax.f32 %v1253_v1, 0.0  ;;  %v3759_v1 = vld [vmem:[#allocation2 + $0x140] sm:$0xf0] }
 0x2e2   :  { %5760 = vst [vmem:[#allocation30_spill] sm:$0xff] %v4373_v10  ;;  %1182 = vmatmul.bf16.gmra.mxu2 %v4373_v10  ;;  %v1010_v10 = vadd.f32 %v4326_v50, %v4357_v22  ;;  %v3565_v22 = vld [vmem:[#allocation2 + $0x140] sm:$0xf] }
 0x2e6   :  { %v1254_v38 = vpop.f32.mrf.mxu3 }
 0x2e7   :  { %v1255_v21 = vadd.f32 %v1254_v38, %v1126_v61  ;;  %v3557_v61 = vld [vmem:[#allocation2 + $0x138] sm:$0xf]  ;;  %v4379_v38 = vpop.f32.mrf.mxu1 }
 0x2e9   :  { %v1370_v59 = vmax.f32 %v1255_v21, 0.0  ;;  %v4381_v21 = vor.u32 %v3759_v1, %v3557_v61 }
 0x2eb   :  { %1296 = vmatmul.bf16.gmra.mxu3 %v4364_v46  ;;  %v1416_v62 = vpack.c.bf16 %v1370_v59, %v1369_v27  ;;  %5761 = vst [vmem:[#allocation31_spill] sm:$0xff] %v4381_v21  ;;  %v3754_v27 = vld [vmem:[#allocation2 + $0x118] sm:$0xf0]  ;;  %v4383_v59 = vpop.f32.mrf.mxu2  ;;  %1053 = vmatmul.bf16.gmra.mxu1 %v4381_v21 }
 0x2ec   :  { %v4387_v52 = vor.u32 %v3754_v27, %v3541_v39  ;;  %v1134_v39 = vadd.f32 %v4342_v25, %v1005_v48  ;;  %v1007_v27 = vadd.f32 %v4326_v50, %v4347_v43 }
 0x2ed   :  { %1516 = vmatmul.bf16.gmra.mxu0 %v1416_v62  ;;  %v1131_v62 = vadd.f32 %v4331_v53, %v1002_v31 }
 0x2ee   :  { %v1257_v28 = vpop.f32.mrf.mxu3  ;;  %5762 = vst [vmem:[#allocation32_spill] sm:$0xff] %v4387_v52 }
 0x2ef   :  { %v1258_v3 = vadd.f32 %v1257_v28, %v1129_v30  ;;  %v4389_v35 = vpop.f32.mrf.mxu1  ;;  %v3761_v28 = vld [vmem:[#allocation2 + $0x154] sm:$0xf]  ;;  %v3571_v30 = vld [vmem:[#allocation2 + $0x15c] sm:$0xf0] }
 0x2f0   :  { %v4396_v31 = vor.u32 %v3761_v28, %v3571_v30 }
 0x2f1   :  { %v1371_v7 = vmax.f32 %v1258_v3, 0.0 }
 0x2f2   :  { %5763 = vst [vmem:[#allocation33_spill] sm:$0xff] %v4396_v31  ;;  %1187 = vmatmul.bf16.gmra.mxu2 %v4396_v31 }
 0x2f3   :  { %v4392_v1 = vpop.f32.mrf.mxu2 }
 0x2f6   :  { %v1259_v47 = vpop.f32.mrf.mxu3 }
 0x2f7   :  { %v1260_v19 = vadd.f32 %v1259_v47, %v1131_v62  ;;  %v3569_v62 = vld [vmem:[#allocation2 + $0x150] sm:$0xf]  ;;  %v4402_v3 = vpop.f32.mrf.mxu1 }
 0x2f9   :  { %v1372_v46 = vmax.f32 %v1260_v19, 0.0  ;;  %v3757_v19 = vld [vmem:[#allocation2 + $0x130] sm:$0xf0] }
 0x2fa   :  { %v4410_v43 = vor.u32 %v3757_v19, %v3553_v13  ;;  %v1139_v13 = vadd.f32 %v4361_v15, %v1010_v10  ;;  %v1012_v19 = vadd.f32 %v4326_v50, %v4366_v58 }
 0x2fb   :  { %1301 = vmatmul.bf16.gmra.mxu3 %v4387_v52  ;;  %v1417_v61 = vpack.c.bf16 %v1372_v46, %v1371_v7  ;;  %v3762_v46 = vld [vmem:[#allocation2 + $0x158] sm:$0xf0]  ;;  %v4406_v7 = vpop.f32.mrf.mxu2 }
 0x2fc   :  { %v4404_v47 = vor.u32 %v3762_v46, %v3569_v62  ;;  %5765 = vst [vmem:[#allocation35_spill] sm:$0xff] %v4410_v43 }
 0x2fd   :  { %1521 = vmatmul.bf16.gmra.mxu0 %v1417_v61  ;;  %v1136_v61 = vadd.f32 %v4350_v56, %v1007_v27 }
 0x2fe   :  { %v1262_v53 = vpop.f32.mrf.mxu3  ;;  %5764 = vst [vmem:[#allocation34_spill] sm:$0xff] %v4404_v47  ;;  %1058 = vmatmul.bf16.gmra.mxu1 %v4404_v47  ;;  %v1015_v47 = vadd.f32 %v4326_v50, %v4379_v38  ;;  %v3577_v38 = vld [vmem:[#allocation2 + $0x158] sm:$0xf] }
 0x2ff   :  { %v1263_v28 = vadd.f32 %v1262_v53, %v1134_v39  ;;  %v4412_v31 = vpop.f32.mrf.mxu1  ;;  %v3764_v53 = vld [vmem:[#allocation2 + $0x16c] sm:$0xf]  ;;  %v3583_v39 = vld [vmem:[#allocation2 + $0x174] sm:$0xf0] }
 0x300   :  { %v4419_v27 = vor.u32 %v3764_v53, %v3583_v39 }
 0x301   :  { %v1373_v30 = vmax.f32 %v1263_v28, 0.0 }
 0x302   :  { %5766 = vst [vmem:[#allocation36_spill] sm:$0xff] %v4419_v27  ;;  %1192 = vmatmul.bf16.gmra.mxu2 %v4419_v27 }
 0x303   :  { %v4415_v46 = vpop.f32.mrf.mxu2 }
 0x306   :  { %v1264_v48 = vpop.f32.mrf.mxu3 }
 0x307   :  { %v1265_v25 = vadd.f32 %v1264_v48, %v1136_v61  ;;  %v3581_v61 = vld [vmem:[#allocation2 + $0x168] sm:$0xf]  ;;  %v4425_v28 = vpop.f32.mrf.mxu1 }
 0x309   :  { %v1374_v52 = vmax.f32 %v1265_v25, 0.0  ;;  %v3760_v25 = vld [vmem:[#allocation2 + $0x148] sm:$0xf0] }
 0x30a   :  { %v4433_v58 = vor.u32 %v3760_v25, %v3565_v22  ;;  %v1144_v22 = vadd.f32 %v4383_v59, %v1015_v47  ;;  %v1017_v25 = vadd.f32 %v4326_v50, %v4389_v35 }
 0x30b   :  { %1306 = vmatmul.bf16.gmra.mxu3 %v4410_v43  ;;  %v1418_v62 = vpack.c.bf16 %v1374_v52, %v1373_v30  ;;  %v3765_v52 = vld [vmem:[#allocation2 + $0x170] sm:$0xf0]  ;;  %v4429_v30 = vpop.f32.mrf.mxu2 }
 0x30c   :  { %v4427_v48 = vor.u32 %v3765_v52, %v3581_v61  ;;  %5768 = vst [vmem:[#allocation38_spill] sm:$0xff] %v4433_v58 }
 0x30d   :  { %1526 = vmatmul.bf16.gmra.mxu0 %v1418_v62  ;;  %v1141_v62 = vadd.f32 %v4369_v12, %v1012_v19 }
 0x30e   :  { %v1267_v56 = vpop.f32.mrf.mxu3  ;;  %5767 = vst [vmem:[#allocation37_spill] sm:$0xff] %v4427_v48  ;;  %1063 = vmatmul.bf16.gmra.mxu1 %v4427_v48  ;;  %v1020_v48 = vadd.f32 %v4326_v50, %v4402_v3  ;;  %v3589_v3 = vld [vmem:[#allocation2 + $0x170] sm:$0xf] }
 0x30f   :  { %v1268_v53 = vadd.f32 %v1267_v56, %v1139_v13  ;;  %v4435_v27 = vpop.f32.mrf.mxu1  ;;  %v3767_v56 = vld [vmem:[#allocation2 + $0x184] sm:$0xf]  ;;  %v3595_v13 = vld [vmem:[#allocation2 + $0x18c] sm:$0xf0] }
 0x310   :  { %v4442_v19 = vor.u32 %v3767_v56, %v3595_v13 }
 0x311   :  { %v1375_v39 = vmax.f32 %v1268_v53, 0.0 }
 0x312   :  { %5769 = vst [vmem:[#allocation39_spill] sm:$0xff] %v4442_v19  ;;  %1197 = vmatmul.bf16.gmra.mxu2 %v4442_v19 }
 0x313   :  { %v4438_v52 = vpop.f32.mrf.mxu2 }
 0x316   :  { %v1269_v15 = vpop.f32.mrf.mxu3 }
 0x317   :  { %v1270_v10 = vadd.f32 %v1269_v15, %v1141_v62  ;;  %v3593_v62 = vld [vmem:[#allocation2 + $0x180] sm:$0xf]  ;;  %v4448_v53 = vpop.f32.mrf.mxu1 }
 0x319   :  { %v1376_v43 = vmax.f32 %v1270_v10, 0.0  ;;  %v3763_v10 = vld [vmem:[#allocation2 + $0x160] sm:$0xf0] }
 0x31a   :  { %v4456_v35 = vor.u32 %v3763_v10, %v3577_v38  ;;  %v1149_v38 = vadd.f32 %v4406_v7, %v1020_v48  ;;  %v1022_v10 = vadd.f32 %v4326_v50, %v4412_v31 }
 0x31b   :  { %1311 = vmatmul.bf16.gmra.mxu3 %v4433_v58  ;;  %v1419_v61 = vpack.c.bf16 %v1376_v43, %v1375_v39  ;;  %v3768_v43 = vld [vmem:[#allocation2 + $0x188] sm:$0xf0]  ;;  %v4452_v39 = vpop.f32.mrf.mxu2 }
 0x31c   :  { %v4450_v15 = vor.u32 %v3768_v43, %v3593_v62  ;;  %5771 = vst [vmem:[#allocation41_spill] sm:$0xff] %v4456_v35 }
 0x31d   :  { %1531 = vmatmul.bf16.gmra.mxu0 %v1419_v61  ;;  %v1146_v61 = vadd.f32 %v4392_v1, %v1017_v25 }
 0x31e   :  { %v1272_v12 = vpop.f32.mrf.mxu3  ;;  %5770 = vst [vmem:[#allocation40_spill] sm:$0xff] %v4450_v15  ;;  %1068 = vmatmul.bf16.gmra.mxu1 %v4450_v15  ;;  %v1025_v15 = vadd.f32 %v4326_v50, %v4425_v28  ;;  %v3601_v28 = vld [vmem:[#allocation2 + $0x188] sm:$0xf] }
 0x31f   :  { %v1273_v56 = vadd.f32 %v1272_v12, %v1144_v22  ;;  %v4458_v19 = vpop.f32.mrf.mxu1  ;;  %v3770_v12 = vld [vmem:[#allocation2 + $0x19c] sm:$0xf]  ;;  %v3607_v22 = vld [vmem:[#allocation2 + $0x1a4] sm:$0xf0] }
 0x320   :  { %v4465_v25 = vor.u32 %v3770_v12, %v3607_v22 }
 0x321   :  { %v1377_v13 = vmax.f32 %v1273_v56, 0.0 }
 0x322   :  { %5772 = vst [vmem:[#allocation42_spill] sm:$0xff] %v4465_v25  ;;  %1202 = vmatmul.bf16.gmra.mxu2 %v4465_v25 }
 0x323   :  { %v4461_v43 = vpop.f32.mrf.mxu2 }
 0x326   :  { %v1274_v59 = vpop.f32.mrf.mxu3 }
 0x327   :  { %v1275_v47 = vadd.f32 %v1274_v59, %v1146_v61  ;;  %v3605_v61 = vld [vmem:[#allocation2 + $0x198] sm:$0xf]  ;;  %v4471_v56 = vpop.f32.mrf.mxu1 }
 0x329   :  { %v1378_v58 = vmax.f32 %v1275_v47, 0.0  ;;  %v3766_v47 = vld [vmem:[#allocation2 + $0x178] sm:$0xf0] }
 0x32a   :  { %v4479_v31 = vor.u32 %v3766_v47, %v3589_v3  ;;  %v1154_v3 = vadd.f32 %v4429_v30, %v1025_v15  ;;  %v1027_v47 = vadd.f32 %v4326_v50, %v4435_v27 }
 0x32b   :  { %1316 = vmatmul.bf16.gmra.mxu3 %v4456_v35  ;;  %v1420_v62 = vpack.c.bf16 %v1378_v58, %v1377_v13  ;;  %v3771_v58 = vld [vmem:[#allocation2 + $0x1a0] sm:$0xf0]  ;;  %v4475_v13 = vpop.f32.mrf.mxu2 }
 0x32c   :  { %v4473_v59 = vor.u32 %v3771_v58, %v3605_v61  ;;  %5774 = vst [vmem:[#allocation44_spill] sm:$0xff] %v4479_v31 }
 0x32d   :  { %1536 = vmatmul.bf16.gmra.mxu0 %v1420_v62  ;;  %v1151_v62 = vadd.f32 %v4415_v46, %v1022_v10 }
 0x32e   :  { %v1277_v1 = vpop.f32.mrf.mxu3  ;;  %5773 = vst [vmem:[#allocation43_spill] sm:$0xff] %v4473_v59  ;;  %1073 = vmatmul.bf16.gmra.mxu1 %v4473_v59  ;;  %v1030_v59 = vadd.f32 %v4326_v50, %v4448_v53  ;;  %v3613_v53 = vld [vmem:[#allocation2 + $0x1a0] sm:$0xf] }
 0x32f   :  { %v1278_v12 = vadd.f32 %v1277_v1, %v1149_v38  ;;  %v4481_v25 = vpop.f32.mrf.mxu1  ;;  %v3773_v1 = vld [vmem:[#allocation2 + $0x1b4] sm:$0xf]  ;;  %v3619_v38 = vld [vmem:[#allocation2 + $0x1bc] sm:$0xf0] }
 0x330   :  { %v4488_v10 = vor.u32 %v3773_v1, %v3619_v38 }
 0x331   :  { %v1379_v22 = vmax.f32 %v1278_v12, 0.0  ;;  %v3774_v12 = vld [vmem:[#allocation2 + $0x1b8] sm:$0xf0] }
 0x332   :  { %5775 = vst [vmem:[#allocation45_spill] sm:$0xff] %v4488_v10  ;;  %1207 = vmatmul.bf16.gmra.mxu2 %v4488_v10 }
 0x333   :  { %v4484_v58 = vpop.f32.mrf.mxu2 }
 0x336   :  { %v1279_v7 = vpop.f32.mrf.mxu3 }
 0x337   :  { %v1280_v48 = vadd.f32 %v1279_v7, %v1151_v62  ;;  %v4494_v62 = vpop.f32.mrf.mxu1 }
 0x339   :  { %v1380_v35 = vmax.f32 %v1280_v48, 0.0  ;;  %v3769_v48 = vld [vmem:[#allocation2 + $0x190] sm:$0xf0] }
 0x33a   :  { %v4502_v27 = vor.u32 %v3769_v48, %v3601_v28  ;;  %v1159_v28 = vadd.f32 %v4452_v39, %v1030_v59  ;;  %v1032_v48 = vadd.f32 %v4326_v50, %v4458_v19 }
 0x33b   :  { %1321 = vmatmul.bf16.gmra.mxu3 %v4479_v31  ;;  %v1421_v61 = vpack.c.bf16 %v1380_v35, %v1379_v22  ;;  %v3617_v35 = vld [vmem:[#allocation2 + $0x1b0] sm:$0xf]  ;;  %v4498_v22 = vpop.f32.mrf.mxu2 }
 0x33c   :  { %v4496_v7 = vor.u32 %v3774_v12, %v3617_v35  ;;  %5777 = vst [vmem:[#allocation47_spill] sm:$0xff] %v4502_v27 }
 0x33d   :  { %1541 = vmatmul.bf16.gmra.mxu0 %v1421_v61  ;;  %v1156_v61 = vadd.f32 %v4438_v52, %v1027_v47 }
 0x33e   :  { %v1282_v46 = vpop.f32.mrf.mxu3  ;;  %5776 = vst [vmem:[#allocation46_spill] sm:$0xff] %v4496_v7  ;;  %1078 = vmatmul.bf16.gmra.mxu1 %v4496_v7 }
 0x33f   :  { %v1283_v1 = vadd.f32 %v1282_v46, %v1154_v3  ;;  %v4504_v10 = vpop.f32.mrf.mxu1  ;;  %v3776_v46 = vld [vmem:[#allocation2 + $0x1cc] sm:$0xf]  ;;  %v3631_v3 = vld [vmem:[#allocation2 + $0x1d4] sm:$0xf0] }
 0x340   :  { %v4511_v47 = vor.u32 %v3776_v46, %v3631_v3 }
 0x341   :  { %v1381_v38 = vmax.f32 %v1283_v1, 0.0  ;;  %v3777_v1 = vld [vmem:[#allocation2 + $0x1d0] sm:$0xf0] }
 0x342   :  { %5778 = vst [vmem:[#allocation48_spill] sm:$0xff] %v4511_v47  ;;  %1212 = vmatmul.bf16.gmra.mxu2 %v4511_v47 }
 0x343   :  { %v4507_v12 = vpop.f32.mrf.mxu2 }
 0x346   :  { %v1284_v30 = vpop.f32.mrf.mxu3 }
 0x347   :  { %v1285_v15 = vadd.f32 %v1284_v30, %v1156_v61  ;;  %v4517_v61 = vpop.f32.mrf.mxu1 }
 0x349   :  { %v1382_v31 = vmax.f32 %v1285_v15, 0.0  ;;  %v3772_v15 = vld [vmem:[#allocation2 + $0x1a8] sm:$0xf0] }
 0x34a   :  { %v4525_v19 = vor.u32 %v3772_v15, %v3613_v53 }
 0x34b   :  { %1326 = vmatmul.bf16.gmra.mxu3 %v4502_v27  ;;  %v1422_v35 = vpack.c.bf16 %v1382_v31, %v1381_v38  ;;  %v3629_v31 = vld [vmem:[#allocation2 + $0x1c8] sm:$0xf]  ;;  %v4521_v38 = vpop.f32.mrf.mxu2 }
 0x34c   :  { %v4519_v30 = vor.u32 %v3777_v1, %v3629_v31  ;;  %5780 = vst [vmem:[#allocation50_spill] sm:$0xff] %v4525_v19 }
 0x34d   :  { %1546 = vmatmul.bf16.gmra.mxu0 %v1422_v35  ;;  %v1161_v35 = vadd.f32 %v4461_v43, %v1032_v48  ;;  %v1035_v43 = vadd.f32 %v4326_v50, %v4471_v56  ;;  %v3643_v48 = vld [vmem:[#allocation2 + $0x1ec] sm:$0xf0] }
 0x34e   :  { %v1287_v52 = vpop.f32.mrf.mxu3  ;;  %5779 = vst [vmem:[#allocation49_spill] sm:$0xff] %v4519_v30  ;;  %1083 = vmatmul.bf16.gmra.mxu1 %v4519_v30 }
 0x34f   :  { %v1288_v46 = vadd.f32 %v1287_v52, %v1159_v28  ;;  %v4529_v7 = vpop.f32.mrf.mxu1  ;;  %v3779_v28 = vld [vmem:[#allocation2 + $0x1e4] sm:$0xf]  ;;  %v1164_v15 = vadd.f32 %v4475_v13, %v1035_v43 }
 0x350   :  { %v4536_v53 = vor.u32 %v3779_v28, %v3643_v48  ;;  %v3775_v28 = vld [vmem:[#allocation2 + $0x1c0] sm:$0xf0] }
 0x351   :  { %v1383_v3 = vmax.f32 %v1288_v46, 0.0 }
 0x352   :  { %5781 = vst [vmem:[#allocation51_spill] sm:$0xff] %v4536_v53  ;;  %1217 = vmatmul.bf16.gmra.mxu2 %v4536_v53 }
 0x353   :  { %v4532_v1 = vpop.f32.mrf.mxu2 }
 0x356   :  { %v1289_v39 = vpop.f32.mrf.mxu3 }
 0x357   :  { %v1290_v59 = vadd.f32 %v1289_v39, %v1161_v35  ;;  %v1037_v35 = vadd.f32 %v4326_v50, %v4481_v25  ;;  %v3641_v39 = vld [vmem:[#allocation2 + $0x1e0] sm:$0xf] }
 0x359   :  { %v1384_v27 = vmax.f32 %v1290_v59, 0.0  ;;  %v3780_v59 = vld [vmem:[#allocation2 + $0x1e8] sm:$0xf0]  ;;  %v1166_v13 = vadd.f32 %v4484_v58, %v1037_v35  ;;  %v1040_v58 = vadd.f32 %v4326_v50, %v4494_v62  ;;  %v3655_v35 = vld [vmem:[#allocation2 + $0x204] sm:$0xf0] }
 0x35a   :  { %v4527_v47 = vpop.f32.mrf.mxu0  ;;  %v4546_v56 = vor.u32 %v3780_v59, %v3641_v39 }
 0x35b   :  { %1331 = vmatmul.bf16.gmra.mxu3 %v4525_v19  ;;  %v1423_v31 = vpack.c.bf16 %v1384_v27, %v1383_v3  ;;  %v4544_v27 = vpop.f32.mrf.mxu1  ;;  %v4550_v48 = vpop.f32.mrf.mxu2 }
 0x35c   :  { %5782 = vst [vmem:[#allocation52_spill] sm:$0xff] %v4546_v56  ;;  %v1050_v44 = vadd.f32 %v4326_v50, %v4544_v27 }
 0x35d   :  { %1551 = vmatmul.bf16.gmra.mxu0 %v1423_v31  ;;  %v3625_v31 = vld [vmem:[#allocation2 + $0x1b8] sm:$0xf] }
 0x35e   :  { %v1292_v52 = vpop.f32.mrf.mxu3  ;;  %1088 = vmatmul.bf16.gmra.mxu1 %v4546_v56  ;;  %v4554_v53 = vor.u32 %v3775_v28, %v3625_v31  ;;  %v1042_v28 = vadd.f32 %v4326_v50, %v4504_v10 }
 0x35f   :  { %v1293_v25 = vadd.f32 %v1292_v52, %v1164_v15  ;;  %v3782_v15 = vld [vmem:[#allocation2 + $0x1fc] sm:$0xf] }
 0x360   :  { %5783 = vst [vmem:[#allocation53_spill] sm:$0xff] %v4554_v53  ;;  %v4565_v31 = vor.u32 %v3782_v15, %v3655_v35  ;;  %v3778_v15 = vld [vmem:[#allocation2 + $0x1d8] sm:$0xf0] }
 0x361   :  { %v1385_v30 = vmax.f32 %v1293_v25, 0.0  ;;  %v3783_v25 = vld [vmem:[#allocation2 + $0x200] sm:$0xf0] }
 0x362   :  { %v4542_v46 = vpop.f32.mrf.mxu0  ;;  %5784 = vst [vmem:[#allocation54_spill] sm:$0xff] %v4565_v31  ;;  %1222 = vmatmul.bf16.gmra.mxu2 %v4565_v31 }
 0x363   :  { %v4558_v59 = vpop.f32.mrf.mxu1  ;;  %v4561_v21 = vpop.f32.mrf.mxu2 }
 0x366   :  { %v1294_v43 = vpop.f32.mrf.mxu3 }
 0x367   :  { %v1295_v19 = vadd.f32 %v1294_v43, %v1166_v13  ;;  %v3637_v43 = vld [vmem:[#allocation2 + $0x1d0] sm:$0xf] }
 0x368   :  { %v4583_v31 = vor.u32 %v3778_v15, %v3637_v43  ;;  %v1047_v15 = vadd.f32 %v4326_v50, %v4529_v7 }
 0x369   :  { %v1386_v24 = vmax.f32 %v1295_v19, 0.0  ;;  %v1169_v19 = vadd.f32 %v4498_v22, %v1040_v58  ;;  %v1171_v22 = vadd.f32 %v4507_v12, %v1042_v28  ;;  %v1045_v12 = vadd.f32 %v4326_v50, %v4517_v61  ;;  %v3667_v28 = vld [vmem:[#allocation2 + $0x21c] sm:$0xf0] }
 0x36a   :  { %v4556_v39 = vpop.f32.mrf.mxu0  ;;  %5786 = vst [vmem:[#allocation56_spill] sm:$0xff] %v4583_v31 }
 0x36b   :  { %1336 = vmatmul.bf16.gmra.mxu3 %v4554_v53  ;;  %v1424_v3 = vpack.c.bf16 %v1386_v24, %v1385_v30  ;;  %v4573_v24 = vpop.f32.mrf.mxu1  ;;  %v3653_v30 = vld [vmem:[#allocation2 + $0x1f8] sm:$0xf]  ;;  %v4579_v35 = vpop.f32.mrf.mxu2 }
 0x36c   :  { %v4575_v62 = vor.u32 %v3783_v25, %v3653_v30  ;;  %v1055_v27 = vadd.f32 %v4326_v50, %v4573_v24 }
 0x36d   :  { %1556 = vmatmul.bf16.gmra.mxu0 %v1424_v3 }
 0x36e   :  { %v1297_v52 = vpop.f32.mrf.mxu3  ;;  %5785 = vst [vmem:[#allocation55_spill] sm:$0xff] %v4575_v62  ;;  %1093 = vmatmul.bf16.gmra.mxu1 %v4575_v62 }
 0x36f   :  { %v1298_v10 = vadd.f32 %v1297_v52, %v1169_v19  ;;  %v3785_v19 = vld [vmem:[#allocation2 + $0x214] sm:$0xf] }
 0x370   :  { %v4594_v43 = vor.u32 %v3785_v19, %v3667_v28  ;;  %v3781_v19 = vld [vmem:[#allocation2 + $0x1f0] sm:$0xf0] }
 0x371   :  { %v1387_v56 = vmax.f32 %v1298_v10, 0.0  ;;  %v3786_v10 = vld [vmem:[#allocation2 + $0x218] sm:$0xf0] }
 0x372   :  { %v4571_v13 = vpop.f32.mrf.mxu0  ;;  %5787 = vst [vmem:[#allocation57_spill] sm:$0xff] %v4594_v43  ;;  %1227 = vmatmul.bf16.gmra.mxu2 %v4594_v43 }
 0x373   :  { %v4587_v25 = vpop.f32.mrf.mxu1  ;;  %v4590_v0 = vpop.f32.mrf.mxu2 }
 0x376   :  { %v1299_v58 = vpop.f32.mrf.mxu3 }
 0x377   :  { %v1300_v53 = vadd.f32 %v1299_v58, %v1171_v22  ;;  %v3649_v58 = vld [vmem:[#allocation2 + $0x1e8] sm:$0xf] }
 0x378   :  { %v4612_v43 = vor.u32 %v3781_v19, %v3649_v58  ;;  %v1179_v58 = vadd.f32 %v4550_v48, %v1050_v44 }
 0x379   :  { %v1388_v6 = vmax.f32 %v1300_v53, 0.0  ;;  %v1174_v53 = vadd.f32 %v4521_v38, %v1045_v12  ;;  %v1176_v38 = vadd.f32 %v4532_v1, %v1047_v15  ;;  %v3679_v15 = vld [vmem:[#allocation2 + $0x234] sm:$0xf0] }
 0x37a   :  { %v4585_v30 = vpop.f32.mrf.mxu0  ;;  %5789 = vst [vmem:[#allocation59_spill] sm:$0xff] %v4612_v43 }
 0x37b   :  { %1341 = vmatmul.bf16.gmra.mxu3 %v4583_v31  ;;  %v1425_v3 = vpack.c.bf16 %v1388_v6, %v1387_v56  ;;  %v4602_v6 = vpop.f32.mrf.mxu1  ;;  %v3665_v56 = vld [vmem:[#allocation2 + $0x210] sm:$0xf]  ;;  %v4608_v28 = vpop.f32.mrf.mxu2 }
 0x37c   :  { %v4604_v61 = vor.u32 %v3786_v10, %v3665_v56 }
 0x37d   :  { %1561 = vmatmul.bf16.gmra.mxu0 %v1425_v3 }
 0x37e   :  { %v1302_v52 = vpop.f32.mrf.mxu3  ;;  %5788 = vst [vmem:[#allocation58_spill] sm:$0xff] %v4604_v61  ;;  %1098 = vmatmul.bf16.gmra.mxu1 %v4604_v61 }
 0x37f   :  { %v1303_v7 = vadd.f32 %v1302_v52, %v1174_v53  ;;  %v3788_v53 = vld [vmem:[#allocation2 + $0x22c] sm:$0xf] }
 0x380   :  { %v4619_v61 = vor.u32 %v3788_v53, %v3679_v15 }
 0x381   :  { %v1389_v62 = vmax.f32 %v1303_v7, 0.0  ;;  %v3784_v7 = vld [vmem:[#allocation2 + $0x208] sm:$0xf0] }
 0x382   :  { %v4600_v22 = vpop.f32.mrf.mxu0  ;;  %5790 = vst [vmem:[#allocation60_spill] sm:$0xff] %v4619_v61  ;;  %1232 = vmatmul.bf16.gmra.mxu2 %v4619_v61 }
 0x383   :  { %v1061_v10 = vpop.f32.mrf.mxu1  ;;  %v1190_v52 = vpop.f32.mrf.mxu2 }
 0x386   :  { %v1304_v12 = vpop.f32.mrf.mxu3 }
 0x387   :  { %v1305_v31 = vadd.f32 %v1304_v12, %v1176_v38 }
 0x389   :  { %v1390_v57 = vmax.f32 %v1305_v31, 0.0  ;;  %v1052_v31 = vadd.f32 %v4326_v50, %v4558_v59 }
 0x38a   :  { %v4614_v56 = vpop.f32.mrf.mxu0 }
 0x38b   :  { %1346 = vmatmul.bf16.gmra.mxu3 %v4612_v43  ;;  %v1426_v3 = vpack.c.bf16 %v1390_v57, %v1389_v62  ;;  %v3677_v57 = vld [vmem:[#allocation2 + $0x228] sm:$0xf]  ;;  %v3789_v62 = vld [vmem:[#allocation2 + $0x230] sm:$0xf0]  ;;  %v1064_v12 = vpop.f32.mrf.mxu1  ;;  %v1181_v53 = vadd.f32 %v4561_v21, %v1052_v31  ;;  %v1193_v43 = vpop.f32.mrf.mxu2  ;;  %v1057_v31 = vadd.f32 %v4326_v50, %v4587_v25 }
 0x38c   :  { %v4627_v38 = vor.u32 %v3789_v62, %v3677_v57 }
 0x38d   :  { %1566 = vmatmul.bf16.gmra.mxu0 %v1426_v3  ;;  %v3661_v3 = vld [vmem:[#allocation2 + $0x200] sm:$0xf] }
 0x38e   :  { %v1307_v1 = vpop.f32.mrf.mxu3  ;;  %5791 = vst [vmem:[#allocation61_spill] sm:$0xff] %v4627_v38  ;;  %1103 = vmatmul.bf16.gmra.mxu1 %v4627_v38  ;;  %v4633_v15 = vor.u32 %v3784_v7, %v3661_v3 }
 0x38f   :  { %v1308_v44 = vadd.f32 %v1307_v1, %v1179_v58  ;;  %v1184_v58 = vadd.f32 %v4579_v35, %v1055_v27  ;;  %v1060_v27 = vadd.f32 %v4326_v50, %v4602_v6 }
 0x390   :  { %5792 = vst [vmem:[#allocation62_spill] sm:$0xff] %v4633_v15 }
 0x391   :  { %v1391_v61 = vmax.f32 %v1308_v44, 0.0  ;;  %v3787_v44 = vld [vmem:[#allocation2 + $0x220] sm:$0xf0] }
 0x392   :  { %v4625_v19 = vpop.f32.mrf.mxu0 }
 0x393   :  { %v1066_v1 = vpop.f32.mrf.mxu1  ;;  %v1195_v7 = vpop.f32.mrf.mxu2 }
 0x396   :  { %v1309_v48 = vpop.f32.mrf.mxu3 }
 0x397   :  { %v1310_v59 = vadd.f32 %v1309_v48, %v1181_v53  ;;  %v3673_v53 = vld [vmem:[#allocation2 + $0x218] sm:$0xf]  ;;  %v1186_v48 = vadd.f32 %v4590_v0, %v1057_v31  ;;  %v1189_v0 = vadd.f32 %v4608_v28, %v1060_v27 }
 0x399   :  { %v1392_v33 = vmax.f32 %v1310_v59, 0.0 }
 0x39a   :  { %v4635_v57 = vpop.f32.mrf.mxu0 }
 0x39b   :  { %1351 = vmatmul.bf16.gmra.mxu3 %v4633_v15  ;;  %v1427_v62 = vpack.c.bf16 %v1392_v33, %v1391_v61  ;;  %v4646_v15 = vor.u32 %v3787_v44, %v3673_v53  ;;  %v1069_v24 = vpop.f32.mrf.mxu1  ;;  %v1198_v25 = vpop.f32.mrf.mxu2  ;;  %v3685_v53 = vld [vmem:[#allocation2 + $0x230] sm:$0xf]  ;;  %v3790_v44 = vld [vmem:[#allocation2 + $0x238] sm:$0xf0] }
 0x39d   :  { %1571 = vmatmul.bf16.gmra.mxu0 %v1427_v62  ;;  %5793 = vst [vmem:[#allocation63_spill] sm:$0xff] %v4646_v15 }
 0x39e   :  { %v1312_v21 = vpop.f32.mrf.mxu3 }
 0x39f   :  { %v1313_v59 = vadd.f32 %v1312_v21, %v1184_v58  ;;  %v1062_v21 = vadd.f32 %v4326_v50, %v1061_v10  ;;  %v1065_v10 = vadd.f32 %v4326_v50, %v1064_v12 }
 0x3a1   :  { %v1393_v62 = vmax.f32 %v1313_v59, 0.0  ;;  %v1194_v9 = vadd.f32 %v1193_v43, %v1065_v10 }
 0x3a2   :  { %v4643_v3 = vpop.f32.mrf.mxu0 }
 0x3a3   :  { %v1071_v31 = vpop.f32.mrf.mxu1 }
 0x3a4   :  { %v1072_v43 = vadd.f32 %v4326_v50, %v1071_v31 }
 0x3a6   :  { %v1314_v33 = vpop.f32.mrf.mxu3 }
 0x3a7   :  { %v1315_v61 = vadd.f32 %v1314_v33, %v1186_v48  ;;  %v1191_v48 = vadd.f32 %v1190_v52, %v1062_v21 }
 0x3a9   :  { %v1394_v38 = vmax.f32 %v1315_v61, 0.0  ;;  %v1200_v61 = vpop.f32.mrf.mxu2 }
 0x3aa   :  { %v4648_v4 = vpop.f32.mrf.mxu0 }
 0x3ab   :  { %1356 = vmatmul.bf16.gmra.mxu3 %v4646_v15  ;;  %v1428_v35 = vpack.c.bf16 %v1394_v38, %v1393_v62  ;;  %v4655_v38 = vor.u32 %v3790_v44, %v3685_v53  ;;  %v1074_v28 = vpop.f32.mrf.mxu1 }
 0x3ac   :  { %v1075_v31 = vadd.f32 %v4326_v50, %v1074_v28  ;;  %v5795_v28 = vpack.c.bf16 %v4625_v19, %v4614_v56 }
 0x3ad   :  { %1576 = vmatmul.bf16.gmra.mxu0 %v1428_v35  ;;  %5794 = vst [vmem:[#allocation64_spill] sm:$0xff] %v4655_v38 }
 0x3ae   :  { %v1317_v23 = vpop.f32.mrf.mxu3 }
 0x3af   :  { %v1318_v59 = vadd.f32 %v1317_v23, %v1189_v0  ;;  %v1067_v23 = vadd.f32 %v4326_v50, %v1066_v1 }
 0x3b1   :  { %v1395_v62 = vmax.f32 %v1318_v59, 0.0  ;;  %v1203_v14 = vpop.f32.mrf.mxu2  ;;  %v1196_v0 = vadd.f32 %v1195_v7, %v1067_v23 }
 0x3b2   :  { %v1539_v58 = vpop.f32.mrf.mxu0 }
 0x3b3   :  { %v1076_v44 = vpop.f32.mrf.mxu1 }
 0x3b6   :  { %v1319_v33 = vpop.f32.mrf.mxu3 }
 0x3b7   :  { %v1320_v15 = vadd.f32 %v1319_v33, %v1191_v48 }
 0x3b9   :  { %v1396_v34 = vmax.f32 %v1320_v15, 0.0 }
 0x3ba   :  { %v1542_v6 = vpop.f32.mrf.mxu0 }
 0x3bb   :  { %1361 = vmatmul.bf16.gmra.mxu3 %v4655_v38  ;;  %v1429_v35 = vpack.c.bf16 %v1396_v34, %v1395_v62  ;;  %v1205_v38 = vpop.f32.mrf.mxu2  ;;  %v1070_v62 = vadd.f32 %v4326_v50, %v1069_v24 }
 0x3bd   :  { %1581 = vmatmul.bf16.gmra.mxu0 %v1429_v35  ;;  %v1079_v35 = vpop.f32.mrf.mxu1  ;;  %v1199_v5 = vadd.f32 %v1198_v25, %v1070_v62  ;;  %v1637_v25 = vpack.c.bf16 %v1539_v58, %v4648_v4 }
 0x3be   :  { %v1322_v27 = vpop.f32.mrf.mxu3 }
 0x3bf   :  { %v1323_v21 = vadd.f32 %v1322_v27, %v1194_v9  ;;  %v1201_v9 = vadd.f32 %v1200_v61, %v1072_v43 }
 0x3c1   :  { %v1397_v15 = vmax.f32 %v1323_v21, 0.0 }
 0x3c2   :  { %v1544_v52 = vpop.f32.mrf.mxu0 }
 0x3c3   :  { %v1208_v7 = vpop.f32.mrf.mxu2  ;;  %v1638_v21 = vpack.c.bf16 %v1544_v52, %v1542_v6  ;;  %v1077_v6 = vadd.f32 %v4326_v50, %v1076_v44 }
 0x3c5   :  { %v1081_v24 = vpop.f32.mrf.mxu1  ;;  %v1206_v4 = vadd.f32 %v1205_v38, %v1077_v6  ;;  %v5797_v38 = vpack.c.bf16 %v4571_v13, %v4556_v39 }
 0x3c6   :  { %v1324_v53 = vpop.f32.mrf.mxu3 }
 0x3c7   :  { %v1325_v48 = vadd.f32 %v1324_v53, %v1196_v0 }
 0x3c9   :  { %v1398_v59 = vmax.f32 %v1325_v48, 0.0 }
 0x3ca   :  { %v1547_v33 = vpop.f32.mrf.mxu0 }
 0x3cb   :  { %v1430_v34 = vpack.c.bf16 %v1398_v59, %v1397_v15  ;;  %v1210_v61 = vpop.f32.mrf.mxu2 }
 0x3cd   :  { %1586 = vmatmul.bf16.gmra.mxu0 %v1430_v34  ;;  %v1204_v34 = vadd.f32 %v1203_v14, %v1075_v31 }
 0x3ce   :  { %v1327_v12 = vpop.f32.mrf.mxu3 }
 0x3cf   :  { %v1328_v27 = vadd.f32 %v1327_v12, %v1199_v5  ;;  %v1636_v5 = vpack.c.bf16 %v4643_v3, %v4635_v57  ;;  %v1084_v12 = vpop.f32.mrf.mxu1  ;;  %v5796_v3 = vpack.c.bf16 %v4600_v22, %v4585_v30 }
 0x3d1   :  { %v1399_v53 = vmax.f32 %v1328_v27, 0.0  ;;  %v1080_v27 = vadd.f32 %v4326_v50, %v1079_v35 }
 0x3d2   :  { %v1549_v1 = vpop.f32.mrf.mxu0 }
 0x3d3   :  { %v1639_v10 = vpack.c.bf16 %v1549_v1, %v1547_v33 }
 0x3d5   :  { %1660 = vmatpush.bf16.msrb.mxu1 %v1639_v10  ;;  %v1213_v10 = vpop.f32.mrf.mxu2 }
 0x3d6   :  { %v1329_v23 = vpop.f32.mrf.mxu3 }
 0x3d7   :  { %v1330_v0 = vadd.f32 %v1329_v23, %v1201_v9  ;;  %v1086_v19 = vpop.f32.mrf.mxu1  ;;  %v1209_v23 = vadd.f32 %v1208_v7, %v1080_v27 }
 0x3d9   :  { %v1400_v48 = vmax.f32 %v1330_v0, 0.0  ;;  %1661 = vmatpush.bf16.msrb.mxu1 %v1638_v21  ;;  %v1082_v0 = vadd.f32 %v4326_v50, %v1081_v24  ;;  %v5798_v21 = vpack.c.bf16 %v4542_v46, %v4527_v47  ;;  %v1085_v46 = vadd.f32 %v4326_v50, %v1084_v12 }
 0x3da   :  { %v4662_v15 = vpop.f32.mrf.mxu0 }
 0x3db   :  { %v1431_v59 = vpack.c.bf16 %v1400_v48, %v1399_v53  ;;  %v1211_v53 = vadd.f32 %v1210_v61, %v1082_v0 }
 0x3dd   :  { %1591 = vmatmul.bf16.gmra.mxu0 %v1431_v59  ;;  %1662 = vmatpush.bf16.msrb.mxu1 %v1637_v25  ;;  %v1215_v22 = vpop.f32.mrf.mxu2 }
 0x3de   :  { %v1332_v33 = vpop.f32.mrf.mxu3 }
 0x3df   :  { %v1333_v58 = vadd.f32 %v1332_v33, %v1204_v34  ;;  %v1089_v59 = vpop.f32.mrf.mxu1  ;;  %v1087_v34 = vadd.f32 %v4326_v50, %v1086_v19  ;;  %v4036_v50 = vld [vmem:[%s5691_s3] ss:$0 sm:$0xff] }
 0x3e1   :  { %1663 = vmatpush.bf16.msrb.mxu1 %v1636_v5  ;;  %v1401_v57 = vmax.f32 %v1333_v58, 0.0  ;;  %v1214_v5 = vadd.f32 %v1213_v10, %v1085_v46 }
 0x3e2   :  { %v4669_v52 = vpop.f32.mrf.mxu0 }
 0x3e3   :  { %v1640_v62 = vpack.c.bf16 %v4669_v52, %v4662_v15 }
 0x3e5   :  { %1664 = vmatpush.bf16.msrb.mxu1 %v5795_v28  ;;  %v1218_v47 = vpop.f32.mrf.mxu2 }
 0x3e6   :  { %v1334_v43 = vpop.f32.mrf.mxu3 }
 0x3e7   :  { %v1335_v1 = vadd.f32 %v1334_v43, %v1206_v4  ;;  %v1216_v4 = vadd.f32 %v1215_v22, %v1087_v34 }
 0x3e9   :  { %v1402_v14 = vmax.f32 %v1335_v1, 0.0  ;;  %1665 = vmatpush.bf16.msrb.mxu1 %v5796_v3 }
 0x3ea   :  { %v4679_v44 = vpop.f32.mrf.mxu0 }
 0x3eb   :  { %v1432_v9 = vpack.c.bf16 %v1402_v14, %v1401_v57 }
 0x3ed   :  { %1596 = vmatmul.bf16.gmra.mxu0 %v1432_v9  ;;  %1666 = vmatpush.bf16.msrb.mxu1 %v5797_v38  ;;  %v1220_v43 = vpop.f32.mrf.mxu2  ;;  %v1090_v9 = vadd.f32 %v4036_v50, %v1089_v59 }
 0x3ee   :  { %v1337_v56 = vpop.f32.mrf.mxu3 }
 0x3ef   :  { %v1338_v39 = vadd.f32 %v1337_v56, %v1209_v23 }
 0x3f1   :  { %1667 = vmatpush.bf16.msrb.mxu1 %v5798_v21  ;;  %v1403_v7 = vmax.f32 %v1338_v39, 0.0 }
 0x3f2   :  { %v4689_v30 = vpop.f32.mrf.mxu0 }
 0x3f3   :  { %v1641_v35 = vpack.c.bf16 %v4689_v30, %v4679_v44 }
 0x3f4   :  { %1668 = vmatmul.bf16.vlgmr.msrb.gmra.mxu1 %v4229_v36  ;;  %v1091_v36 = vpop.f32.mrf.mxu1 }
 0x3f5   :  { %v1223_v38 = vpop.f32.mrf.mxu2  ;;  %v1092_v56 = vadd.f32 %v4036_v50, %v1091_v36 }
 0x3f6   :  { %v1339_v13 = vpop.f32.mrf.mxu3 }
 0x3f7   :  { %v1340_v48 = vadd.f32 %v1339_v13, %v1211_v53  ;;  %v1221_v0 = vadd.f32 %v1220_v43, %v1092_v56 }
 0x3f9   :  { %v1404_v25 = vmax.f32 %v1340_v48, 0.0 }
 0x3fa   :  { %v4694_v24 = vpop.f32.mrf.mxu0 }
 0x3fb   :  { %v1433_v31 = vpack.c.bf16 %v1404_v25, %v1403_v7 }
 0x3fc   :  { %v1094_v3 = vpop.f32.mrf.mxu1 }
 0x3fd   :  { %1601 = vmatmul.bf16.gmra.mxu0 %v1433_v31  ;;  %v1225_v7 = vpop.f32.mrf.mxu2  ;;  %v1095_v31 = vadd.f32 %v4036_v50, %v1094_v3 }
 0x3fe   :  { %v1342_v33 = vpop.f32.mrf.mxu3 }
 0x3ff   :  { %v1343_v58 = vadd.f32 %v1342_v33, %v1214_v5  ;;  %v1224_v33 = vadd.f32 %v1223_v38, %v1095_v31 }
 0x401   :  { %v1405_v57 = vmax.f32 %v1343_v58, 0.0 }
 0x402   :  { %v4698_v6 = vpop.f32.mrf.mxu0 }
 0x403   :  { %v1642_v61 = vpack.c.bf16 %v4698_v6, %v4694_v24 }
 0x404   :  { %1673 = vmatmul.bf16.gmra.mxu1 %v4235_v45  ;;  %v1219_v45 = vadd.f32 %v1218_v47, %v1090_v9  ;;  %v1096_v53 = vpop.f32.mrf.mxu1 }
 0x405   :  { %v1097_v5 = vadd.f32 %v4036_v50, %v1096_v53  ;;  %v1228_v36 = vpop.f32.mrf.mxu2 }
 0x406   :  { %v1344_v28 = vpop.f32.mrf.mxu3 }
 0x407   :  { %v1345_v1 = vadd.f32 %v1344_v28, %v1216_v4 }
 0x409   :  { %v1406_v12 = vmax.f32 %v1345_v1, 0.0 }
 0x40a   :  { %v4703_v14 = vpop.f32.mrf.mxu0 }
 0x40b   :  { %v1434_v10 = vpack.c.bf16 %v1406_v12, %v1405_v57 }
 0x40c   :  { %v1099_v46 = vpop.f32.mrf.mxu1 }
 0x40d   :  { %1606 = vmatmul.bf16.gmra.mxu0 %v1434_v10  ;;  %v1100_v9 = vadd.f32 %v4036_v50, %v1099_v46  ;;  %v1230_v3 = vpop.f32.mrf.mxu2 }
 0x40e   :  { %v1347_v27 = vpop.f32.mrf.mxu3 }
 0x40f   :  { %v1348_v21 = vadd.f32 %v1347_v27, %v1219_v45  ;;  %v1229_v45 = vadd.f32 %v1228_v36, %v1100_v9 }
 0x411   :  { %v1407_v13 = vmax.f32 %v1348_v21, 0.0 }
 0x412   :  { %v4708_v19 = vpop.f32.mrf.mxu0 }
 0x413   :  { %v1643_v23 = vpack.c.bf16 %v4708_v19, %v4703_v14 }
 0x414   :  { %1678 = vmatmul.bf16.gmra.mxu1 %v4241_v55  ;;  %v1226_v55 = vadd.f32 %v1225_v7, %v1097_v5  ;;  %v1101_v57 = vpop.f32.mrf.mxu1 }
 0x415   :  { %v1102_v38 = vadd.f32 %v4036_v50, %v1101_v57 }
 0x416   :  { %v1349_v22 = vpop.f32.mrf.mxu3 }
 0x417   :  { %v1350_v39 = vadd.f32 %v1349_v22, %v1221_v0 }
 0x419   :  { %v1408_v48 = vmax.f32 %v1350_v39, 0.0  ;;  %v1233_v39 = vpop.f32.mrf.mxu2 }
 0x41a   :  { %v4713_v59 = vpop.f32.mrf.mxu0 }
 0x41b   :  { %v1435_v25 = vpack.c.bf16 %v1408_v48, %v1407_v13 }
 0x41c   :  { %v1104_v0 = vpop.f32.mrf.mxu1 }
 0x41d   :  { %1611 = vmatmul.bf16.gmra.mxu0 %v1435_v25  ;;  %v1105_v31 = vadd.f32 %v4036_v50, %v1104_v0 }
 0x41e   :  { %v1352_v47 = vpop.f32.mrf.mxu3 }
 0x41f   :  { %v1353_v4 = vadd.f32 %v1352_v47, %v1224_v33  ;;  %v1234_v33 = vadd.f32 %v1233_v39, %v1105_v31 }
 0x421   :  { %v1409_v43 = vmax.f32 %v1353_v4, 0.0  ;;  %v1235_v36 = vpop.f32.mrf.mxu2 }
 0x422   :  { %v1574_v34 = vpop.f32.mrf.mxu0 }
 0x424   :  { %1683 = vmatmul.bf16.gmra.mxu1 %v4251_v2  ;;  %v1231_v2 = vadd.f32 %v1230_v3, %v1102_v38  ;;  %v1106_v47 = vpop.f32.mrf.mxu1 }
 0x425   :  { %v1107_v5 = vadd.f32 %v4036_v50, %v1106_v47  ;;  %v5812_v47 = vld [vmem:[#allocation30_spill] sm:$0xff] }
 0x426   :  { %v1354_v58 = vpop.f32.mrf.mxu3 }
 0x427   :  { %v1355_v28 = vadd.f32 %v1354_v58, %v1226_v55 }
 0x429   :  { %v1410_v1 = vmax.f32 %v1355_v28, 0.0 }
 0x42a   :  { %v1577_v12 = vpop.f32.mrf.mxu0 }
 0x42b   :  { %v1436_v10 = vpack.c.bf16 %v1410_v1, %v1409_v43 }
 0x42d   :  { %1616 = vmatmul.bf16.gmra.mxu0 %v1436_v10 }
 0x42e   :  { %v1357_v27 = vpop.f32.mrf.mxu3 }
 0x42f   :  { %v1358_v21 = vadd.f32 %v1357_v27, %v1229_v45 }
 0x431   :  { %v1411_v13 = vmax.f32 %v1358_v21, 0.0  ;;  %v5808_v21 = vld [vmem:[#allocation20_spill] sm:$0xff] }
 0x432   :  { %v1579_v56 = vpop.f32.mrf.mxu0 }
 0x433   :  { %v1645_v45 = vpack.c.bf16 %v1579_v56, %v1577_v12  ;;  %v5806_v12 = vld [vmem:[#allocation19_spill] sm:$0xff] }
 0x434   :  { %1688 = vmatmul.bf16.gmra.mxu1 %v4260_v11  ;;  %v1236_v11 = vadd.f32 %v1235_v36, %v1107_v5  ;;  %v2047_v36 = vlaneseq }
 0x436   :  { %v1359_v22 = vpop.f32.mrf.mxu3 }
 0x437   :  { %v1360_v53 = vadd.f32 %v1359_v22, %v1231_v2 }
 0x439   :  { %v1412_v48 = vmax.f32 %v1360_v53, 0.0  ;;  %v5809_v53 = vld [vmem:[#allocation27_spill] sm:$0xff] }
 0x43a   :  { %v1582_v7 = vpop.f32.mrf.mxu0 }
 0x43b   :  { %v1437_v25 = vpack.c.bf16 %v1412_v48, %v1411_v13 }
 0x43d   :  { %1621 = vmatmul.bf16.gmra.mxu0 %v1437_v25  ;;  %v5811_v25 = vld [vmem:[#allocation22_spill] sm:$0xff] }
 0x43e   :  { %v1362_v46 = vpop.f32.mrf.mxu3 }
 0x43f   :  { %v1363_v4 = vadd.f32 %v1362_v46, %v1234_v33  ;;  %v4764_v33 = vld [vmem:[%s5693_s5] ss:$0 sm:$0xff] }
 0x441   :  { %v1413_v43 = vmax.f32 %v1363_v4, 0.0 }
 0x442   :  { %v1584_v55 = vpop.f32.mrf.mxu0 }
 0x443   :  { %v1646_v27 = vpack.c.bf16 %v1584_v55, %v1582_v7  ;;  %v5810_v7 = vld [vmem:[#allocation31_spill] sm:$0xff] }
 0x444   :  { %1693 = vmatmul.bf16.gmra.mxu1 %v4269_v20  ;;  %v1644_v20 = vpack.c.bf16 %v1574_v34, %v4713_v59 }
 0x446   :  { %v1364_v58 = vpop.f32.mrf.mxu3 }
 0x447   :  { %v1365_v28 = vadd.f32 %v1364_v58, %v1236_v11  ;;  %v4767_v11 = vand.u32 127, %v2047_v36  ;;  %v5813_v58 = vld [vmem:[#allocation34_spill] sm:$0xff] }
 0x449   :  { %v1414_v1 = vmax.f32 %v1365_v28, 0.0  ;;  %v5814_v28 = vld [vmem:[#allocation24_spill] sm:$0xff]  ;;  %vm2049_vm0 = vcmp.lt.s32.totalorder %v4767_v11, 7 }
 0x44a   :  { %v1587_v57 = vpop.f32.mrf.mxu0 }
 0x44b   :  { %v1438_v10 = vpack.c.bf16 %v1414_v1, %v1413_v43 }
 0x44d   :  { %1626 = vmatmul.bf16.gmra.mxu0 %v1438_v10 }
 0x452   :  { %v1589_v9 = vpop.f32.mrf.mxu0 }
 0x453   :  { %v1647_v3 = vpack.c.bf16 %v1589_v9, %v1587_v57  ;;  %v5815_v57 = vld [vmem:[#allocation33_spill] sm:$0xff] }
 0x454   :  { %1698 = vmatmul.bf16.gmra.mxu1 %v4278_v29 }
 0x455   :  { %1789 = vmatpush.bf16.msrb.mxu2 %v1647_v3 }
 0x459   :  { %1790 = vmatpush.bf16.msrb.mxu2 %v1646_v27 }
 0x45a   :  { %v1592_v50 = vpop.f32.mrf.mxu0 }
 0x45d   :  { %1791 = vmatpush.bf16.msrb.mxu2 %v1645_v45 }
 0x461   :  { %1792 = vmatpush.bf16.msrb.mxu2 %v1644_v20 }
 0x462   :  { %v1594_v38 = vpop.f32.mrf.mxu0 }
 0x463   :  { %v1648_v0 = vpack.c.bf16 %v1594_v38, %v1592_v50 }
 0x464   :  { %1703 = vmatmul.bf16.gmra.mxu1 %v4287_v40 }
 0x465   :  { %1793 = vmatpush.bf16.msrb.mxu2 %v1643_v23  ;;  %v5804_v23 = vld [vmem:[#allocation25_spill] sm:$0xff] }
 0x469   :  { %1794 = vmatpush.bf16.msrb.mxu2 %v1642_v61  ;;  %v5803_v61 = vld [vmem:[#allocation17_spill] sm:$0xff] }
 0x46a   :  { %v1597_v29 = vpop.f32.mrf.mxu0 }
 0x46d   :  { %1795 = vmatpush.bf16.msrb.mxu2 %v1641_v35 }
 0x471   :  { %1796 = vmatpush.bf16.msrb.mxu2 %v1640_v62  ;;  %v1669_v56 = vpop.f32.mrf.mxu1 }
 0x472   :  { %v1599_v59 = vpop.f32.mrf.mxu0  ;;  %v1670_v55 = vadd.f32 %v4764_v33, %v1669_v56 }
 0x473   :  { %v1649_v34 = vpack.c.bf16 %v1599_v59, %v1597_v29 }
 0x474   :  { %1797 = vmatmul.bf16.vlgmr.msrb.gmra.mxu2 %v4226_v32  ;;  %1708 = vmatmul.bf16.gmra.mxu1 %v4296_v54 }
 0x479   :  { %v1671_v2 = vpop.f32.mrf.mxu1 }
 0x47a   :  { %v1602_v40 = vpop.f32.mrf.mxu0  ;;  %v1672_v3 = vadd.f32 %v4764_v33, %v1671_v2 }
 0x481   :  { %v1674_v39 = vpop.f32.mrf.mxu1 }
 0x482   :  { %v1604_v14 = vpop.f32.mrf.mxu0  ;;  %v1675_v29 = vadd.f32 %v4764_v33, %v1674_v39 }
 0x483   :  { %v1650_v19 = vpack.c.bf16 %v1604_v14, %v1602_v40  ;;  %v5816_v40 = vld [vmem:[#allocation37_spill] sm:$0xff]  ;;  %v5817_v14 = vld [vmem:[#allocation26_spill] sm:$0xff] }
 0x484   :  { %1802 = vmatmul.bf16.gmra.mxu2 %v4232_v41  ;;  %1713 = vmatmul.bf16.gmra.mxu1 %v4305_v16 }
 0x489   :  { %v1676_v48 = vpop.f32.mrf.mxu1 }
 0x48a   :  { %v1607_v24 = vpop.f32.mrf.mxu0 }
 0x491   :  { %v1679_v46 = vpop.f32.mrf.mxu1 }
 0x492   :  { %v1609_v44 = vpop.f32.mrf.mxu0 }
 0x493   :  { %v1651_v30 = vpack.c.bf16 %v1609_v44, %v1607_v24  ;;  %v5818_v44 = vld [vmem:[#allocation36_spill] sm:$0xff] }
 0x494   :  { %1807 = vmatmul.bf16.gmra.mxu2 %v4238_v51  ;;  %1718 = vmatmul.bf16.gmra.mxu1 %v4316_v42 }
 0x499   :  { %v1681_v4 = vpop.f32.mrf.mxu1 }
 0x49a   :  { %v1612_v15 = vpop.f32.mrf.mxu0 }
 0x4a1   :  { %v1684_v50 = vpop.f32.mrf.mxu1 }
 0x4a2   :  { %v1614_v52 = vpop.f32.mrf.mxu0 }
 0x4a4   :  { %1812 = vmatmul.bf16.gmra.mxu2 %v4248_v63  ;;  %1723 = vmatmul.bf16.gmra.mxu1 %v4340_v18  ;;  %v1652_v63 = vpack.c.bf16 %v1614_v52, %v1612_v15  ;;  %v5802_v18 = vld [vmem:[#allocation23_spill] sm:$0xff]  ;;  %v1677_v52 = vadd.f32 %v4764_v33, %v1676_v48  ;;  %v5823_v48 = vld [vmem:[#allocation32_spill] sm:$0xff] }
 0x4aa   :  { %v1617_v32 = vpop.f32.mrf.mxu0 }
 0x4b2   :  { %v1619_v54 = vpop.f32.mrf.mxu0 }
 0x4b3   :  { %v1653_v42 = vpack.c.bf16 %v1619_v54, %v1617_v32 }
 0x4b4   :  { %1817 = vmatmul.bf16.gmra.mxu2 %v4257_v8  ;;  %v5799_v8 = vld [vmem:[#allocation15_spill] sm:$0xff] }
 0x4ba   :  { %v1622_v41 = vpop.f32.mrf.mxu0 }
 0x4c2   :  { %v1624_v62 = vpop.f32.mrf.mxu0 }
 0x4c3   :  { %v1654_v51 = vpack.c.bf16 %v1624_v62, %v1622_v41 }
 0x4c4   :  { %1822 = vmatmul.bf16.gmra.mxu2 %v4266_v17  ;;  %v5800_v17 = vld [vmem:[#allocation21_spill] sm:$0xff] }
 0x4ca   :  { %v1627_v16 = vpop.f32.mrf.mxu0 }
 0x4d2   :  { %v1629_v35 = vpop.f32.mrf.mxu0 }
 0x4d3   :  { %v1655_v6 = vpack.c.bf16 %v1629_v35, %v1627_v16 }
 0x4d4   :  { %1827 = vmatmul.bf16.gmra.mxu2 %v4275_v26  ;;  %v5801_v26 = vld [vmem:[#allocation16_spill] sm:$0xff] }
 0x4d5   :  { %1918 = vmatpush.bf16.msrb.mxu3 %v1655_v6  ;;  %v1680_v6 = vadd.f32 %v4764_v33, %v1679_v46 }
 0x4d9   :  { %1919 = vmatpush.bf16.msrb.mxu3 %v1654_v51 }
 0x4dd   :  { %1920 = vmatpush.bf16.msrb.mxu3 %v1653_v42 }
 0x4e1   :  { %1921 = vmatpush.bf16.msrb.mxu3 %v1652_v63  ;;  %v5819_v63 = vld [vmem:[#allocation40_spill] sm:$0xff] }
 0x4e4   :  { %1832 = vmatmul.bf16.gmra.mxu2 %v4284_v37  ;;  %v5805_v37 = vld [vmem:[#allocation18_spill] sm:$0xff] }
 0x4e5   :  { %1922 = vmatpush.bf16.msrb.mxu3 %v1651_v30 }
 0x4e9   :  { %1923 = vmatpush.bf16.msrb.mxu3 %v1650_v19 }
 0x4ed   :  { %1924 = vmatpush.bf16.msrb.mxu3 %v1649_v34  ;;  %v1686_v34 = vpop.f32.mrf.mxu1 }
 0x4f1   :  { %1925 = vmatpush.bf16.msrb.mxu3 %v1648_v0 }
 0x4f4   :  { %1926 = vmatmul.bf16.vlgmr.msrb.gmra.mxu3 %v4245_v60  ;;  %1837 = vmatmul.bf16.gmra.mxu2 %v4293_v49  ;;  %v5807_v49 = vld [vmem:[#allocation28_spill] sm:$0xff] }
 0x4f5   :  { %1728 = vmatmul.bf16.gmra.mxu1 %v5807_v49  ;;  %v1689_v54 = vpop.f32.mrf.mxu1 }
 0x4f7   :  { %v1798_v60 = vpop.f32.mrf.mxu2 }
 0x4f8   :  { %v1799_v43 = vadd.f32 %v1798_v60, %v1670_v55 }
 0x4fd   :  { %v1691_v42 = vpop.f32.mrf.mxu1 }
 0x4ff   :  { %v1800_v22 = vpop.f32.mrf.mxu2 }
 0x500   :  { %v1801_v20 = vadd.f32 %v1800_v22, %v1672_v3  ;;  %v1685_v22 = vadd.f32 %v4764_v33, %v1684_v50  ;;  %v5826_v3 = vld [vmem:[#allocation35_spill] sm:$0xff] }
 0x504   :  { %1931 = vmatmul.bf16.gmra.mxu3 %v5799_v8  ;;  %1842 = vmatmul.bf16.gmra.mxu2 %v5800_v17  ;;  %v5820_v8 = vld [vmem:[#allocation29_spill] sm:$0xff] }
 0x505   :  { %1733 = vmatmul.bf16.gmra.mxu1 %v5810_v7  ;;  %v1694_v56 = vpop.f32.mrf.mxu1 }
 0x507   :  { %v1803_v13 = vpop.f32.mrf.mxu2 }
 0x508   :  { %v1804_v19 = vadd.f32 %v1803_v13, %v1675_v29  ;;  %v5822_v13 = vld [vmem:[#allocation43_spill] sm:$0xff]  ;;  %v1692_v29 = vadd.f32 %v4764_v33, %v1691_v42 }
 0x50d   :  { %v1696_v39 = vpop.f32.mrf.mxu1 }
 0x50f   :  { %v1805_v31 = vpop.f32.mrf.mxu2 }
 0x510   :  { %v1806_v62 = vadd.f32 %v1805_v31, %v1677_v52  ;;  %v5824_v31 = vld [vmem:[#allocation42_spill] sm:$0xff] }
 0x514   :  { %1936 = vmatmul.bf16.gmra.mxu3 %v5801_v26  ;;  %1847 = vmatmul.bf16.gmra.mxu2 %v5802_v18  ;;  %v5821_v18 = vld [vmem:[#allocation39_spill] sm:$0xff] }
 0x515   :  { %1738 = vmatmul.bf16.gmra.mxu1 %v5813_v58  ;;  %v1699_v55 = vpop.f32.mrf.mxu1 }
 0x517   :  { %v1808_v5 = vpop.f32.mrf.mxu2 }
 0x518   :  { %v1809_v17 = vadd.f32 %v1808_v5, %v1680_v6  ;;  %v1687_v5 = vadd.f32 %v4764_v33, %v1686_v34 }
 0x51f   :  { %v1810_v1 = vpop.f32.mrf.mxu2 }
 0x524   :  { %1941 = vmatmul.bf16.gmra.mxu3 %v5803_v61  ;;  %1852 = vmatmul.bf16.gmra.mxu2 %v5804_v23 }
 0x525   :  { %1743 = vmatmul.bf16.gmra.mxu1 %v5816_v40 }
 0x527   :  { %v1813_v45 = vpop.f32.mrf.mxu2 }
 0x528   :  { %v1814_v7 = vadd.f32 %v1813_v45, %v1685_v22 }
 0x52f   :  { %v1815_v24 = vpop.f32.mrf.mxu2 }
 0x530   :  { %v1816_v58 = vadd.f32 %v1815_v24, %v1687_v5 }
 0x534   :  { %1946 = vmatmul.bf16.gmra.mxu3 %v5805_v37  ;;  %1857 = vmatmul.bf16.gmra.mxu2 %v5809_v53  ;;  %v1682_v37 = vadd.f32 %v4764_v33, %v1681_v4 }
 0x535   :  { %1748 = vmatmul.bf16.gmra.mxu1 %v5819_v63  ;;  %v1697_v63 = vadd.f32 %v4764_v33, %v1696_v39  ;;  %v5833_v39 = vld [vmem:[#allocation51_spill] sm:$0xff] }
 0x536   :  { %v1811_v2 = vadd.f32 %v1810_v1, %v1682_v37  ;;  %v1690_v1 = vadd.f32 %v4764_v33, %v1689_v54  ;;  %v5828_v54 = vld [vmem:[#allocation49_spill] sm:$0xff]  ;;  %v1700_v37 = vadd.f32 %v4764_v33, %v1699_v55 }
 0x537   :  { %v1818_v41 = vpop.f32.mrf.mxu2 }
 0x538   :  { %v1819_v50 = vadd.f32 %v1818_v41, %v1690_v1  ;;  %v5829_v41 = vld [vmem:[#allocation38_spill] sm:$0xff]  ;;  %v5835_v1 = vld [vmem:[#allocation44_spill] sm:$0xff] }
 0x53f   :  { %v1820_v26 = vpop.f32.mrf.mxu2 }
 0x544   :  { %1951 = vmatmul.bf16.gmra.mxu3 %v5806_v12  ;;  %1862 = vmatmul.bf16.gmra.mxu2 %v5812_v47 }
 0x545   :  { %1753 = vmatmul.bf16.gmra.mxu1 %v5822_v13 }
 0x547   :  { %v1823_v60 = vpop.f32.mrf.mxu2 }
 0x554   :  { %1956 = vmatmul.bf16.gmra.mxu3 %v5808_v21  ;;  %1867 = vmatmul.bf16.gmra.mxu2 %v5815_v57 }
 0x564   :  { %1961 = vmatmul.bf16.gmra.mxu3 %v5811_v25  ;;  %1872 = vmatmul.bf16.gmra.mxu2 %v5818_v44  ;;  %v1825_v25 = vpop.f32.mrf.mxu2 }
 0x56c   :  { %v1828_v4 = vpop.f32.mrf.mxu2 }
 0x574   :  { %1966 = vmatmul.bf16.gmra.mxu3 %v5814_v28  ;;  %1877 = vmatmul.bf16.gmra.mxu2 %v5821_v18  ;;  %v1830_v45 = vpop.f32.mrf.mxu2  ;;  %v1826_v18 = vadd.f32 %v1825_v25, %v1697_v63 }
 0x577   :  { %v1927_v10 = vpop.f32.mrf.mxu3 }
 0x578   :  { %v1928_v9 = vadd.f32 %v1927_v10, %v1799_v43  ;;  %v1701_v10 = vpop.f32.mrf.mxu1 }
 0x57a   :  { %v4776_v27 = vsel %vm2049_vm0, %v1928_v9, -inf  ;;  %v5825_v9 = vld [vmem:[#allocation46_spill] sm:$0xff] }
 0x57b   :  { %2098 = vmax.xlane.f32.xlu0 %v4776_v27  ;;  %1758 = vmatmul.bf16.gmra.mxu1 %v5825_v9 }
 0x57f   :  { %v1929_v38 = vpop.f32.mrf.mxu3 }
 0x580   :  { %v1930_v0 = vadd.f32 %v1929_v38, %v1801_v20  ;;  %v5827_v20 = vld [vmem:[#allocation45_spill] sm:$0xff]  ;;  %v1704_v40 = vpop.f32.mrf.mxu1 }
 0x582   :  { %v4782_v59 = vsel %vm2049_vm0, %v1930_v0, -inf }
 0x583   :  { %2100 = vmax.xlane.f32.xlu0 %v4782_v59 }
 0x584   :  { %1971 = vmatmul.bf16.gmra.mxu3 %v5817_v14  ;;  %1882 = vmatmul.bf16.gmra.mxu2 %v5824_v31  ;;  %v1833_v14 = vpop.f32.mrf.mxu2 }
 0x587   :  { %v1932_v30 = vpop.f32.mrf.mxu3 }
 0x588   :  { %v1933_v15 = vadd.f32 %v1932_v30, %v1804_v19  ;;  %v1821_v19 = vadd.f32 %v1820_v26, %v1692_v29  ;;  %v1695_v30 = vadd.f32 %v4764_v33, %v1694_v56  ;;  %v1706_v52 = vpop.f32.mrf.mxu1 }
 0x58a   :  { %v4791_v32 = vsel %vm2049_vm0, %v1933_v15, -inf }
 0x58b   :  { %2102 = vmax.xlane.f32.xlu1 %v4791_v32  ;;  %1763 = vmatmul.bf16.gmra.mxu1 %v5828_v54 }
 0x58f   :  { %v1934_v16 = vpop.f32.mrf.mxu3 }
 0x590   :  { %v1935_v35 = vadd.f32 %v1934_v16, %v1806_v62  ;;  %v1824_v62 = vadd.f32 %v1823_v60, %v1695_v30  ;;  %v1835_v16 = vpop.f32.mrf.mxu2 }
 0x592   :  { %v4797_v51 = vsel %vm2049_vm0, %v1935_v35, -inf  ;;  %v5830_v35 = vld [vmem:[#allocation48_spill] sm:$0xff] }
 0x593   :  { %2104 = vmax.xlane.f32.xlu1 %v4797_v51 }
 0x594   :  { %1976 = vmatmul.bf16.gmra.mxu3 %v5820_v8  ;;  %1887 = vmatmul.bf16.gmra.mxu2 %v5827_v20  ;;  %v1707_v20 = vadd.f32 %v4764_v33, %v1706_v52 }
 0x597   :  { %v1937_v61 = vpop.f32.mrf.mxu3 }
 0x598   :  { %v1938_v23 = vadd.f32 %v1937_v61, %v1809_v17  ;;  %v1709_v17 = vpop.f32.mrf.mxu1  ;;  %v1838_v26 = vpop.f32.mrf.mxu2 }
 0x599   :  { %v1710_v30 = vadd.f32 %v4764_v33, %v1709_v17 }
 0x59a   :  { %v4806_v12 = vsel %vm2049_vm0, %v1938_v23, -inf }
 0x59b   :  { %2106 = vmax.xlane.f32.xlu2 %v4806_v12 }
 0x59f   :  { %v1939_v49 = vpop.f32.mrf.mxu3 }
 0x5a0   :  { %v1940_v21 = vadd.f32 %v1939_v49, %v1811_v2  ;;  %v1711_v60 = vpop.f32.mrf.mxu1  ;;  %v5831_v2 = vld [vmem:[#allocation52_spill] sm:$0xff]  ;;  %v5832_v49 = vld [vmem:[#allocation41_spill] sm:$0xff]  ;;  %v1840_v22 = vpop.f32.mrf.mxu2 }
 0x5a1   :  { %1768 = vmatmul.bf16.gmra.mxu1 %v5831_v2 }
 0x5a2   :  { %v4812_v53 = vsel %vm2049_vm0, %v1940_v21, -inf  ;;  %v1829_v21 = vadd.f32 %v1828_v4, %v1700_v37  ;;  %v1705_v4 = vadd.f32 %v4764_v33, %v1704_v40  ;;  %v1836_v40 = vadd.f32 %v1835_v16, %v1707_v20  ;;  %v5838_v16 = vld [vmem:[#allocation47_spill] sm:$0xff] }
 0x5a3   :  { %2108 = vmax.xlane.f32.xlu2 %v4812_v53  ;;  %v1712_v37 = vadd.f32 %v4764_v33, %v1711_v60 }
 0x5a4   :  { %1981 = vmatmul.bf16.gmra.mxu3 %v5823_v48  ;;  %1892 = vmatmul.bf16.gmra.mxu2 %v5830_v35  ;;  %v1839_v35 = vadd.f32 %v1838_v26, %v1710_v30 }
 0x5a7   :  { %v1942_v47 = vpop.f32.mrf.mxu3 }
 0x5a8   :  { %v1943_v46 = vadd.f32 %v1942_v47, %v1814_v7  ;;  %v1702_v7 = vadd.f32 %v4764_v33, %v1701_v10  ;;  %v1714_v31 = vpop.f32.mrf.mxu1  ;;  %v4869_v47 = vpop.f32.mrf.mxu2  ;;  %v1834_v10 = vadd.f32 %v1833_v14, %v1705_v4 }
 0x5aa   :  { %v4821_v36 = vsel %vm2049_vm0, %v1943_v46, -inf  ;;  %v1831_v46 = vadd.f32 %v1830_v45, %v1702_v7  ;;  %v1715_v7 = vadd.f32 %v4764_v33, %v1714_v31 }
 0x5ab   :  { %2110 = vmax.xlane.f32.xlu0 %v4821_v36 }
 0x5ac   :  { %v1844_v31 = vadd.f32 %v4869_v47, %v1715_v7 }
 0x5af   :  { %v1944_v28 = vpop.f32.mrf.mxu3 }
 0x5b0   :  { %v1945_v43 = vadd.f32 %v1944_v28, %v1816_v58  ;;  %v4877_v28 = vpop.f32.mrf.mxu1  ;;  %v4881_v9 = vpop.f32.mrf.mxu2 }
 0x5b2   :  { %v4827_v57 = vsel %vm2049_vm0, %v1945_v43, -inf  ;;  %v5834_v43 = vld [vmem:[#allocation55_spill] sm:$0xff] }
 0x5b3   :  { %2112 = vmax.xlane.f32.xlu1 %v4827_v57  ;;  %1773 = vmatmul.bf16.gmra.mxu1 %v5834_v43  ;;  %v5841_v43 = vld [vmem:[#allocation61_spill] sm:$0xff] }
 0x5b4   :  { %1986 = vmatmul.bf16.gmra.mxu3 %v5826_v3  ;;  %1897 = vmatmul.bf16.gmra.mxu2 %v5833_v39  ;;  %v5836_v3 = vld [vmem:[#allocation54_spill] sm:$0xff] }
 0x5b7   :  { %v1947_v38 = vpop.f32.mrf.mxu3 }
 0x5b8   :  { %v1948_v0 = vadd.f32 %v1947_v38, %v1819_v50  ;;  %v4892_v29 = vpop.f32.mrf.mxu2 }
 0x5ba   :  { %v4836_v34 = vsel %vm2049_vm0, %v1948_v0, -inf  ;;  %v4890_v0 = vpop.f32.mrf.mxu1 }
 0x5bb   :  { %2114 = vmax.xlane.f32.xlu2 %v4836_v34 }
 0x5bf   :  { %v1949_v24 = vpop.f32.mrf.mxu3 }
 0x5c0   :  { %v1950_v44 = vadd.f32 %v1949_v24, %v1821_v19 }
 0x5c2   :  { %v4842_v15 = vsel %vm2049_vm0, %v1950_v44, -inf }
 0x5c3   :  { %2116 = vmax.xlane.f32.xlu0 %v4842_v15 }
 0x5c4   :  { %1991 = vmatmul.bf16.gmra.mxu3 %v5829_v41  ;;  %1902 = vmatmul.bf16.gmra.mxu2 %v5836_v3  ;;  %v4901_v41 = vpop.f32.mrf.mxu1 }
 0x5c7   :  { %v1952_v6 = vpop.f32.mrf.mxu3 }
 0x5c8   :  { %v1953_v42 = vadd.f32 %v1952_v6, %v1824_v62  ;;  %v5837_v62 = vld [vmem:[#allocation58_spill] sm:$0xff]  ;;  %v4905_v6 = vpop.f32.mrf.mxu2 }
 0x5c9   :  { %1778 = vmatmul.bf16.gmra.mxu1 %v5837_v62 }
 0x5ca   :  { %v4851_v8 = vsel %vm2049_vm0, %v1953_v42, -inf }
 0x5cb   :  { %2118 = vmax.xlane.f32.xlu1 %v4851_v8 }
 0x5cf   :  { %v1954_v61 = vpop.f32.mrf.mxu3 }
 0x5d0   :  { %v1955_v23 = vadd.f32 %v1954_v61, %v1826_v18 }
 0x5d2   :  { %v4857_v56 = vsel %vm2049_vm0, %v1955_v23, -inf }
 0x5d3   :  { %2120 = vmax.xlane.f32.xlu2 %v4857_v56 }
 0x5d4   :  { %1996 = vmatmul.bf16.gmra.mxu3 %v5832_v49  ;;  %v4920_v49 = vpop.f32.mrf.mxu1 }
 0x5d7   :  { %v1957_v13 = vpop.f32.mrf.mxu3 }
 0x5d8   :  { %v1958_v48 = vadd.f32 %v1957_v13, %v1829_v21  ;;  %v1841_v21 = vadd.f32 %v1840_v22, %v1712_v37 }
 0x5da   :  { %v4866_v25 = vsel %vm2049_vm0, %v1958_v48, -inf }
 0x5db   :  { %2122 = vmax.xlane.f32.xlu0 %v4866_v25 }
 0x5dc   :  { %v4936_v22 = vpop.f32.mrf.mxu1  ;;  %1783 = vmatmul.bf16.gmra.mxu1 %v5841_v43  ;;  %v1725_v43 = vadd.f32 %v4764_v33, %v4920_v49 }
 0x5df   :  { %v1959_v5 = vpop.f32.mrf.mxu3 }
 0x5e0   :  { %v1960_v55 = vadd.f32 %v1959_v5, %v1831_v46 }
 0x5e2   :  { %v4874_v58 = vsel %vm2049_vm0, %v1960_v55, -inf }
 0x5e3   :  { %2124 = vmax.xlane.f32.xlu1 %v4874_v58 }
 0x5e4   :  { %2001 = vmatmul.bf16.gmra.mxu3 %v5835_v1 }
 0x5e7   :  { %v1962_v50 = vpop.f32.mrf.mxu3 }
 0x5e8   :  { %v1963_v45 = vadd.f32 %v1962_v50, %v1834_v10  ;;  %v5842_v10 = vld [vmem:[#allocation60_spill] sm:$0xff] }
 0x5ea   :  { %v4887_v38 = vsel %vm2049_vm0, %v1963_v45, -inf }
 0x5eb   :  { %2126 = vmax.xlane.f32.xlu2 %v4887_v38 }
 0x5ee   :  { %v2099_v14 = vpop.xlane.xlu0 %2098 }
 0x5ef   :  { %v1964_v19 = vpop.f32.mrf.mxu3  ;;  %v2194_v24 = vsub.f32 %v4776_v27, %v2099_v14  ;;  %v5839_v27 = vld [vmem:[#allocation57_spill] sm:$0xff] }
 0x5f0   :  { %v1965_v44 = vadd.f32 %v1964_v19, %v1836_v40  ;;  %1907 = vmatmul.bf16.gmra.mxu2 %v5839_v27  ;;  %v1717_v19 = vadd.f32 %v4764_v33, %v4877_v28 }
 0x5f1   :  { %v2242_v54 = vmul.f32 1.442695, %v2194_v24 }
 0x5f2   :  { %v4898_v52 = vsel %vm2049_vm0, %v1965_v44, -inf  ;;  %v1846_v30 = vadd.f32 %v4881_v9, %v1717_v19  ;;  %v5843_v9 = vld [vmem:[#allocation53_spill] sm:$0xff] }
 0x5f3   :  { %3844 = vpow2.f32 %v2242_v54  ;;  %2128 = vmax.xlane.f32.xlu0 %v4898_v52 }
 0x5f4   :  { %2006 = vmatmul.bf16.gmra.mxu3 %v5838_v16 }
 0x5f6   :  { %v2101_v42 = vpop.xlane.xlu0 %2100 }
 0x5f7   :  { %v1967_v63 = vpop.f32.mrf.mxu3  ;;  %v2195_v17 = vsub.f32 %v4782_v59, %v2101_v42  ;;  %v4922_v59 = vpop.f32.mrf.mxu2 }
 0x5f8   :  { %v1968_v18 = vadd.f32 %v1967_v63, %v1839_v35  ;;  %v1720_v35 = vadd.f32 %v4764_v33, %v4890_v0  ;;  %v1854_v49 = vadd.f32 %v4922_v59, %v1725_v43 }
 0x5f9   :  { %v3845_v61 = vpop.eup %3844  ;;  %v2244_v23 = vmul.f32 1.442695, %v2195_v17 }
 0x5fa   :  { %v4912_v2 = vsel %vm2049_vm0, %v1968_v18, -inf  ;;  %v4916_v26 = vsel %vm2049_vm0, %v3845_v61, 0.0  ;;  %v1849_v0 = vadd.f32 %v4892_v29, %v1720_v35 }
 0x5fb   :  { %3846 = vpow2.f32 %v2244_v23  ;;  %2130 = vmax.xlane.f32.xlu1 %v4912_v2  ;;  %2386 = vadd.xlane.f32.xlu0 %v4916_v26 }
 0x5fe   :  { %v2103_v39 = vpop.xlane.xlu1 %2102 }
 0x5ff   :  { %v1969_v60 = vpop.f32.mrf.mxu3  ;;  %v2196_v13 = vsub.f32 %v4791_v32, %v2103_v39  ;;  %v5840_v32 = vld [vmem:[#allocation50_spill] sm:$0xff]  ;;  %v4941_v1 = vpop.f32.mrf.mxu2 }
 0x600   :  { %v1970_v48 = vadd.f32 %v1969_v60, %v1841_v21  ;;  %1912 = vmatmul.bf16.gmra.mxu2 %v5842_v10 }
 0x601   :  { %v3847_v46 = vpop.eup %3846  ;;  %v2246_v5 = vmul.f32 1.442695, %v2196_v13  ;;  %v1722_v13 = vadd.f32 %v4764_v33, %v4901_v41 }
 0x602   :  { %v4928_v55 = vsel %vm2049_vm0, %v1970_v48, -inf  ;;  %v4932_v4 = vsel %vm2049_vm0, %v3847_v46, 0.0 }
 0x603   :  { %3848 = vpow2.f32 %v2246_v5  ;;  %2132 = vmax.xlane.f32.xlu2 %v4928_v55  ;;  %2388 = vadd.xlane.f32.xlu1 %v4932_v4  ;;  %v1851_v46 = vadd.f32 %v4905_v6, %v1722_v13  ;;  %v5844_v6 = vld [vmem:[#allocation56_spill] sm:$0xff] }
 0x604   :  { %2011 = vmatmul.bf16.gmra.mxu3 %v5840_v32 }
 0x606   :  { %v2105_v3 = vpop.xlane.xlu1 %2104 }
 0x607   :  { %v1972_v50 = vpop.f32.mrf.mxu3  ;;  %v2197_v45 = vsub.f32 %v4797_v51, %v2105_v3  ;;  %v4957_v51 = vpop.f32.mrf.mxu1 }
 0x608   :  { %v1973_v20 = vadd.f32 %v1972_v50, %v1844_v31  ;;  %v4959_v44 = vpop.f32.mrf.mxu2 }
 0x609   :  { %v3849_v40 = vpop.eup %3848  ;;  %v2248_v14 = vmul.f32 1.442695, %v2197_v45 }
 0x60a   :  { %v4949_v24 = vsel %vm2049_vm0, %v1973_v20, -inf  ;;  %v4953_v47 = vsel %vm2049_vm0, %v3849_v40, 0.0 }
 0x60b   :  { %3850 = vpow2.f32 %v2248_v14  ;;  %2134 = vmax.xlane.f32.xlu0 %v4949_v24  ;;  %2390 = vadd.xlane.f32.xlu2 %v4953_v47 }
 0x60e   :  { %v2107_v28 = vpop.xlane.xlu2 %2106 }
 0x60f   :  { %v1974_v54 = vpop.f32.mrf.mxu3  ;;  %v2198_v62 = vsub.f32 %v4806_v12, %v2107_v28  ;;  %v4975_v12 = vpop.f32.mrf.mxu1 }
 0x610   :  { %v1975_v16 = vadd.f32 %v1974_v54, %v1846_v30  ;;  %v4979_v18 = vpop.f32.mrf.mxu2  ;;  %v1732_v43 = vadd.f32 %v4764_v33, %v4975_v12 }
 0x611   :  { %v3851_v27 = vpop.eup %3850  ;;  %v2250_v42 = vmul.f32 1.442695, %v2198_v62  ;;  %v1727_v62 = vadd.f32 %v4764_v33, %v4936_v22 }
 0x612   :  { %v4967_v63 = vsel %vm2049_vm0, %v3851_v27, 0.0  ;;  %v4971_v17 = vsel %vm2049_vm0, %v1975_v16, -inf }
 0x613   :  { %3852 = vpow2.f32 %v2250_v42  ;;  %2392 = vadd.xlane.f32.xlu0 %v4967_v63  ;;  %2136 = vmax.xlane.f32.xlu1 %v4971_v17  ;;  %v1856_v27 = vadd.f32 %v4941_v1, %v1727_v62  ;;  %v5845_v1 = vld [vmem:[#allocation59_spill] sm:$0xff] }
 0x614   :  { %2016 = vmatmul.bf16.gmra.mxu3 %v5843_v9 }
 0x616   :  { %v2109_v61 = vpop.xlane.xlu2 %2108 }
 0x617   :  { %v1977_v23 = vpop.f32.mrf.mxu3  ;;  %v2199_v37 = vsub.f32 %v4812_v53, %v2109_v61  ;;  %v4994_v53 = vpop.f32.mrf.mxu1  ;;  %v1730_v61 = vadd.f32 %v4764_v33, %v4957_v51 }
 0x618   :  { %v1978_v21 = vadd.f32 %v1977_v23, %v1849_v0  ;;  %v4996_v29 = vpop.f32.mrf.mxu2 }
 0x619   :  { %v3853_v39 = vpop.eup %3852  ;;  %v2252_v60 = vmul.f32 1.442695, %v2199_v37  ;;  %v1859_v51 = vadd.f32 %v4959_v44, %v1730_v61  ;;  %v1861_v44 = vadd.f32 %v4979_v18, %v1732_v43  ;;  %v5846_v18 = vld [vmem:[#allocation62_spill] sm:$0xff] }
 0x61a   :  { %v4986_v48 = vsel %vm2049_vm0, %v1978_v21, -inf  ;;  %v4990_v7 = vsel %vm2049_vm0, %v3853_v39, 0.0 }
 0x61b   :  { %3854 = vpow2.f32 %v2252_v60  ;;  %2138 = vmax.xlane.f32.xlu2 %v4986_v48  ;;  %2394 = vadd.xlane.f32.xlu1 %v4990_v7 }
 0x61e   :  { %v2111_v41 = vpop.xlane.xlu0 %2110 }
 0x61f   :  { %v1979_v5 = vpop.f32.mrf.mxu3  ;;  %v2200_v32 = vsub.f32 %v4821_v36, %v2111_v41  ;;  %v5012_v36 = vpop.f32.mrf.mxu1 }
 0x620   :  { %v1980_v31 = vadd.f32 %v1979_v5, %v1851_v46  ;;  %v5016_v20 = vpop.f32.mrf.mxu2 }
 0x621   :  { %v3855_v10 = vpop.eup %3854  ;;  %v2254_v3 = vmul.f32 1.442695, %v2200_v32 }
 0x622   :  { %v5004_v50 = vsel %vm2049_vm0, %v3855_v10, 0.0  ;;  %v5008_v45 = vsel %vm2049_vm0, %v1980_v31, -inf }
 0x623   :  { %2396 = vadd.xlane.f32.xlu2 %v5004_v50  ;;  %2140 = vmax.xlane.f32.xlu0 %v5008_v45  ;;  %3856 = vpow2.f32 %v2254_v3 }
 0x624   :  { %2021 = vmatmul.bf16.gmra.mxu3 %v5844_v6 }
 0x626   :  { %v2113_v40 = vpop.xlane.xlu1 %2112 }
 0x627   :  { %v1982_v14 = vpop.f32.mrf.mxu3  ;;  %v2201_v19 = vsub.f32 %v4827_v57, %v2113_v40  ;;  %v5031_v57 = vpop.f32.mrf.mxu1 }
 0x628   :  { %v1983_v30 = vadd.f32 %v1982_v14, %v1854_v49  ;;  %v5033_v59 = vpop.f32.mrf.mxu2  ;;  %v1735_v14 = vadd.f32 %v4764_v33, %v4994_v53 }
 0x629   :  { %v3857_v28 = vpop.eup %3856  ;;  %v2256_v54 = vmul.f32 1.442695, %v2201_v19 }
 0x62a   :  { %v5023_v16 = vsel %vm2049_vm0, %v1983_v30, -inf  ;;  %v5027_v35 = vsel %vm2049_vm0, %v3857_v28, 0.0  ;;  %v1864_v53 = vadd.f32 %v4996_v29, %v1735_v14 }
 0x62b   :  { %3858 = vpow2.f32 %v2256_v54  ;;  %2142 = vmax.xlane.f32.xlu1 %v5023_v16  ;;  %2398 = vadd.xlane.f32.xlu0 %v5027_v35 }
 0x62e   :  { %v2115_v22 = vpop.xlane.xlu2 %2114 }
 0x62f   :  { %v1984_v42 = vpop.f32.mrf.mxu3  ;;  %v2202_v9 = vsub.f32 %v4836_v34, %v2115_v22  ;;  %v5049_v34 = vpop.f32.mrf.mxu1 }
 0x630   :  { %v1985_v0 = vadd.f32 %v1984_v42, %v1856_v27  ;;  %v5054_v41 = vpop.f32.mrf.mxu2 }
 0x631   :  { %v3859_v23 = vpop.eup %3858  ;;  %v2258_v37 = vmul.f32 1.442695, %v2202_v9 }
 0x632   :  { %v5041_v21 = vsel %vm2049_vm0, %v1985_v0, -inf  ;;  %v5045_v39 = vsel %vm2049_vm0, %v3859_v23, 0.0  ;;  %v1737_v23 = vadd.f32 %v4764_v33, %v5012_v36 }
 0x633   :  { %2144 = vmax.xlane.f32.xlu2 %v5041_v21  ;;  %2400 = vadd.xlane.f32.xlu1 %v5045_v39  ;;  %3860 = vpow2.f32 %v2258_v37 }
 0x634   :  { %2026 = vmatmul.bf16.gmra.mxu3 %v5845_v1 }
 0x636   :  { %v2117_v60 = vpop.xlane.xlu0 %2116 }
 0x637   :  { %v1987_v13 = vpop.f32.mrf.mxu3  ;;  %v2203_v46 = vsub.f32 %v4842_v15, %v2117_v60  ;;  %v5068_v15 = vpop.f32.mrf.mxu1 }
 0x638   :  { %v1988_v5 = vadd.f32 %v1987_v13, %v1859_v51  ;;  %v5074_v28 = vpop.f32.mrf.mxu2  ;;  %v1866_v51 = vadd.f32 %v5016_v20, %v1737_v23 }
 0x639   :  { %v3861_v32 = vpop.eup %3860  ;;  %v2260_v31 = vmul.f32 1.442695, %v2203_v46 }
 0x63a   :  { %v5060_v10 = vsel %vm2049_vm0, %v1988_v5, -inf  ;;  %v5064_v3 = vsel %vm2049_vm0, %v3861_v32, 0.0  ;;  %v1740_v5 = vadd.f32 %v4764_v33, %v5031_v57 }
 0x63b   :  { %3862 = vpow2.f32 %v2260_v31  ;;  %2146 = vmax.xlane.f32.xlu0 %v5060_v10  ;;  %2402 = vadd.xlane.f32.xlu2 %v5064_v3 }
 0x63c   :  { %v1869_v20 = vadd.f32 %v5033_v59, %v1740_v5 }
 0x63e   :  { %v2119_v6 = vpop.xlane.xlu1 %2118 }
 0x63f   :  { %v1989_v49 = vpop.f32.mrf.mxu3  ;;  %v2204_v12 = vsub.f32 %v4851_v8, %v2119_v6  ;;  %v5086_v8 = vpop.f32.mrf.mxu1 }
 0x640   :  { %v1990_v40 = vadd.f32 %v1989_v49, %v1861_v44 }
 0x641   :  { %v3863_v19 = vpop.eup %3862  ;;  %v2262_v30 = vmul.f32 1.442695, %v2204_v12 }
 0x642   :  { %v5078_v54 = vsel %vm2049_vm0, %v1990_v40, -inf  ;;  %v5082_v62 = vsel %vm2049_vm0, %v3863_v19, 0.0 }
 0x643   :  { %2148 = vmax.xlane.f32.xlu1 %v5078_v54  ;;  %2404 = vadd.xlane.f32.xlu0 %v5082_v62  ;;  %3864 = vpow2.f32 %v2262_v30 }
 0x644   :  { %2031 = vmatmul.bf16.gmra.mxu3 %v5846_v18  ;;  %v1742_v18 = vadd.f32 %v4764_v33, %v5049_v34 }
 0x646   :  { %v2121_v27 = vpop.xlane.xlu2 %2120 }
 0x647   :  { %v1992_v22 = vpop.f32.mrf.mxu3  ;;  %v2205_v42 = vsub.f32 %v4857_v56, %v2121_v27  ;;  %v1875_v56 = vpop.f32.mrf.mxu2 }
 0x648   :  { %v1993_v9 = vadd.f32 %v1992_v22, %v1864_v53  ;;  %v5103_v29 = vpop.f32.mrf.mxu1 }
 0x649   :  { %v3865_v0 = vpop.eup %3864  ;;  %v2264_v61 = vmul.f32 1.442695, %v2205_v42 }
 0x64a   :  { %v5095_v37 = vsel %vm2049_vm0, %v1993_v9, -inf  ;;  %v5099_v1 = vsel %vm2049_vm0, %v3865_v0, 0.0  ;;  %v1745_v0 = vadd.f32 %v4764_v33, %v5068_v15 }
 0x64b   :  { %3866 = vpow2.f32 %v2264_v61  ;;  %2150 = vmax.xlane.f32.xlu2 %v5095_v37  ;;  %2406 = vadd.xlane.f32.xlu1 %v5099_v1 }
 0x64c   :  { %v1874_v15 = vadd.f32 %v5074_v28, %v1745_v0 }
 0x64e   :  { %v2123_v60 = vpop.xlane.xlu0 %2122 }
 0x64f   :  { %v1994_v36 = vpop.f32.mrf.mxu3  ;;  %v2206_v13 = vsub.f32 %v4866_v25, %v2123_v60  ;;  %v5847_v25 = vld [vmem:[#allocation63_spill] sm:$0xff]  ;;  %v1878_v57 = vpop.f32.mrf.mxu2 }
 0x650   :  { %v1995_v46 = vadd.f32 %v1994_v36, %v1866_v51  ;;  %v5122_v40 = vpop.f32.mrf.mxu1 }
 0x651   :  { %v3867_v32 = vpop.eup %3866  ;;  %v2266_v31 = vmul.f32 1.442695, %v2206_v13 }
 0x652   :  { %v5111_v43 = vsel %vm2049_vm0, %v3867_v32, 0.0  ;;  %v5115_v44 = vsel %vm2049_vm0, %v1995_v46, -inf }
 0x653   :  { %2408 = vadd.xlane.f32.xlu2 %v5111_v43  ;;  %2152 = vmax.xlane.f32.xlu0 %v5115_v44  ;;  %3868 = vpow2.f32 %v2266_v31 }
 0x654   :  { %2036 = vmatmul.bf16.gmra.mxu3 %v5847_v25 }
 0x656   :  { %v2125_v6 = vpop.xlane.xlu1 %2124 }
 0x657   :  { %v1997_v49 = vpop.f32.mrf.mxu3  ;;  %v2207_v12 = vsub.f32 %v4874_v58, %v2125_v6  ;;  %v1871_v58 = vadd.f32 %v5054_v41, %v1742_v18  ;;  %v5137_v42 = vpop.f32.mrf.mxu2  ;;  %v1750_v18 = vadd.f32 %v4764_v33, %v5103_v29 }
 0x658   :  { %v1998_v14 = vadd.f32 %v1997_v49, %v1869_v20  ;;  %v5142_v51 = vpop.f32.mrf.mxu1  ;;  %v1747_v20 = vadd.f32 %v4764_v33, %v5086_v8 }
 0x659   :  { %v3869_v19 = vpop.eup %3868  ;;  %v2268_v30 = vmul.f32 1.442695, %v2207_v12 }
 0x65a   :  { %v5128_v53 = vsel %vm2049_vm0, %v1998_v14, -inf  ;;  %v5132_v59 = vsel %vm2049_vm0, %v3869_v19, 0.0  ;;  %v1876_v28 = vadd.f32 %v1875_v56, %v1747_v20  ;;  %v1879_v56 = vadd.f32 %v1878_v57, %v1750_v18 }
 0x65b   :  { %3870 = vpow2.f32 %v2268_v30  ;;  %2154 = vmax.xlane.f32.xlu1 %v5128_v53  ;;  %2410 = vadd.xlane.f32.xlu0 %v5132_v59 }
 0x65e   :  { %v2127_v27 = vpop.xlane.xlu2 %2126 }
 0x65f   :  { %v1999_v22 = vpop.f32.mrf.mxu3  ;;  %v2208_v34 = vsub.f32 %v4887_v38, %v2127_v27  ;;  %v5848_v38 = vld [vmem:[#allocation64_spill] sm:$0xff]  ;;  %v5157_v25 = vpop.f32.mrf.mxu2 }
 0x660   :  { %v2000_v9 = vadd.f32 %v1999_v22, %v1871_v58 }
 0x661   :  { %v3871_v61 = vpop.eup %3870  ;;  %v2270_v23 = vmul.f32 1.442695, %v2208_v34 }
 0x662   :  { %v5146_v60 = vsel %vm2049_vm0, %v2000_v9, -inf  ;;  %v5150_v41 = vsel %vm2049_vm0, %v3871_v61, 0.0 }
 0x663   :  { %2156 = vmax.xlane.f32.xlu2 %v5146_v60  ;;  %2412 = vadd.xlane.f32.xlu1 %v5150_v41  ;;  %3872 = vpow2.f32 %v2270_v23 }
 0x664   :  { %2041 = vmatmul.bf16.gmra.mxu3 %v5848_v38 }
 0x666   :  { %v2129_v36 = vpop.xlane.xlu0 %2128 }
 0x667   :  { %v2002_v13 = vpop.f32.mrf.mxu3  ;;  %v2209_v46 = vsub.f32 %v4898_v52, %v2129_v36  ;;  %v5170_v52 = vpop.f32.mrf.mxu1 }
 0x668   :  { %v2003_v5 = vadd.f32 %v2002_v13, %v1874_v15 }
 0x669   :  { %v3873_v32 = vpop.eup %3872  ;;  %v2272_v31 = vmul.f32 1.442695, %v2209_v46 }
 0x66a   :  { %v5163_v6 = vsel %vm2049_vm0, %v2003_v5, -inf  ;;  %v5167_v49 = vsel %vm2049_vm0, %v3873_v32, 0.0  ;;  %v1752_v5 = vadd.f32 %v4764_v33, %v5122_v40 }
 0x66b   :  { %3874 = vpow2.f32 %v2272_v31  ;;  %2158 = vmax.xlane.f32.xlu0 %v5163_v6  ;;  %2414 = vadd.xlane.f32.xlu2 %v5167_v49 }
 0x66e   :  { %v2131_v12 = vpop.xlane.xlu1 %2130  ;;  %v2387_v14 = vpop.xlane.xlu0 %2386 }
 0x66f   :  { %v2004_v19 = vpop.f32.mrf.mxu3  ;;  %v2210_v8 = vsub.f32 %v4912_v2, %v2131_v12  ;;  %3876 = vrcp.f32 %v2387_v14  ;;  %v5186_v2 = vpop.f32.mrf.mxu2  ;;  %v2491_v31 = vand.u32 2147483647, %v2387_v14  ;;  %v2493_v20 = vand.u32 2147483648, %v2387_v14 }
 0x670   :  { %v2005_v30 = vadd.f32 %v2004_v19, %v1876_v28  ;;  %v5188_v29 = vpop.f32.mrf.mxu1  ;;  %vm2487_vm2 = vweird.f32 %v2387_v14 }
 0x671   :  { %v3875_v58 = vpop.eup %3874  ;;  %v2274_v27 = vmul.f32 1.442695, %v2210_v8  ;;  %v2494_v19 = vor.u32 1.1754944e-38, %v2493_v20  ;;  %vm2492_vm4 = vcmp.eq.f32.partialorder %v2491_v31, 8.507059e+37 }
 0x672   :  { %v5178_v22 = vsel %vm2049_vm0, %v2005_v30, -inf  ;;  %v5182_v34 = vsel %vm2049_vm0, %v3875_v58, 0.0  ;;  %v1881_v30 = vadd.f32 %v5137_v42, %v1752_v5 }
 0x673   :  { %3878 = vpow2.f32 %v2274_v27  ;;  %2160 = vmax.xlane.f32.xlu1 %v5178_v22  ;;  %2416 = vadd.xlane.f32.xlu0 %v5182_v34 }
 0x675   :  { %v3877_v9 = vpop.eup %3876 }
 0x676   :  { %v2133_v0 = vpop.xlane.xlu2 %2132  ;;  %v2389_v61 = vpop.xlane.xlu1 %2388  ;;  %v2483_v23 = vmul.f32 %v3877_v9, %v2387_v14  ;;  %vm2488_vm1 = vweird.f32 %v3877_v9 }
 0x677   :  { %v2007_v38 = vpop.f32.mrf.mxu3  ;;  %v2211_v15 = vsub.f32 %v4928_v55, %v2133_v0  ;;  %3880 = vrcp.f32 %v2389_v61  ;;  %vm2489_vm3 = vmor %vm2487_vm2, %vm2488_vm1  ;;  %v5203_v8 = vpop.f32.mrf.mxu2  ;;  %v2508_v5 = vand.u32 2147483648, %v2389_v61  ;;  %vm2502_vm6 = vweird.f32 %v2389_v61 }
 0x678   :  { %v2008_v36 = vadd.f32 %v2007_v38, %v1879_v56  ;;  %v2484_v13 = vsub.f32 1.0, %v2483_v23 }
 0x679   :  { %v3879_v46 = vpop.eup %3878  ;;  %v2276_v32 = vmul.f32 1.442695, %v2211_v15  ;;  %v5209_v15 = vpop.f32.mrf.mxu1 }
 0x67a   :  { %v2485_v57 = vmul.f32 %v3877_v9, %v2484_v13  ;;  %v5195_v28 = vsel %vm2049_vm0, %v2008_v36, -inf  ;;  %v5199_v12 = vsel %vm2049_vm0, %v3879_v46, 0.0  ;;  %v1755_v36 = vadd.f32 %v4764_v33, %v5142_v51 }
 0x67b   :  { %3882 = vpow2.f32 %v2276_v32  ;;  %2162 = vmax.xlane.f32.xlu2 %v5195_v28  ;;  %2418 = vadd.xlane.f32.xlu1 %v5199_v12  ;;  %v2506_v46 = vand.u32 2147483647, %v2389_v61 }
 0x67c   :  { %v2486_v55 = vadd.f32 %v3877_v9, %v2485_v57 }
 0x67d   :  { %v3881_v40 = vpop.eup %3880  ;;  %vm2507_vm8 = vcmp.eq.f32.partialorder %v2506_v46, 8.507059e+37 }
 0x67e   :  { %v2498_v18 = vmul.f32 %v3881_v40, %v2389_v61  ;;  %v2490_v58 = vsel %vm2489_vm3, %v3877_v9, %v2486_v55  ;;  %v2135_v27 = vpop.xlane.xlu0 %2134  ;;  %v5206_v56 = vpop.xlane.xlu2 %2390  ;;  %vm2503_vm5 = vweird.f32 %v3881_v40  ;;  %v2509_v55 = vor.u32 1.1754944e-38, %v2508_v5 }
 0x67f   :  { %v2009_v0 = vpop.f32.mrf.mxu3  ;;  %v2495_v23 = vsel %vm2492_vm4, %v2494_v19, %v2490_v58  ;;  %v2212_v38 = vsub.f32 %v4949_v24, %v2135_v27  ;;  %3884 = vrcp.f32 %v5206_v56  ;;  %vm2504_vm7 = vmor %vm2502_vm6, %vm2503_vm5  ;;  %vm2517_vm10 = vweird.f32 %v5206_v56 }
 0x680   :  { %v2010_v14 = vadd.f32 %v2009_v0, %v1881_v30  ;;  %v2499_v13 = vsub.f32 1.0, %v2498_v18  ;;  %v2496_v42 = vmul.f32 %v2495_v23, %v4916_v26  ;;  %v1884_v26 = vadd.f32 %v5157_v25, %v1755_v36  ;;  %v5229_v23 = vpop.f32.mrf.mxu2 }
 0x681   :  { %v3883_v9 = vpop.eup %3882  ;;  %v2278_v32 = vmul.f32 1.442695, %v2212_v38  ;;  %v5238_v46 = vpop.f32.mrf.mxu1 }
 0x682   :  { %v2500_v31 = vmul.f32 %v3881_v40, %v2499_v13  ;;  %3202 = vst [vmem:[#allocation10] sm:$0xff] %v2496_v42  ;;  %v5217_v24 = vsel %vm2049_vm0, %v3883_v9, 0.0  ;;  %v5221_v20 = vsel %vm2049_vm0, %v2010_v14, -inf  ;;  %v2521_v13 = vand.u32 2147483647, %v5206_v56 }
 0x683   :  { %3886 = vpow2.f32 %v2278_v32  ;;  %2420 = vadd.xlane.f32.xlu2 %v5217_v24  ;;  %2164 = vmax.xlane.f32.xlu0 %v5221_v20  ;;  %v2523_v42 = vand.u32 2147483648, %v5206_v56 }
 0x684   :  { %v2501_v51 = vadd.f32 %v3881_v40, %v2500_v31  ;;  %vm2522_vm12 = vcmp.eq.f32.partialorder %v2521_v13, 8.507059e+37 }
 0x685   :  { %v3885_v57 = vpop.eup %3884  ;;  %v2524_v32 = vor.u32 1.1754944e-38, %v2523_v42 }
 0x686   :  { %v2505_v19 = vsel %vm2504_vm7, %v3881_v40, %v2501_v51  ;;  %v2513_v30 = vmul.f32 %v3885_v57, %v5206_v56  ;;  %v2137_v18 = vpop.xlane.xlu1 %2136  ;;  %v5227_v58 = vpop.xlane.xlu0 %2392  ;;  %v1757_v40 = vadd.f32 %v4764_v33, %v5170_v52  ;;  %vm2518_vm9 = vweird.f32 %v3885_v57  ;;  %v5260_v56 = vld [vmem:[%s5693_s5] ss:$0 sm:$0xff]  ;;  %s4174_s5 = smov [#allocation10]  }
 0x687   :  { %v2012_v27 = vpop.f32.mrf.mxu3  ;;  %v2510_v0 = vsel %vm2507_vm8, %v2509_v55, %v2505_v19  ;;  %v2213_v38 = vsub.f32 %v4971_v17, %v2137_v18  ;;  %3888 = vrcp.f32 %v5227_v58  ;;  %vm2519_vm11 = vmor %vm2517_vm10, %vm2518_vm9  ;;  %vm2532_vm14 = vweird.f32 %v5227_v58  ;;  %s3254_s24 = sshll.u32 %s4174_s5, 4  ;;  %s3255_s24 = int_to_ptr.vmem [resolvable:$true] %s3254_s24 }
 0x688   :  { %v2013_v25 = vadd.f32 %v2012_v27, %v1884_v26  ;;  %v2511_v61 = vmul.f32 %v2510_v0, %v4932_v4  ;;  %v2514_v14 = vsub.f32 1.0, %v2513_v30  ;;  %v1886_v31 = vadd.f32 %v5186_v2, %v1757_v40 }
 0x689   :  { %v3887_v36 = vpop.eup %3886  ;;  %v2280_v9 = vmul.f32 1.442695, %v2213_v38  ;;  %v1760_v2 = vadd.f32 %v5260_v56, %v5188_v29 }
 0x68a   :  { %3203 = vst [vmem:[#allocation10 + $0x8] sm:$0xff] %v2511_v61  ;;  %v2515_v5 = vmul.f32 %v3885_v57, %v2514_v14  ;;  %v5242_v17 = vsel %vm2049_vm0, %v2013_v25, -inf  ;;  %v5246_v4 = vsel %vm2049_vm0, %v3887_v36, 0.0  ;;  %v2536_v61 = vand.u32 2147483647, %v5227_v58 }
 0x68b   :  { %3890 = vpow2.f32 %v2280_v9  ;;  %2166 = vmax.xlane.f32.xlu1 %v5242_v17  ;;  %2422 = vadd.xlane.f32.xlu0 %v5246_v4  ;;  %v2538_v14 = vand.u32 2147483648, %v5227_v58  ;;  %v1889_v42 = vadd.f32 %v5203_v8, %v1760_v2 }
 0x68c   :  { %v2516_v33 = vadd.f32 %v3885_v57, %v2515_v5  ;;  %vm2537_vm1 = vcmp.eq.f32.partialorder %v2536_v61, 8.507059e+37 }
 0x68d   :  { %v3889_v52 = vpop.eup %3888 }
 0x68e   :  { %v2520_v26 = vsel %vm2519_vm11, %v3885_v57, %v2516_v33  ;;  %v2528_v51 = vmul.f32 %v3889_v52, %v5227_v58  ;;  %v2139_v55 = vpop.xlane.xlu2 %2138  ;;  %v5253_v19 = vpop.xlane.xlu1 %2394  ;;  %vm2533_vm13 = vweird.f32 %v3889_v52  ;;  %v2539_v33 = vor.u32 1.1754944e-38, %v2538_v14 }
 0x68f   :  { %v2014_v30 = vpop.f32.mrf.mxu3  ;;  %v2525_v18 = vsel %vm2522_vm12, %v2524_v32, %v2520_v26  ;;  %v2214_v27 = vsub.f32 %v4986_v48, %v2139_v55  ;;  %3892 = vrcp.f32 %v5253_v19  ;;  %v5267_v48 = vpop.f32.mrf.mxu2  ;;  %vm2534_vm15 = vmor %vm2532_vm14, %vm2533_vm13  ;;  %v1762_v58 = vadd.f32 %v5260_v56, %v5209_v15 }
 0x690   :  { %v2015_v0 = vadd.f32 %v2014_v30, %v1886_v31  ;;  %v2526_v57 = vmul.f32 %v2525_v18, %v4953_v47  ;;  %v2529_v38 = vsub.f32 1.0, %v2528_v51  ;;  %v5277_v47 = vpop.f32.mrf.mxu1  ;;  %v2553_v2 = vand.u32 2147483648, %v5253_v19 }
 0x691   :  { %v3891_v25 = vpop.eup %3890  ;;  %v2282_v36 = vmul.f32 1.442695, %v2214_v27  ;;  %vm2547_vm3 = vweird.f32 %v5253_v19 }
 0x692   :  { %3204 = vst [vmem:[#allocation10 + $0x10] sm:$0xff] %v2526_v57  ;;  %v2530_v40 = vmul.f32 %v3889_v52, %v2529_v38  ;;  %v5271_v13 = vsel %vm2049_vm0, %v2015_v0, -inf  ;;  %v5275_v29 = vsel %vm2049_vm0, %v3891_v25, 0.0 }
 0x693   :  { %3894 = vpow2.f32 %v2282_v36  ;;  %2168 = vmax.xlane.f32.xlu2 %v5271_v13  ;;  %2424 = vadd.xlane.f32.xlu1 %v5275_v29  ;;  %v2554_v36 = vor.u32 1.1754944e-38, %v2553_v2 }
 0x694   :  { %v2531_v9 = vadd.f32 %v3889_v52, %v2530_v40 }
 0x695   :  { %v3893_v5 = vpop.eup %3892 }
 0x696   :  { %v2535_v32 = vsel %vm2534_vm15, %v3889_v52, %v2531_v9  ;;  %v5283_v31 = vpop.xlane.xlu2 %2396  ;;  %v2543_v26 = vmul.f32 %v3893_v5, %v5253_v19  ;;  %v2141_v51 = vpop.xlane.xlu0 %2140  ;;  %v2551_v52 = vand.u32 2147483647, %v5253_v19  ;;  %vm2548_vm2 = vweird.f32 %v3893_v5 }
 0x697   :  { %v2017_v55 = vpop.f32.mrf.mxu3  ;;  %v2540_v30 = vsel %vm2537_vm1, %v2539_v33, %v2535_v32  ;;  %3896 = vrcp.f32 %v5283_v31  ;;  %v2215_v57 = vsub.f32 %v5008_v45, %v2141_v51  ;;  %v5301_v61 = vpop.f32.mrf.mxu2  ;;  %vm2549_vm4 = vmor %vm2547_vm3, %vm2548_vm2  ;;  %vm2562_vm7 = vweird.f32 %v5283_v31 }
 0x698   :  { %v2018_v18 = vadd.f32 %v2017_v55, %v1889_v42  ;;  %v2541_v8 = vmul.f32 %v2540_v30, %v4967_v63  ;;  %v2544_v27 = vsub.f32 1.0, %v2543_v26  ;;  %v5306_v40 = vpop.f32.mrf.mxu1  ;;  %v1891_v42 = vadd.f32 %v5229_v23, %v1762_v58 }
 0x699   :  { %v3895_v0 = vpop.eup %3894  ;;  %v2284_v15 = vmul.f32 1.442695, %v2215_v57  ;;  %vm2552_vm5 = vcmp.eq.f32.partialorder %v2551_v52, 8.507059e+37  ;;  %v2566_v58 = vand.u32 2147483647, %v5283_v31 }
 0x69a   :  { %3205 = vst [vmem:[#allocation10 + $0x18] sm:$0xff] %v2541_v8  ;;  %v2545_v38 = vmul.f32 %v3893_v5, %v2544_v27  ;;  %v5295_v25 = vsel %vm2049_vm0, %v2018_v18, -inf  ;;  %v5299_v63 = vsel %vm2049_vm0, %v3895_v0, 0.0  ;;  %v1765_v18 = vadd.f32 %v5260_v56, %v5238_v46 }
 0x69b   :  { %2170 = vmax.xlane.f32.xlu0 %v5295_v25  ;;  %2426 = vadd.xlane.f32.xlu2 %v5299_v63  ;;  %3898 = vpow2.f32 %v2284_v15  ;;  %v2568_v27 = vand.u32 2147483648, %v5283_v31  ;;  %vm2567_vm9 = vcmp.eq.f32.partialorder %v2566_v58, 8.507059e+37 }
 0x69c   :  { %v2546_v14 = vadd.f32 %v3893_v5, %v2545_v38  ;;  %v1894_v46 = vadd.f32 %v5267_v48, %v1765_v18  ;;  %v1767_v18 = vadd.f32 %v5260_v56, %v5277_v47 }
 0x69d   :  { %v3897_v45 = vpop.eup %3896  ;;  %v2569_v38 = vor.u32 1.1754944e-38, %v2568_v27 }
 0x69e   :  { %v2558_v9 = vmul.f32 %v3897_v45, %v5283_v31  ;;  %v2550_v33 = vsel %vm2549_vm4, %v3893_v5, %v2546_v14  ;;  %v2143_v32 = vpop.xlane.xlu1 %2142  ;;  %v5310_v26 = vpop.xlane.xlu0 %2398  ;;  %vm2563_vm6 = vweird.f32 %v3897_v45 }
 0x69f   :  { %v2019_v51 = vpop.f32.mrf.mxu3  ;;  %v2555_v55 = vsel %vm2552_vm5, %v2554_v36, %v2550_v33  ;;  %v2216_v30 = vsub.f32 %v5023_v16, %v2143_v32  ;;  %3900 = vrcp.f32 %v5310_v26  ;;  %vm2564_vm8 = vmor %vm2562_vm7, %vm2563_vm6  ;;  %v1898_v15 = vpop.f32.mrf.mxu2  ;;  %vm2577_vm11 = vweird.f32 %v5310_v26 }
 0x6a0   :  { %v2020_v19 = vadd.f32 %v2019_v51, %v1891_v42  ;;  %v2559_v8 = vsub.f32 1.0, %v2558_v9  ;;  %v2556_v23 = vmul.f32 %v2555_v55, %v4990_v7  ;;  %v5334_v31 = vpop.f32.mrf.mxu1 }
 0x6a1   :  { %v2286_v5 = vmul.f32 1.442695, %v2216_v30  ;;  %v3899_v52 = vpop.eup %3898 }
 0x6a2   :  { %v2560_v0 = vmul.f32 %v3897_v45, %v2559_v8  ;;  %3206 = vst [vmem:[#allocation10 + $0x20] sm:$0xff] %v2556_v23  ;;  %v5321_v16 = vsel %vm2049_vm0, %v2020_v19, -inf  ;;  %v5328_v7 = vsel %vm2049_vm0, %v3899_v52, 0.0  ;;  %v2583_v8 = vand.u32 2147483648, %v5310_v26 }
 0x6a3   :  { %3902 = vpow2.f32 %v2286_v5  ;;  %2172 = vmax.xlane.f32.xlu1 %v5321_v16  ;;  %2428 = vadd.xlane.f32.xlu0 %v5328_v7 }
 0x6a4   :  { %v2561_v2 = vadd.f32 %v3897_v45, %v2560_v0  ;;  %v1896_v0 = vadd.f32 %v5301_v61, %v1767_v18  ;;  %v2584_v52 = vor.u32 1.1754944e-38, %v2583_v8 }
 0x6a5   :  { %v3901_v57 = vpop.eup %3900 }
 0x6a6   :  { %v2565_v14 = vsel %vm2564_vm8, %v3897_v45, %v2561_v2  ;;  %v2145_v36 = vpop.xlane.xlu2 %2144  ;;  %v5331_v42 = vpop.xlane.xlu1 %2400  ;;  %v2573_v48 = vmul.f32 %v3901_v57, %v5310_v26  ;;  %vm2578_vm10 = vweird.f32 %v3901_v57 }
 0x6a7   :  { %v2022_v9 = vpop.f32.mrf.mxu3  ;;  %v2570_v33 = vsel %vm2567_vm9, %v2569_v38, %v2565_v14  ;;  %v2217_v32 = vsub.f32 %v5041_v21, %v2145_v36  ;;  %3904 = vrcp.f32 %v5331_v42  ;;  %vm2579_vm12 = vmor %vm2577_vm11, %vm2578_vm10  ;;  %v1900_v14 = vpop.f32.mrf.mxu2  ;;  %vm2592_vm15 = vweird.f32 %v5331_v42 }
 0x6a8   :  { %v2023_v51 = vadd.f32 %v2022_v9, %v1894_v46  ;;  %v2571_v55 = vmul.f32 %v2570_v33, %v5004_v50  ;;  %v2574_v45 = vsub.f32 1.0, %v2573_v48  ;;  %v2581_v50 = vand.u32 2147483647, %v5310_v26 }
 0x6a9   :  { %v3903_v30 = vpop.eup %3902  ;;  %v2288_v19 = vmul.f32 1.442695, %v2217_v32  ;;  %v1770_v26 = vadd.f32 %v5260_v56, %v5306_v40 }
 0x6aa   :  { %3207 = vst [vmem:[#allocation10 + $0x28] sm:$0xff] %v2571_v55  ;;  %v5344_v23 = vsel %vm2049_vm0, %v2023_v51, -inf  ;;  %v5348_v21 = vsel %vm2049_vm0, %v3903_v30, 0.0  ;;  %v2575_v27 = vmul.f32 %v3901_v57, %v2574_v45  ;;  %vm2582_vm13 = vcmp.eq.f32.partialorder %v2581_v50, 8.507059e+37 }
 0x6ab   :  { %3906 = vpow2.f32 %v2288_v19  ;;  %2174 = vmax.xlane.f32.xlu2 %v5344_v23  ;;  %2430 = vadd.xlane.f32.xlu1 %v5348_v21  ;;  %v2596_v51 = vand.u32 2147483647, %v5331_v42  ;;  %v2598_v55 = vand.u32 2147483648, %v5331_v42  ;;  %v1774_v19 = vpop.f32.mrf.mxu1  ;;  %v1899_v18 = vadd.f32 %v1898_v15, %v1770_v26 }
 0x6ac   :  { %v2576_v5 = vadd.f32 %v3901_v57, %v2575_v27 }
 0x6ad   :  { %v3905_v47 = vpop.eup %3904  ;;  %v2599_v27 = vor.u32 1.1754944e-38, %v2598_v55  ;;  %vm2597_vm2 = vcmp.eq.f32.partialorder %v2596_v51, 8.507059e+37 }
 0x6ae   :  { %v2588_v58 = vmul.f32 %v3905_v47, %v5331_v42  ;;  %v2147_v46 = vpop.xlane.xlu0 %2146  ;;  %v5356_v2 = vpop.xlane.xlu2 %2402  ;;  %v2580_v36 = vsel %vm2579_vm12, %v3901_v57, %v2576_v5  ;;  %vm2593_vm14 = vweird.f32 %v3905_v47 }
 0x6af   :  { %v2024_v38 = vpop.f32.mrf.mxu3  ;;  %v2218_v48 = vsub.f32 %v5060_v10, %v2147_v46  ;;  %3908 = vrcp.f32 %v5356_v2  ;;  %v2585_v33 = vsel %vm2582_vm13, %v2584_v52, %v2580_v36  ;;  %vm2594_vm1 = vmor %vm2592_vm15, %vm2593_vm14  ;;  %v2611_v26 = vand.u32 2147483647, %v5356_v2 }
 0x6b0   :  { %v2025_v9 = vadd.f32 %v2024_v38, %v1896_v0  ;;  %v2589_v61 = vsub.f32 1.0, %v2588_v58  ;;  %v2586_v30 = vmul.f32 %v2585_v33, %v5027_v35  ;;  %vm2607_vm4 = vweird.f32 %v5356_v2 }
 0x6b1   :  { %v3907_v32 = vpop.eup %3906  ;;  %v2290_v57 = vmul.f32 1.442695, %v2218_v48  ;;  %vm2612_vm6 = vcmp.eq.f32.partialorder %v2611_v26, 8.507059e+37 }
 0x6b2   :  { %v2590_v45 = vmul.f32 %v3905_v47, %v2589_v61  ;;  %v5367_v10 = vsel %vm2049_vm0, %v3907_v32, 0.0  ;;  %v5371_v40 = vsel %vm2049_vm0, %v2025_v9, -inf  ;;  %3208 = vst [vmem:[#allocation10 + $0x30] sm:$0xff] %v2586_v30  ;;  %v1903_v9 = vpop.f32.mrf.mxu2  ;;  %v2613_v61 = vand.u32 2147483648, %v5356_v2 }
 0x6b3   :  { %3910 = vpow2.f32 %v2290_v57  ;;  %2432 = vadd.xlane.f32.xlu2 %v5367_v10  ;;  %2176 = vmax.xlane.f32.xlu0 %v5371_v40  ;;  %v1776_v51 = vpop.f32.mrf.mxu1 }
 0x6b4   :  { %v2591_v35 = vadd.f32 %v3905_v47, %v2590_v45  ;;  %v2614_v30 = vor.u32 1.1754944e-38, %v2613_v61 }
 0x6b5   :  { %v3909_v8 = vpop.eup %3908 }
 0x6b6   :  { %v2595_v50 = vsel %vm2594_vm1, %v3905_v47, %v2591_v35  ;;  %v2603_v5 = vmul.f32 %v3909_v8, %v5356_v2  ;;  %v2149_v0 = vpop.xlane.xlu1 %2148  ;;  %v5377_v58 = vpop.xlane.xlu0 %2404  ;;  %v1772_v47 = vadd.f32 %v5260_v56, %v5334_v31  ;;  %vm2608_vm3 = vweird.f32 %v3909_v8 }
 0x6b7   :  { %v2027_v52 = vpop.f32.mrf.mxu3  ;;  %v2600_v46 = vsel %vm2597_vm2, %v2599_v27, %v2595_v50  ;;  %v2219_v38 = vsub.f32 %v5078_v54, %v2149_v0  ;;  %3912 = vrcp.f32 %v5377_v58  ;;  %vm2609_vm5 = vmor %vm2607_vm4, %vm2608_vm3  ;;  %vm2622_vm8 = vweird.f32 %v5377_v58 }
 0x6b8   :  { %v2028_v15 = vadd.f32 %v2027_v52, %v1899_v18  ;;  %v2601_v36 = vmul.f32 %v2600_v46, %v5045_v39  ;;  %v2604_v42 = vsub.f32 1.0, %v2603_v5  ;;  %v1901_v57 = vadd.f32 %v1900_v14, %v1772_v47 }
 0x6b9   :  { %v3911_v48 = vpop.eup %3910  ;;  %v2292_v33 = vmul.f32 1.442695, %v2219_v38  ;;  %v1775_v46 = vadd.f32 %v5260_v56, %v1774_v19  ;;  %v2626_v14 = vand.u32 2147483647, %v5377_v58 }
 0x6ba   :  { %3209 = vst [vmem:[#allocation10 + $0x38] sm:$0xff] %v2601_v36  ;;  %v2605_v32 = vmul.f32 %v3909_v8, %v2604_v42  ;;  %v5388_v54 = vsel %vm2049_vm0, %v2028_v15, -inf  ;;  %v5392_v39 = vsel %vm2049_vm0, %v3911_v48, 0.0  ;;  %v1905_v19 = vpop.f32.mrf.mxu2 }
 0x6bb   :  { %3914 = vpow2.f32 %v2292_v33  ;;  %2178 = vmax.xlane.f32.xlu1 %v5388_v54  ;;  %2434 = vadd.xlane.f32.xlu0 %v5392_v39  ;;  %v1779_v33 = vpop.f32.mrf.mxu1  ;;  %vm2627_vm10 = vcmp.eq.f32.partialorder %v2626_v14, 8.507059e+37 }
 0x6bc   :  { %v2606_v31 = vadd.f32 %v3909_v8, %v2605_v32 }
 0x6bd   :  { %v3913_v55 = vpop.eup %3912 }
 0x6be   :  { %v2610_v45 = vsel %vm2609_vm5, %v3909_v8, %v2606_v31  ;;  %v2618_v18 = vmul.f32 %v3913_v55, %v5377_v58  ;;  %v2151_v35 = vpop.xlane.xlu2 %2150  ;;  %v2407_v27 = vpop.xlane.xlu1 %2406  ;;  %v2628_v8 = vand.u32 2147483648, %v5377_v58  ;;  %vm2623_vm7 = vweird.f32 %v3913_v55 }
 0x6bf   :  { %v2029_v50 = vpop.f32.mrf.mxu3  ;;  %v2615_v5 = vsel %vm2612_vm6, %v2614_v30, %v2610_v45  ;;  %v2220_v0 = vsub.f32 %v5095_v37, %v2151_v35  ;;  %3916 = vrcp.f32 %v2407_v27  ;;  %vm2624_vm9 = vmor %vm2622_vm8, %vm2623_vm7  ;;  %v1777_v58 = vadd.f32 %v5260_v56, %v1776_v51 }
 0x6c0   :  { %v2030_v52 = vadd.f32 %v2029_v50, %v1901_v57  ;;  %v2616_v2 = vmul.f32 %v2615_v5, %v5064_v3  ;;  %v2619_v38 = vsub.f32 1.0, %v2618_v18  ;;  %v1904_v3 = vadd.f32 %v1903_v9, %v1775_v46 }
 0x6c1   :  { %v3915_v15 = vpop.eup %3914  ;;  %v2294_v36 = vmul.f32 1.442695, %v2220_v0  ;;  %v2629_v61 = vor.u32 1.1754944e-38, %v2628_v8  ;;  %v2641_v0 = vand.u32 2147483647, %v2407_v27  ;;  %vm2637_vm12 = vweird.f32 %v2407_v27 }
 0x6c2   :  { %3210 = vst [vmem:[#allocation10 + $0x40] sm:$0xff] %v2616_v2  ;;  %v2620_v42 = vmul.f32 %v3913_v55, %v2619_v38  ;;  %v5405_v48 = vsel %vm2049_vm0, %v2030_v52, -inf  ;;  %v5409_v37 = vsel %vm2049_vm0, %v3915_v15, 0.0  ;;  %v2643_v52 = vand.u32 2147483648, %v2407_v27  ;;  %v1908_v38 = vpop.f32.mrf.mxu2 }
 0x6c3   :  { %3918 = vpow2.f32 %v2294_v36  ;;  %2180 = vmax.xlane.f32.xlu2 %v5405_v48  ;;  %2436 = vadd.xlane.f32.xlu1 %v5409_v37  ;;  %v1906_v14 = vadd.f32 %v1905_v19, %v1777_v58  ;;  %vm2642_vm14 = vcmp.eq.f32.partialorder %v2641_v0, 8.507059e+37 }
 0x6c4   :  { %v2621_v47 = vadd.f32 %v3913_v55, %v2620_v42  ;;  %v2644_v15 = vor.u32 1.1754944e-38, %v2643_v52 }
 0x6c5   :  { %v3917_v26 = vpop.eup %3916 }
 0x6c6   :  { %v2625_v32 = vsel %vm2624_vm9, %v3913_v55, %v2621_v47  ;;  %v2409_v31 = vpop.xlane.xlu2 %2408  ;;  %v2633_v30 = vmul.f32 %v3917_v26, %v2407_v27  ;;  %v5414_v57 = vpop.xlane.xlu0 %2152  ;;  %vm2638_vm11 = vweird.f32 %v3917_v26 }
 0x6c7   :  { %v2032_v45 = vpop.f32.mrf.mxu3  ;;  %v2630_v18 = vsel %vm2627_vm10, %v2629_v61, %v2625_v32  ;;  %3920 = vrcp.f32 %v2409_v31  ;;  %vm2639_vm13 = vmor %vm2637_vm12, %vm2638_vm11  ;;  %v2656_v19 = vand.u32 2147483647, %v2409_v31  ;;  %vm2652_vm1 = vweird.f32 %v2409_v31 }
 0x6c8   :  { %v2033_v35 = vadd.f32 %v2032_v45, %v1904_v3  ;;  %v2631_v50 = vmul.f32 %v2630_v18, %v5082_v62  ;;  %v2634_v9 = vsub.f32 1.0, %v2633_v30  ;;  %v1780_v30 = vadd.f32 %v5260_v56, %v1779_v33  ;;  %v1781_v45 = vpop.f32.mrf.mxu1 }
 0x6c9   :  { %v3919_v5 = vpop.eup %3918  ;;  %vm2657_vm3 = vcmp.eq.f32.partialorder %v2656_v19, 8.507059e+37 }
 0x6ca   :  { %3211 = vst [vmem:[#allocation10 + $0x48] sm:$0xff] %v2631_v50  ;;  %v5420_v55 = vsel %vm2049_vm0, %v2033_v35, -inf  ;;  %v2635_v46 = vmul.f32 %v3917_v26, %v2634_v9  ;;  %v5424_v2 = vsel %vm2049_vm0, %v3919_v5, 0.0  ;;  %v2658_v35 = vand.u32 2147483648, %v2409_v31 }
 0x6cb   :  { %2182 = vmax.xlane.f32.xlu0 %v5420_v55  ;;  %2438 = vadd.xlane.f32.xlu2 %v5424_v2  ;;  %v1909_v9 = vadd.f32 %v1908_v38, %v1780_v30  ;;  %v2221_v38 = vsub.f32 %v5115_v44, %v5414_v57 }
 0x6cc   :  { %v2636_v62 = vadd.f32 %v3917_v26, %v2635_v46  ;;  %v2659_v33 = vor.u32 1.1754944e-38, %v2658_v35 }
 0x6cd   :  { %v3921_v51 = vpop.eup %3920 }
 0x6ce   :  { %v2648_v8 = vmul.f32 %v3921_v51, %v2409_v31  ;;  %v2640_v36 = vsel %vm2639_vm13, %v3917_v26, %v2636_v62  ;;  %v5428_v42 = vpop.xlane.xlu1 %2154  ;;  %v2411_v3 = vpop.xlane.xlu0 %2410  ;;  %vm2653_vm15 = vweird.f32 %v3921_v51 }
 0x6cf   :  { %v2034_v47 = vpop.f32.mrf.mxu3  ;;  %v2645_v61 = vsel %vm2642_vm14, %v2644_v15, %v2640_v36  ;;  %3922 = vrcp.f32 %v2411_v3  ;;  %vm2654_vm2 = vmor %vm2652_vm1, %vm2653_vm15  ;;  %v1910_v15 = vpop.f32.mrf.mxu2  ;;  %v2222_v44 = vsub.f32 %v5128_v53, %v5428_v42  ;;  %vm2667_vm5 = vweird.f32 %v2411_v3 }
 0x6d0   :  { %v2035_v32 = vadd.f32 %v2034_v47, %v1906_v14  ;;  %v2649_v18 = vsub.f32 1.0, %v2648_v8  ;;  %v2646_v27 = vmul.f32 %v2645_v61, %v5099_v1  ;;  %v1782_v47 = vadd.f32 %v5260_v56, %v1781_v45 }
 0x6d2   :  { %v2650_v50 = vmul.f32 %v3921_v51, %v2649_v18  ;;  %3212 = vst [vmem:[#allocation10 + $0x50] sm:$0xff] %v2646_v27  ;;  %v5434_v26 = vsel %vm2049_vm0, %v2035_v32, -inf  ;;  %v2673_v32 = vand.u32 2147483648, %v2411_v3  ;;  %v2671_v18 = vand.u32 2147483647, %v2411_v3 }
 0x6d3   :  { %2184 = vmax.xlane.f32.xlu1 %v5434_v26  ;;  %v2296_v27 = vmul.f32 1.442695, %v2221_v38  ;;  %v1911_v45 = vadd.f32 %v1910_v15, %v1782_v47 }
 0x6d4   :  { %v2651_v5 = vadd.f32 %v3921_v51, %v2650_v50  ;;  %v2674_v50 = vor.u32 1.1754944e-38, %v2673_v32  ;;  %vm2672_vm7 = vcmp.eq.f32.partialorder %v2671_v18, 8.507059e+37 }
 0x6d5   :  { %v3923_v58 = vpop.eup %3922 }
 0x6d6   :  { %v2655_v0 = vsel %vm2654_vm2, %v3921_v51, %v2651_v5  ;;  %v5437_v1 = vpop.xlane.xlu2 %2156  ;;  %v2413_v52 = vpop.xlane.xlu1 %2412  ;;  %v2663_v46 = vmul.f32 %v3923_v58, %v2411_v3  ;;  %vm2668_vm4 = vweird.f32 %v3923_v58  ;;  %v2298_v3 = vmul.f32 1.442695, %v2222_v44 }
 0x6d7   :  { %v2037_v62 = vpop.f32.mrf.mxu3  ;;  %v2660_v14 = vsel %vm2657_vm3, %v2659_v33, %v2655_v0  ;;  %3924 = vrcp.f32 %v2413_v52  ;;  %v1784_v51 = vpop.f32.mrf.mxu1  ;;  %vm2669_vm6 = vmor %vm2667_vm5, %vm2668_vm4  ;;  %v2686_v15 = vand.u32 2147483647, %v2413_v52  ;;  %vm2682_vm9 = vweird.f32 %v2413_v52 }
 0x6d8   :  { %v2038_v8 = vadd.f32 %v2037_v62, %v1909_v9  ;;  %v2661_v36 = vmul.f32 %v2660_v14, %v5111_v43  ;;  %v2664_v31 = vsub.f32 1.0, %v2663_v46  ;;  %v1785_v33 = vadd.f32 %v5260_v56, %v1784_v51  ;;  %v1913_v42 = vpop.f32.mrf.mxu2 }
 0x6d9   :  { %v2688_v14 = vand.u32 2147483648, %v2413_v52  ;;  %vm2687_vm11 = vcmp.eq.f32.partialorder %v2686_v15, 8.507059e+37 }
 0x6da   :  { %3213 = vst [vmem:[#allocation10 + $0x58] sm:$0xff] %v2661_v36  ;;  %v5445_v61 = vsel %vm2049_vm0, %v2038_v8, -inf  ;;  %v2665_v30 = vmul.f32 %v3923_v58, %v2664_v31  ;;  %v1914_v31 = vadd.f32 %v1913_v42, %v1785_v33 }
 0x6db   :  { %2186 = vmax.xlane.f32.xlu2 %v5445_v61 }
 0x6dc   :  { %v2666_v57 = vadd.f32 %v3923_v58, %v2665_v30  ;;  %v2689_v30 = vor.u32 1.1754944e-38, %v2688_v14 }
 0x6dd   :  { %v3925_v43 = vpop.eup %3924 }
 0x6de   :  { %v2678_v35 = vmul.f32 %v3925_v43, %v2413_v52  ;;  %v2159_v19 = vpop.xlane.xlu0 %2158  ;;  %v5450_v9 = vpop.xlane.xlu2 %2414  ;;  %v2670_v0 = vsel %vm2669_vm6, %v3923_v58, %v2666_v57  ;;  %vm2683_vm8 = vweird.f32 %v3925_v43 }
 0x6df   :  { %v2039_v5 = vpop.f32.mrf.mxu3  ;;  %3926 = vrcp.f32 %v5450_v9  ;;  %v2675_v53 = vsel %vm2672_vm7, %v2674_v50, %v2670_v0  ;;  %v2224_v58 = vsub.f32 %v5163_v6, %v2159_v19  ;;  %v1786_v47 = vpop.f32.mrf.mxu1  ;;  %vm2684_vm10 = vmor %vm2682_vm9, %vm2683_vm8  ;;  %v2223_v19 = vsub.f32 %v5146_v60, %v5437_v1 }
 0x6e0   :  { %3928 = vpow2.f32 %v2296_v27  ;;  %v2040_v46 = vadd.f32 %v2039_v5, %v1911_v45  ;;  %v2679_v62 = vsub.f32 1.0, %v2678_v35  ;;  %v2676_v8 = vmul.f32 %v2675_v53, %v5132_v59  ;;  %v1915_v1 = vpop.f32.mrf.mxu2 }
 0x6e1   :  { %3930 = vpow2.f32 %v2298_v3  ;;  %v2302_v27 = vmul.f32 1.442695, %v2224_v58  ;;  %v1787_v35 = vadd.f32 %v5260_v56, %v1786_v47  ;;  %v2701_v0 = vand.u32 2147483647, %v5450_v9 }
 0x6e2   :  { %v5457_v36 = vsel %vm2049_vm0, %v2040_v46, -inf  ;;  %v2680_v38 = vmul.f32 %v3925_v43, %v2679_v62  ;;  %3214 = vst [vmem:[#allocation10 + $0x60] sm:$0xff] %v2676_v8  ;;  %v2703_v46 = vand.u32 2147483648, %v5450_v9  ;;  %v2300_v53 = vmul.f32 1.442695, %v2223_v19 }
 0x6e3   :  { %2188 = vmax.xlane.f32.xlu0 %v5457_v36  ;;  %vm2697_vm13 = vweird.f32 %v5450_v9  ;;  %v1916_v14 = vadd.f32 %v1915_v1, %v1787_v35  ;;  %vm2702_vm15 = vcmp.eq.f32.partialorder %v2701_v0, 8.507059e+37 }
 0x6e4   :  { %v2681_v51 = vadd.f32 %v3925_v43, %v2680_v38 }
 0x6e5   :  { %v3927_v32 = vpop.eup %3926 }
 0x6e6   :  { %v3929_v59 = vpop.eup %3928  ;;  %v2685_v18 = vsel %vm2684_vm10, %v3925_v43, %v2681_v51  ;;  %v2693_v44 = vmul.f32 %v3927_v32, %v5450_v9  ;;  %v2161_v57 = vpop.xlane.xlu1 %2160  ;;  %vm2698_vm12 = vweird.f32 %v3927_v32 }
 0x6e7   :  { %v5462_v45 = vpop.xlane.xlu0 %2416  ;;  %v2042_v6 = vpop.f32.mrf.mxu3  ;;  %v2690_v50 = vsel %vm2687_vm11, %v2689_v30, %v2685_v18  ;;  %v5471_v33 = vsel %vm2049_vm0, %v3929_v59, 0.0  ;;  %v2225_v56 = vsub.f32 %v5178_v22, %v2161_v57  ;;  %vm2699_vm14 = vmor %vm2697_vm13, %vm2698_vm12  ;;  %v2704_v22 = vor.u32 1.1754944e-38, %v2703_v46 }
 0x6e8   :  { %3932 = vrcp.f32 %v5462_v45  ;;  %v2043_v52 = vadd.f32 %v2042_v6, %v1914_v31  ;;  %v2691_v5 = vmul.f32 %v2690_v50, %v5150_v41  ;;  %v2694_v43 = vsub.f32 1.0, %v2693_v44  ;;  %v3931_v41 = vpop.eup %3930 }
 0x6e9   :  { %3934 = vpow2.f32 %v2302_v27  ;;  %v2304_v15 = vmul.f32 1.442695, %v2225_v56  ;;  %v5487_v27 = vsel %vm2049_vm0, %v3931_v41, 0.0  ;;  %v2716_v35 = vand.u32 2147483647, %v5462_v45 }
 0x6ea   :  { %3215 = vst [vmem:[#allocation10 + $0x68] sm:$0xff] %v2691_v5  ;;  %v5478_v62 = vsel %vm2049_vm0, %v2043_v52, -inf  ;;  %v2695_v60 = vmul.f32 %v3927_v32, %v2694_v43  ;;  %vm2712_vm2 = vweird.f32 %v5462_v45 }
 0x6eb   :  { %2440 = vadd.xlane.f32.xlu0 %v5471_v33  ;;  %2190 = vmax.xlane.f32.xlu1 %v5478_v62  ;;  %vm2717_vm4 = vcmp.eq.f32.partialorder %v2716_v35, 8.507059e+37 }
 0x6ec   :  { %v2696_v42 = vadd.f32 %v3927_v32, %v2695_v60 }
 0x6ee   :  { %v3933_v3 = vpop.eup %3932  ;;  %v2700_v8 = vsel %vm2699_vm14, %v3927_v32, %v2696_v42  ;;  %v2163_v58 = vpop.xlane.xlu2 %2162  ;;  %v2718_v32 = vand.u32 2147483648, %v5462_v45 }
 0x6ef   :  { %v2708_v38 = vmul.f32 %v3933_v3, %v5462_v45  ;;  %v2419_v31 = vpop.xlane.xlu1 %2418  ;;  %v2044_v47 = vpop.f32.mrf.mxu3  ;;  %v2705_v51 = vsel %vm2702_vm15, %v2704_v22, %v2700_v8  ;;  %v2226_v44 = vsub.f32 %v5195_v28, %v2163_v58  ;;  %vm2713_vm1 = vweird.f32 %v3933_v3 }
 0x6f0   :  { %3936 = vrcp.f32 %v2419_v31  ;;  %v3935_v30 = vpop.eup %3934  ;;  %v2045_v59 = vadd.f32 %v2044_v47, %v1916_v14  ;;  %v2706_v18 = vmul.f32 %v2705_v51, %v5167_v49  ;;  %vm2714_vm3 = vmor %vm2712_vm2, %vm2713_vm1  ;;  %v2719_v52 = vor.u32 1.1754944e-38, %v2718_v32 }
 0x6f1   :  { %3938 = vpow2.f32 %v2300_v53  ;;  %v2709_v9 = vsub.f32 1.0, %v2708_v38  ;;  %v5500_v49 = vsel %vm2049_vm0, %v3935_v30, 0.0  ;;  %v2306_v19 = vmul.f32 1.442695, %v2226_v44 }
 0x6f2   :  { %3940 = vpow2.f32 %v2304_v15  ;;  %v5493_v57 = vsel %vm2049_vm0, %v2045_v59, -inf  ;;  %3216 = vst [vmem:[#allocation10 + $0x70] sm:$0xff] %v2706_v18  ;;  %v2731_v22 = vand.u32 2147483647, %v2419_v31  ;;  %v2733_v15 = vand.u32 2147483648, %v2419_v31 }
 0x6f3   :  { %v2710_v6 = vmul.f32 %v3933_v3, %v2709_v9  ;;  %2192 = vmax.xlane.f32.xlu2 %v5493_v57  ;;  %2442 = vadd.xlane.f32.xlu1 %v5487_v27  ;;  %vm2727_vm6 = vweird.f32 %v2419_v31 }
 0x6f4   :  { %2446 = vadd.xlane.f32.xlu0 %v5500_v49  ;;  %v2734_v38 = vor.u32 1.1754944e-38, %v2733_v15  ;;  %vm2732_vm8 = vcmp.eq.f32.partialorder %v2731_v22, 8.507059e+37 }
 0x6f5   :  { %v2711_v50 = vadd.f32 %v3933_v3, %v2710_v6 }
 0x6f6   :  { %v3937_v28 = vpop.eup %3936  ;;  %v2421_v0 = vpop.xlane.xlu2 %2420 }
 0x6f7   :  { %v3939_v5 = vpop.eup %3938  ;;  %v2715_v43 = vsel %vm2714_vm3, %v3933_v3, %v2711_v50  ;;  %v2723_v46 = vmul.f32 %v3937_v28, %v2419_v31  ;;  %v2165_v56 = vpop.xlane.xlu0 %2164  ;;  %3942 = vrcp.f32 %v2421_v0  ;;  %vm2728_vm5 = vweird.f32 %v3937_v28 }
 0x6f8   :  { %v3941_v60 = vpop.eup %3940  ;;  %v2720_v41 = vsel %vm2717_vm4, %v2719_v52, %v2715_v43  ;;  %v2227_v45 = vsub.f32 %v5221_v20, %v2165_v56  ;;  %v5508_v42 = vsel %vm2049_vm0, %v3939_v5, 0.0  ;;  %3944 = vpow2.f32 %v2306_v19  ;;  %vm2729_vm7 = vmor %vm2727_vm6, %vm2728_vm5 }
 0x6f9   :  { %v2721_v1 = vmul.f32 %v2720_v41, %v5182_v34  ;;  %v2724_v53 = vsub.f32 1.0, %v2723_v46  ;;  %v5512_v3 = vsel %vm2049_vm0, %v3941_v60, 0.0  ;;  %v2748_v6 = vand.u32 2147483648, %v2421_v0 }
 0x6fa   :  { %v2308_v8 = vmul.f32 1.442695, %v2227_v45  ;;  %v2746_v52 = vand.u32 2147483647, %v2421_v0  ;;  %vm2742_vm10 = vweird.f32 %v2421_v0 }
 0x6fb   :  { %3217 = vst [vmem:[#allocation10 + $0x78] sm:$0xff] %v2721_v1  ;;  %v2725_v14 = vmul.f32 %v3937_v28, %v2724_v53  ;;  %2444 = vadd.xlane.f32.xlu2 %v5508_v42  ;;  %2448 = vadd.xlane.f32.xlu1 %v5512_v3  ;;  %v2749_v5 = vor.u32 1.1754944e-38, %v2748_v6 }
 0x6fc   :  { %3946 = vpow2.f32 %v2308_v8  ;;  %vm2747_vm12 = vcmp.eq.f32.partialorder %v2746_v52, 8.507059e+37 }
 0x6fd   :  { %v2726_v34 = vadd.f32 %v3937_v28, %v2725_v14  ;;  %v3943_v20 = vpop.eup %3942 }
 0x6fe   :  { %v2738_v58 = vmul.f32 %v3943_v20, %v2421_v0  ;;  %v2167_v51 = vpop.xlane.xlu1 %2166  ;;  %v3945_v59 = vpop.eup %3944  ;;  %vm2743_vm9 = vweird.f32 %v3943_v20 }
 0x6ff   :  { %v2730_v47 = vsel %vm2729_vm7, %v3937_v28, %v2726_v34  ;;  %v2423_v30 = vpop.xlane.xlu0 %2422  ;;  %v2228_v9 = vsub.f32 %v5242_v17, %v2167_v51  ;;  %v5520_v28 = vsel %vm2049_vm0, %v3945_v59, 0.0  ;;  %vm2744_vm11 = vmor %vm2742_vm10, %vm2743_vm9 }
 0x700   :  { %v2735_v18 = vsel %vm2732_vm8, %v2734_v38, %v2730_v47  ;;  %3948 = vrcp.f32 %v2423_v30  ;;  %v2739_v32 = vsub.f32 1.0, %v2738_v58  ;;  %v2763_v0 = vand.u32 2147483648, %v2423_v30 }
 0x701   :  { %v2736_v44 = vmul.f32 %v2735_v18, %v5199_v12  ;;  %v2310_v35 = vmul.f32 1.442695, %v2228_v9  ;;  %v2761_v8 = vand.u32 2147483647, %v2423_v30  ;;  %vm2757_vm14 = vweird.f32 %v2423_v30 }
 0x702   :  { %v3947_v31 = vpop.eup %3946  ;;  %v2740_v50 = vmul.f32 %v3943_v20, %v2739_v32 }
 0x703   :  { %3218 = vst [vmem:[#allocation10 + $0x80] sm:$0xff] %v2736_v44  ;;  %3950 = vpow2.f32 %v2310_v35  ;;  %2450 = vadd.xlane.f32.xlu2 %v5520_v28  ;;  %v5525_v17 = vsel %vm2049_vm0, %v3947_v31, 0.0  ;;  %vm2762_vm1 = vcmp.eq.f32.partialorder %v2761_v8, 8.507059e+37 }
 0x704   :  { %v2741_v19 = vadd.f32 %v3943_v20, %v2740_v50  ;;  %2452 = vadd.xlane.f32.xlu0 %v5525_v17 }
 0x706   :  { %v3949_v12 = vpop.eup %3948  ;;  %v2745_v43 = vsel %vm2744_vm11, %v3943_v20, %v2741_v19  ;;  %v2169_v46 = vpop.xlane.xlu2 %2168 }
 0x707   :  { %v2425_v56 = vpop.xlane.xlu1 %2424  ;;  %v2753_v60 = vmul.f32 %v3949_v12, %v2423_v30  ;;  %v2750_v41 = vsel %vm2747_vm12, %v2749_v5, %v2745_v43  ;;  %v2229_v1 = vsub.f32 %v5271_v13, %v2169_v46  ;;  %vm2758_vm13 = vweird.f32 %v3949_v12 }
 0x708   :  { %3952 = vrcp.f32 %v2425_v56  ;;  %v2751_v53 = vmul.f32 %v2750_v41, %v5217_v24  ;;  %vm2759_vm15 = vmor %vm2757_vm14, %vm2758_vm13  ;;  %v2764_v24 = vor.u32 1.1754944e-38, %v2763_v0  ;;  %v2778_v6 = vand.u32 2147483648, %v2425_v56 }
 0x709   :  { %v2754_v45 = vsub.f32 1.0, %v2753_v60  ;;  %v3951_v22 = vpop.eup %3950  ;;  %v2312_v15 = vmul.f32 1.442695, %v2229_v1  ;;  %v2776_v30 = vand.u32 2147483647, %v2425_v56  ;;  %vm2772_vm3 = vweird.f32 %v2425_v56 }
 0x70a   :  { %3219 = vst [vmem:[#allocation10 + $0x88] sm:$0xff] %v2751_v53  ;;  %v5532_v34 = vsel %vm2049_vm0, %v3951_v22, 0.0  ;;  %v2779_v19 = vor.u32 1.1754944e-38, %v2778_v6 }
 0x70b   :  { %v2755_v14 = vmul.f32 %v3949_v12, %v2754_v45  ;;  %3954 = vpow2.f32 %v2312_v15  ;;  %2454 = vadd.xlane.f32.xlu1 %v5532_v34  ;;  %vm2777_vm5 = vcmp.eq.f32.partialorder %v2776_v30, 8.507059e+37 }
 0x70d   :  { %v2756_v20 = vadd.f32 %v3949_v12, %v2755_v14 }
 0x70e   :  { %v3953_v13 = vpop.eup %3952  ;;  %v2171_v47 = vpop.xlane.xlu0 %2170 }
 0x70f   :  { %v2768_v38 = vmul.f32 %v3953_v13, %v2425_v56  ;;  %v2760_v58 = vsel %vm2759_vm15, %v3949_v12, %v2756_v20  ;;  %v2427_v51 = vpop.xlane.xlu2 %2426  ;;  %v2230_v18 = vsub.f32 %v5295_v25, %v2171_v47  ;;  %vm2773_vm2 = vweird.f32 %v3953_v13 }
 0x710   :  { %v2765_v59 = vsel %vm2762_vm1, %v2764_v24, %v2760_v58  ;;  %3956 = vrcp.f32 %v2427_v51  ;;  %vm2774_vm4 = vmor %vm2772_vm3, %vm2773_vm2  ;;  %v2793_v45 = vand.u32 2147483648, %v2427_v51  ;;  %v2791_v15 = vand.u32 2147483647, %v2427_v51 }
 0x711   :  { %v2769_v9 = vsub.f32 1.0, %v2768_v38  ;;  %v2766_v32 = vmul.f32 %v2765_v59, %v5246_v4  ;;  %v3955_v44 = vpop.eup %3954  ;;  %v2314_v35 = vmul.f32 1.442695, %v2230_v18  ;;  %vm2787_vm7 = vweird.f32 %v2427_v51 }
 0x712   :  { %v5539_v50 = vsel %vm2049_vm0, %v3955_v44, 0.0  ;;  %vm2792_vm9 = vcmp.eq.f32.partialorder %v2791_v15, 8.507059e+37 }
 0x713   :  { %v2770_v31 = vmul.f32 %v3953_v13, %v2769_v9  ;;  %3220 = vst [vmem:[#allocation10 + $0x90] sm:$0xff] %v2766_v32  ;;  %3958 = vpow2.f32 %v2314_v35  ;;  %2456 = vadd.xlane.f32.xlu2 %v5539_v50 }
 0x715   :  { %v2771_v52 = vadd.f32 %v3953_v13, %v2770_v31 }
 0x716   :  { %v3957_v25 = vpop.eup %3956  ;;  %v2173_v5 = vpop.xlane.xlu1 %2172 }
 0x717   :  { %v2775_v4 = vsel %vm2774_vm4, %v3953_v13, %v2771_v52  ;;  %v2783_v12 = vmul.f32 %v3957_v25, %v2427_v51  ;;  %v2231_v46 = vsub.f32 %v5321_v16, %v2173_v5  ;;  %v2429_v1 = vpop.xlane.xlu0 %2428  ;;  %vm2788_vm6 = vweird.f32 %v3957_v25 }
 0x718   :  { %v2780_v43 = vsel %vm2777_vm5, %v2779_v19, %v2775_v4  ;;  %3960 = vrcp.f32 %v2429_v1  ;;  %vm2789_vm8 = vmor %vm2787_vm7, %vm2788_vm6  ;;  %v2808_v32 = vand.u32 2147483648, %v2429_v1  ;;  %v2806_v6 = vand.u32 2147483647, %v2429_v1 }
 0x719   :  { %v2781_v60 = vmul.f32 %v2780_v43, %v5275_v29  ;;  %v2784_v41 = vsub.f32 1.0, %v2783_v12  ;;  %v3959_v53 = vpop.eup %3958  ;;  %v2316_v22 = vmul.f32 1.442695, %v2231_v46  ;;  %v2794_v29 = vor.u32 1.1754944e-38, %v2793_v45 }
 0x71a   :  { %v5546_v0 = vsel %vm2049_vm0, %v3959_v53, 0.0  ;;  %vm2802_vm11 = vweird.f32 %v2429_v1  ;;  %v2809_v52 = vor.u32 1.1754944e-38, %v2808_v32  ;;  %vm2807_vm13 = vcmp.eq.f32.partialorder %v2806_v6, 8.507059e+37 }
 0x71b   :  { %3221 = vst [vmem:[#allocation10 + $0x98] sm:$0xff] %v2781_v60  ;;  %v2785_v56 = vmul.f32 %v3957_v25, %v2784_v41  ;;  %3962 = vpow2.f32 %v2316_v22  ;;  %2458 = vadd.xlane.f32.xlu0 %v5546_v0 }
 0x71d   :  { %v2786_v16 = vadd.f32 %v3957_v25, %v2785_v56 }
 0x71e   :  { %v2175_v8 = vpop.xlane.xlu2 %2174  ;;  %v2431_v20 = vpop.xlane.xlu1 %2430 }
 0x71f   :  { %v2790_v14 = vsel %vm2789_vm8, %v3957_v25, %v2786_v16  ;;  %v3961_v13 = vpop.eup %3960  ;;  %v2232_v38 = vsub.f32 %v5344_v23, %v2175_v8  ;;  %3964 = vrcp.f32 %v2431_v20  ;;  %v2821_v43 = vand.u32 2147483647, %v2431_v20 }
 0x720   :  { %v2795_v24 = vsel %vm2792_vm9, %v2794_v29, %v2790_v14  ;;  %v2798_v47 = vmul.f32 %v3961_v13, %v2429_v1  ;;  %vm2803_vm10 = vweird.f32 %v3961_v13  ;;  %v2823_v46 = vand.u32 2147483648, %v2431_v20 }
 0x721   :  { %v2796_v58 = vmul.f32 %v2795_v24, %v5299_v63  ;;  %v3963_v59 = vpop.eup %3962  ;;  %v2318_v18 = vmul.f32 1.442695, %v2232_v38  ;;  %vm2804_vm12 = vmor %vm2802_vm11, %vm2803_vm10  ;;  %vm2817_vm15 = vweird.f32 %v2431_v20  ;;  %vm2822_vm2 = vcmp.eq.f32.partialorder %v2821_v43, 8.507059e+37 }
 0x722   :  { %v2799_v9 = vsub.f32 1.0, %v2798_v47  ;;  %v5553_v51 = vsel %vm2049_vm0, %v3963_v59, 0.0  ;;  %v2824_v22 = vor.u32 1.1754944e-38, %v2823_v46 }
 0x723   :  { %3222 = vst [vmem:[#allocation10 + $0xa0] sm:$0xff] %v2796_v58  ;;  %3966 = vpow2.f32 %v2318_v18  ;;  %2460 = vadd.xlane.f32.xlu1 %v5553_v51 }
 0x724   :  { %v2800_v44 = vmul.f32 %v3961_v13, %v2799_v9 }
 0x725   :  { %v3965_v23 = vpop.eup %3964 }
 0x726   :  { %v2801_v35 = vadd.f32 %v3961_v13, %v2800_v44  ;;  %v2433_v63 = vpop.xlane.xlu2 %2432  ;;  %v2813_v31 = vmul.f32 %v3965_v23, %v2431_v20  ;;  %v2177_v30 = vpop.xlane.xlu0 %2176  ;;  %vm2818_vm14 = vweird.f32 %v3965_v23 }
 0x727   :  { %3968 = vrcp.f32 %v2433_v63  ;;  %v2233_v4 = vsub.f32 %v5371_v40, %v2177_v30  ;;  %vm2819_vm1 = vmor %vm2817_vm15, %vm2818_vm14  ;;  %v2838_v24 = vand.u32 2147483648, %v2433_v63  ;;  %v2836_v47 = vand.u32 2147483647, %v2433_v63 }
 0x728   :  { %v2805_v25 = vsel %vm2804_vm12, %v3961_v13, %v2801_v35  ;;  %v2814_v19 = vsub.f32 1.0, %v2813_v31  ;;  %vm2832_vm4 = vweird.f32 %v2433_v63 }
 0x729   :  { %v3967_v12 = vpop.eup %3966  ;;  %v2810_v5 = vsel %vm2807_vm13, %v2809_v52, %v2805_v25  ;;  %v2320_v1 = vmul.f32 1.442695, %v2233_v4  ;;  %v2839_v9 = vor.u32 1.1754944e-38, %v2838_v24  ;;  %vm2837_vm6 = vcmp.eq.f32.partialorder %v2836_v47, 8.507059e+37 }
 0x72a   :  { %v2811_v60 = vmul.f32 %v2810_v5, %v5328_v7  ;;  %v2815_v41 = vmul.f32 %v3965_v23, %v2814_v19  ;;  %v5560_v53 = vsel %vm2049_vm0, %v3967_v12, 0.0 }
 0x72b   :  { %2462 = vadd.xlane.f32.xlu2 %v5560_v53  ;;  %3970 = vpow2.f32 %v2320_v1 }
 0x72c   :  { %3223 = vst [vmem:[#allocation10 + $0xa8] sm:$0xff] %v2811_v60  ;;  %v2816_v45 = vadd.f32 %v3965_v23, %v2815_v41 }
 0x72d   :  { %v3969_v40 = vpop.eup %3968 }
 0x72e   :  { %v2828_v56 = vmul.f32 %v3969_v40, %v2433_v63  ;;  %v2820_v15 = vsel %vm2819_vm1, %v3965_v23, %v2816_v45  ;;  %v2179_v16 = vpop.xlane.xlu1 %2178  ;;  %v2435_v7 = vpop.xlane.xlu0 %2434  ;;  %vm2833_vm3 = vweird.f32 %v3969_v40 }
 0x72f   :  { %v2825_v29 = vsel %vm2822_vm2, %v2824_v22, %v2820_v15  ;;  %v2234_v14 = vsub.f32 %v5388_v54, %v2179_v16  ;;  %3972 = vrcp.f32 %v2435_v7  ;;  %vm2834_vm5 = vmor %vm2832_vm4, %vm2833_vm3  ;;  %v2853_v25 = vand.u32 2147483648, %v2435_v7 }
 0x730   :  { %v2829_v8 = vsub.f32 1.0, %v2828_v56  ;;  %v2826_v13 = vmul.f32 %v2825_v29, %v5348_v21  ;;  %v2851_v4 = vand.u32 2147483647, %v2435_v7  ;;  %vm2847_vm8 = vweird.f32 %v2435_v7 }
 0x731   :  { %v2322_v38 = vmul.f32 1.442695, %v2234_v14  ;;  %v3971_v58 = vpop.eup %3970 }
 0x732   :  { %v2830_v20 = vmul.f32 %v3969_v40, %v2829_v8  ;;  %3224 = vst [vmem:[#allocation10 + $0xb0] sm:$0xff] %v2826_v13  ;;  %v5567_v59 = vsel %vm2049_vm0, %v3971_v58, 0.0  ;;  %vm2852_vm10 = vcmp.eq.f32.partialorder %v2851_v4, 8.507059e+37 }
 0x733   :  { %3974 = vpow2.f32 %v2322_v38  ;;  %2464 = vadd.xlane.f32.xlu0 %v5567_v59 }
 0x734   :  { %v2831_v18 = vadd.f32 %v3969_v40, %v2830_v20 }
 0x735   :  { %v3973_v54 = vpop.eup %3972 }
 0x736   :  { %v2835_v21 = vsel %vm2834_vm5, %v3969_v40, %v2831_v18  ;;  %v2843_v32 = vmul.f32 %v3973_v54, %v2435_v7  ;;  %v2181_v44 = vpop.xlane.xlu2 %2180  ;;  %v2437_v6 = vpop.xlane.xlu1 %2436  ;;  %vm2848_vm7 = vweird.f32 %v3973_v54 }
 0x737   :  { %v2840_v23 = vsel %vm2837_vm6, %v2839_v9, %v2835_v21  ;;  %v2235_v35 = vsub.f32 %v5405_v48, %v2181_v44  ;;  %3976 = vrcp.f32 %v2437_v6  ;;  %vm2849_vm9 = vmor %vm2847_vm8, %vm2848_vm7  ;;  %v2868_v15 = vand.u32 2147483648, %v2437_v6 }
 0x738   :  { %v2841_v31 = vmul.f32 %v2840_v23, %v5367_v10  ;;  %v2844_v30 = vsub.f32 1.0, %v2843_v32  ;;  %v2854_v10 = vor.u32 1.1754944e-38, %v2853_v25  ;;  %v2866_v29 = vand.u32 2147483647, %v2437_v6 }
 0x739   :  { %v3975_v52 = vpop.eup %3974  ;;  %v2324_v63 = vmul.f32 1.442695, %v2235_v35  ;;  %vm2862_vm12 = vweird.f32 %v2437_v6 }
 0x73a   :  { %3225 = vst [vmem:[#allocation10 + $0xb8] sm:$0xff] %v2841_v31  ;;  %v2845_v19 = vmul.f32 %v3973_v54, %v2844_v30  ;;  %v5574_v12 = vsel %vm2049_vm0, %v3975_v52, 0.0  ;;  %vm2867_vm14 = vcmp.eq.f32.partialorder %v2866_v29, 8.507059e+37 }
 0x73b   :  { %3978 = vpow2.f32 %v2324_v63  ;;  %2466 = vadd.xlane.f32.xlu1 %v5574_v12 }
 0x73c   :  { %v2846_v5 = vadd.f32 %v3973_v54, %v2845_v19 }
 0x73d   :  { %v3977_v48 = vpop.eup %3976 }
 0x73e   :  { %v2850_v43 = vsel %vm2849_vm9, %v3973_v54, %v2846_v5  ;;  %v2858_v46 = vmul.f32 %v3977_v48, %v2437_v6  ;;  %v2183_v60 = vpop.xlane.xlu0 %2182  ;;  %v2439_v41 = vpop.xlane.xlu2 %2438  ;;  %vm2863_vm11 = vweird.f32 %v3977_v48 }
 0x73f   :  { %v2855_v1 = vsel %vm2852_vm10, %v2854_v10, %v2850_v43  ;;  %v2236_v45 = vsub.f32 %v5420_v55, %v2183_v60  ;;  %3980 = vrcp.f32 %v2439_v41  ;;  %vm2864_vm13 = vmor %vm2862_vm12, %vm2863_vm11  ;;  %v2883_v9 = vand.u32 2147483648, %v2439_v41 }
 0x740   :  { %v2856_v40 = vmul.f32 %v2855_v1, %v5392_v39  ;;  %v2859_v22 = vsub.f32 1.0, %v2858_v46  ;;  %v2869_v39 = vor.u32 1.1754944e-38, %v2868_v15  ;;  %v2881_v44 = vand.u32 2147483647, %v2439_v41 }
 0x741   :  { %v3979_v56 = vpop.eup %3978  ;;  %v2326_v16 = vmul.f32 1.442695, %v2236_v45  ;;  %vm2877_vm1 = vweird.f32 %v2439_v41 }
 0x742   :  { %3226 = vst [vmem:[#allocation10 + $0xc0] sm:$0xff] %v2856_v40  ;;  %v2860_v7 = vmul.f32 %v3977_v48, %v2859_v22  ;;  %v5581_v14 = vsel %vm2049_vm0, %v3979_v56, 0.0  ;;  %vm2882_vm3 = vcmp.eq.f32.partialorder %v2881_v44, 8.507059e+37 }
 0x743   :  { %3982 = vpow2.f32 %v2326_v16  ;;  %2468 = vadd.xlane.f32.xlu2 %v5581_v14 }
 0x744   :  { %v2861_v8 = vadd.f32 %v3977_v48, %v2860_v7 }
 0x745   :  { %v3981_v55 = vpop.eup %3980 }
 0x746   :  { %v2865_v13 = vsel %vm2864_vm13, %v3977_v48, %v2861_v8  ;;  %v2873_v24 = vmul.f32 %v3981_v55, %v2439_v41  ;;  %v2185_v38 = vpop.xlane.xlu1 %2184  ;;  %vm2878_vm15 = vweird.f32 %v3981_v55 }
 0x747   :  { %v2870_v58 = vsel %vm2867_vm14, %v2869_v39, %v2865_v13  ;;  %v2237_v20 = vsub.f32 %v5434_v26, %v2185_v38  ;;  %vm2879_vm2 = vmor %vm2877_vm1, %vm2878_vm15  ;;  %v2884_v26 = vor.u32 1.1754944e-38, %v2883_v9 }
 0x748   :  { %v2871_v47 = vmul.f32 %v2870_v58, %v5409_v37  ;;  %v2874_v18 = vsub.f32 1.0, %v2873_v24 }
 0x749   :  { %v3983_v54 = vpop.eup %3982  ;;  %v2328_v21 = vmul.f32 1.442695, %v2237_v20 }
 0x74a   :  { %3227 = vst [vmem:[#allocation10 + $0xc8] sm:$0xff] %v2871_v47  ;;  %v2875_v32 = vmul.f32 %v3981_v55, %v2874_v18  ;;  %v5588_v6 = vsel %vm2049_vm0, %v3983_v54, 0.0 }
 0x74b   :  { %3984 = vpow2.f32 %v2328_v21  ;;  %2470 = vadd.xlane.f32.xlu0 %v5588_v6 }
 0x74c   :  { %v2876_v23 = vadd.f32 %v3981_v55, %v2875_v32 }
 0x74e   :  { %v2880_v37 = vsel %vm2879_vm2, %v3981_v55, %v2876_v23  ;;  %v2187_v35 = vpop.xlane.xlu2 %2186 }
 0x74f   :  { %v2885_v31 = vsel %vm2882_vm3, %v2884_v26, %v2880_v37  ;;  %v2238_v30 = vsub.f32 %v5445_v61, %v2187_v35 }
 0x750   :  { %v2886_v52 = vmul.f32 %v2885_v31, %v5424_v2 }
 0x751   :  { %v3985_v25 = vpop.eup %3984  ;;  %v2330_v63 = vmul.f32 1.442695, %v2238_v30 }
 0x752   :  { %3228 = vst [vmem:[#allocation10 + $0xd0] sm:$0xff] %v2886_v52  ;;  %v5595_v19 = vsel %vm2049_vm0, %v3985_v25, 0.0 }
 0x753   :  { %3986 = vpow2.f32 %v2330_v63  ;;  %2472 = vadd.xlane.f32.xlu1 %v5595_v19 }
 0x756   :  { %v2189_v4 = vpop.xlane.xlu0 %2188 }
 0x757   :  { %v2239_v5 = vsub.f32 %v5457_v36, %v2189_v4 }
 0x759   :  { %v3987_v48 = vpop.eup %3986  ;;  %v2332_v10 = vmul.f32 1.442695, %v2239_v5 }
 0x75a   :  { %v5601_v61 = vsel %vm2049_vm0, %v3987_v48, 0.0 }
 0x75b   :  { %3988 = vpow2.f32 %v2332_v10  ;;  %2474 = vadd.xlane.f32.xlu2 %v5601_v61 }
 0x75e   :  { %v2441_v2 = vpop.xlane.xlu0 %2440  ;;  %v2191_v43 = vpop.xlane.xlu1 %2190 }
 0x75f   :  { %3990 = vrcp.f32 %v2441_v2  ;;  %v2240_v46 = vsub.f32 %v5478_v62, %v2191_v43  ;;  %v2898_v62 = vand.u32 2147483648, %v2441_v2  ;;  %v2896_v55 = vand.u32 2147483647, %v2441_v2 }
 0x760   :  { %vm2892_vm5 = vweird.f32 %v2441_v2 }
 0x761   :  { %v3989_v60 = vpop.eup %3988  ;;  %v2334_v41 = vmul.f32 1.442695, %v2240_v46  ;;  %v2899_v24 = vor.u32 1.1754944e-38, %v2898_v62  ;;  %vm2897_vm7 = vcmp.eq.f32.partialorder %v2896_v55, 8.507059e+37 }
 0x762   :  { %v5607_v1 = vsel %vm2049_vm0, %v3989_v60, 0.0 }
 0x763   :  { %2476 = vadd.xlane.f32.xlu0 %v5607_v1  ;;  %3992 = vpow2.f32 %v2334_v41 }
 0x765   :  { %v3991_v36 = vpop.eup %3990 }
 0x766   :  { %v2888_v45 = vmul.f32 %v3991_v36, %v2441_v2  ;;  %v2193_v40 = vpop.xlane.xlu2 %2192  ;;  %v2443_v22 = vpop.xlane.xlu1 %2442  ;;  %vm2893_vm4 = vweird.f32 %v3991_v36 }
 0x767   :  { %v2241_v56 = vsub.f32 %v5493_v57, %v2193_v40  ;;  %3994 = vrcp.f32 %v2443_v22  ;;  %v5611_v15 = vpop.xlane.xlu0 %2446  ;;  %vm2894_vm6 = vmor %vm2892_vm5, %vm2893_vm4  ;;  %v2911_v44 = vand.u32 2147483647, %v2443_v22  ;;  %v2913_v23 = vand.u32 2147483648, %v2443_v22 }
 0x768   :  { %v2889_v16 = vsub.f32 1.0, %v2888_v45  ;;  %3996 = vrcp.f32 %v5611_v15  ;;  %v2941_v35 = vand.u32 2147483647, %v5611_v15  ;;  %vm2907_vm9 = vweird.f32 %v2443_v22 }
 0x769   :  { %v2336_v7 = vmul.f32 1.442695, %v2241_v56  ;;  %v3993_v29 = vpop.eup %3992  ;;  %v2943_v52 = vand.u32 2147483648, %v5611_v15  ;;  %vm2912_vm11 = vcmp.eq.f32.partialorder %v2911_v44, 8.507059e+37  ;;  %v2914_v63 = vor.u32 1.1754944e-38, %v2913_v23 }
 0x76a   :  { %v2890_v8 = vmul.f32 %v3991_v36, %v2889_v16  ;;  %v5616_v39 = vsel %vm2049_vm0, %v3993_v29, 0.0  ;;  %vm2937_vm12 = vweird.f32 %v5611_v15  ;;  %vm5639_vm13 = vcmp.eq.f32.partialorder %v2941_v35, 8.507059e+37 }
 0x76b   :  { %3998 = vpow2.f32 %v2336_v7  ;;  %2478 = vadd.xlane.f32.xlu1 %v5616_v39  ;;  %v2944_v40 = vor.u32 1.1754944e-38, %v2943_v52 }
 0x76c   :  { %v2891_v13 = vadd.f32 %v3991_v36, %v2890_v8 }
 0x76d   :  { %v3995_v57 = vpop.eup %3994 }
 0x76e   :  { %v2895_v38 = vsel %vm2894_vm6, %v3991_v36, %v2891_v13  ;;  %v5619_v58 = vpop.xlane.xlu2 %2444  ;;  %v2903_v20 = vmul.f32 %v3995_v57, %v2443_v22  ;;  %v5621_v47 = vpop.xlane.xlu1 %2448  ;;  %vm2908_vm8 = vweird.f32 %v3995_v57 }
 0x76f   :  { %v3997_v18 = vpop.eup %3996  ;;  %v2900_v54 = vsel %vm2897_vm7, %v2899_v24, %v2895_v38  ;;  %4000 = vrcp.f32 %v5619_v58  ;;  %vm2909_vm10 = vmor %vm2907_vm9, %vm2908_vm8  ;;  %v2926_v22 = vand.u32 2147483647, %v5619_v58  ;;  %v2928_v56 = vand.u32 2147483648, %v5619_v58 }
 0x770   :  { %v2901_v9 = vmul.f32 %v2900_v54, %v5471_v33  ;;  %v2904_v21 = vsub.f32 1.0, %v2903_v20  ;;  %4002 = vrcp.f32 %v5621_v47  ;;  %v2933_v37 = vmul.f32 %v3997_v18, %v5611_v15 }
 0x771   :  { %v3999_v32 = vpop.eup %3998  ;;  %v2958_v7 = vand.u32 2147483648, %v5621_v47  ;;  %vm2922_vm2 = vweird.f32 %v5619_v58  ;;  %v2929_v24 = vor.u32 1.1754944e-38, %v2928_v56  ;;  %vm2952_vm4 = vweird.f32 %v5621_v47 }
 0x772   :  { %3229 = vst [vmem:[#allocation10 + $0xd8] sm:$0xff] %v2901_v9  ;;  %v2905_v26 = vmul.f32 %v3995_v57, %v2904_v21  ;;  %v5630_v31 = vsel %vm2049_vm0, %v3999_v32, 0.0  ;;  %v2934_v33 = vsub.f32 1.0, %v2933_v37  ;;  %vm2938_vm0 = vweird.f32 %v3997_v18 }
 0x773   :  { %2480 = vadd.xlane.f32.xlu2 %v5630_v31  ;;  %vm2939_vm14 = vmor %vm2937_vm12, %vm2938_vm0  ;;  %vm2927_vm5 = vcmp.eq.f32.partialorder %v2926_v22, 8.507059e+37 }
 0x774   :  { %v2906_v30 = vadd.f32 %v3995_v57, %v2905_v26  ;;  %v2935_v11 = vmul.f32 %v3997_v18, %v2934_v33 }
 0x775   :  { %v4001_v25 = vpop.eup %4000 }
 0x776   :  { %v4003_v4 = vpop.eup %4002  ;;  %v2918_v5 = vmul.f32 %v4001_v25, %v5619_v58  ;;  %v2910_v48 = vsel %vm2909_vm10, %v3995_v57, %v2906_v30  ;;  %v5636_v10 = vpop.xlane.xlu2 %2450  ;;  %v2936_v45 = vadd.f32 %v3997_v18, %v2935_v11  ;;  %vm2923_vm15 = vweird.f32 %v4001_v25 }
 0x777   :  { %v2915_v2 = vsel %vm2912_vm11, %v2914_v63, %v2910_v48  ;;  %v2948_v43 = vmul.f32 %v4003_v4, %v5621_v47  ;;  %4004 = vrcp.f32 %v5636_v10  ;;  %v5644_v60 = vpop.xlane.xlu0 %2452  ;;  %vm2953_vm1 = vweird.f32 %v4003_v4  ;;  %vm2924_vm3 = vmor %vm2922_vm2, %vm2923_vm15 }
 0x778   :  { %v2919_v41 = vsub.f32 1.0, %v2918_v5  ;;  %v2916_v36 = vmul.f32 %v2915_v2, %v5487_v27  ;;  %4006 = vrcp.f32 %v5644_v60  ;;  %v2940_v29 = vsel %vm2939_vm14, %v3997_v18, %v2936_v45  ;;  %vm2954_vm6 = vmor %vm2952_vm4, %vm2953_vm1 }
 0x779   :  { %v2949_v16 = vsub.f32 1.0, %v2948_v43  ;;  %v2956_v27 = vand.u32 2147483647, %v5621_v47  ;;  %v2945_v55 = vsel %vm5639_vm13, %v2944_v40, %v2940_v29  ;;  %v2959_v18 = vor.u32 1.1754944e-38, %v2958_v7 }
 0x77a   :  { %v2920_v62 = vmul.f32 %v4001_v25, %v2919_v41  ;;  %3230 = vst [vmem:[#allocation10 + $0xe0] sm:$0xff] %v2916_v36  ;;  %v2946_v15 = vmul.f32 %v2945_v55, %v5500_v49  ;;  %v2973_v37 = vand.u32 2147483648, %v5636_v10  ;;  %v2971_v30 = vand.u32 2147483647, %v5636_v10 }
 0x77b   :  { %v2950_v8 = vmul.f32 %v4003_v4, %v2949_v16  ;;  %vm2957_vm7 = vcmp.eq.f32.partialorder %v2956_v27, 8.507059e+37  ;;  %vm2967_vm9 = vweird.f32 %v5636_v10  ;;  %v2988_v52 = vand.u32 2147483648, %v5644_v60 }
 0x77c   :  { %v2921_v13 = vadd.f32 %v4001_v25, %v2920_v62  ;;  %3232 = vst [vmem:[#allocation10 + $0xf0] sm:$0xff] %v2946_v15  ;;  %v2986_v63 = vand.u32 2147483647, %v5644_v60  ;;  %vm2982_vm12 = vweird.f32 %v5644_v60  ;;  %vm2972_vm0 = vcmp.eq.f32.partialorder %v2971_v30, 8.507059e+37 }
 0x77d   :  { %v4005_v57 = vpop.eup %4004  ;;  %v2951_v38 = vadd.f32 %v4003_v4, %v2950_v8 }
 0x77e   :  { %v2925_v20 = vsel %vm2924_vm3, %v4001_v25, %v2921_v13  ;;  %v2963_v54 = vmul.f32 %v4005_v57, %v5636_v10  ;;  %v2455_v9 = vpop.xlane.xlu1 %2454  ;;  %v4007_v21 = vpop.eup %4006  ;;  %vm2968_vm8 = vweird.f32 %v4005_v57  ;;  %v2989_v10 = vor.u32 1.1754944e-38, %v2988_v52 }
 0x77f   :  { %v2930_v32 = vsel %vm2927_vm5, %v2929_v24, %v2925_v20  ;;  %v2955_v44 = vsel %vm2954_vm6, %v4003_v4, %v2951_v38  ;;  %4008 = vrcp.f32 %v2455_v9  ;;  %v2978_v26 = vmul.f32 %v4007_v21, %v5644_v60  ;;  %vm2969_vm11 = vmor %vm2967_vm9, %vm2968_vm8 }
 0x780   :  { %v2931_v49 = vmul.f32 %v2930_v32, %v5508_v42  ;;  %v2960_v58 = vsel %vm2957_vm7, %v2959_v18, %v2955_v44  ;;  %v2964_v23 = vsub.f32 1.0, %v2963_v54  ;;  %vm2983_vm10 = vweird.f32 %v4007_v21 }
 0x781   :  { %v2961_v47 = vmul.f32 %v2960_v58, %v5512_v3  ;;  %v2979_v33 = vsub.f32 1.0, %v2978_v26  ;;  %v2974_v3 = vor.u32 1.1754944e-38, %v2973_v37  ;;  %vm2984_vm13 = vmor %vm2982_vm12, %vm2983_vm10  ;;  %vm2987_vm14 = vcmp.eq.f32.partialorder %v2986_v63, 8.507059e+37 }
 0x782   :  { %3231 = vst [vmem:[#allocation10 + $0xe8] sm:$0xff] %v2931_v49  ;;  %v2965_v35 = vmul.f32 %v4005_v57, %v2964_v23  ;;  %v3003_v40 = vand.u32 2147483648, %v2455_v9  ;;  %v3001_v56 = vand.u32 2147483647, %v2455_v9  ;;  %vm2997_vm1 = vweird.f32 %v2455_v9 }
 0x783   :  { %3233 = vst [vmem:[#allocation10 + $0xf8] sm:$0xff] %v2961_v47  ;;  %v2980_v25 = vmul.f32 %v4007_v21, %v2979_v33 }
 0x784   :  { %v2966_v42 = vadd.f32 %v4005_v57, %v2965_v35  ;;  %v3004_v7 = vor.u32 1.1754944e-38, %v3003_v40  ;;  %vm3002_vm3 = vcmp.eq.f32.partialorder %v3001_v56, 8.507059e+37 }
 0x785   :  { %v4009_v4 = vpop.eup %4008  ;;  %v2981_v48 = vadd.f32 %v4007_v21, %v2980_v25 }
 0x786   :  { %v2970_v5 = vsel %vm2969_vm11, %v4005_v57, %v2966_v42  ;;  %v2457_v11 = vpop.xlane.xlu2 %2456  ;;  %v2993_v2 = vmul.f32 %v4009_v4, %v2455_v9  ;;  %vm2998_vm15 = vweird.f32 %v4009_v4 }
 0x787   :  { %v2975_v43 = vsel %vm2972_vm0, %v2974_v3, %v2970_v5  ;;  %4010 = vrcp.f32 %v2457_v11  ;;  %v2985_v41 = vsel %vm2984_vm13, %v4007_v21, %v2981_v48  ;;  %vm2999_vm2 = vmor %vm2997_vm1, %vm2998_vm15  ;;  %v3018_v15 = vand.u32 2147483648, %v2457_v11 }
 0x788   :  { %v2976_v46 = vmul.f32 %v2975_v43, %v5520_v28  ;;  %v2994_v36 = vsub.f32 1.0, %v2993_v2  ;;  %v2990_v45 = vsel %vm2987_vm14, %v2989_v10, %v2985_v41  ;;  %v3016_v57 = vand.u32 2147483647, %v2457_v11 }
 0x789   :  { %v2991_v22 = vmul.f32 %v2990_v45, %v5525_v17  ;;  %vm3012_vm5 = vweird.f32 %v2457_v11  ;;  %v3019_v20 = vor.u32 1.1754944e-38, %v3018_v15 }
 0x78a   :  { %3234 = vst [vmem:[#allocation10 + $0x100] sm:$0xff] %v2976_v46  ;;  %v2995_v60 = vmul.f32 %v4009_v4, %v2994_v36  ;;  %vm3017_vm7 = vcmp.eq.f32.partialorder %v3016_v57, 8.507059e+37 }
 0x78b   :  { %3235 = vst [vmem:[#allocation10 + $0x108] sm:$0xff] %v2991_v22 }
 0x78c   :  { %v2996_v16 = vadd.f32 %v4009_v4, %v2995_v60 }
 0x78d   :  { %v4011_v62 = vpop.eup %4010 }
 0x78e   :  { %v3008_v29 = vmul.f32 %v4011_v62, %v2457_v11  ;;  %v3000_v8 = vsel %vm2999_vm2, %v4009_v4, %v2996_v16  ;;  %v2459_v28 = vpop.xlane.xlu0 %2458  ;;  %vm3013_vm4 = vweird.f32 %v4011_v62 }
 0x78f   :  { %v3005_v27 = vsel %vm3002_vm3, %v3004_v7, %v3000_v8  ;;  %4012 = vrcp.f32 %v2459_v28  ;;  %vm3014_vm6 = vmor %vm3012_vm5, %vm3013_vm4  ;;  %v3031_v58 = vand.u32 2147483647, %v2459_v28  ;;  %vm3027_vm9 = vweird.f32 %v2459_v28 }
 0x790   :  { %v3009_v55 = vsub.f32 1.0, %v3008_v29  ;;  %v3006_v13 = vmul.f32 %v3005_v27, %v5532_v34  ;;  %v3033_v34 = vand.u32 2147483648, %v2459_v28 }
 0x791   :  { %vm3032_vm11 = vcmp.eq.f32.partialorder %v3031_v58, 8.507059e+37 }
 0x792   :  { %v3010_v17 = vmul.f32 %v4011_v62, %v3009_v55  ;;  %3236 = vst [vmem:[#allocation10 + $0x110] sm:$0xff] %v3006_v13  ;;  %v3034_v47 = vor.u32 1.1754944e-38, %v3033_v34 }
 0x794   :  { %v3011_v24 = vadd.f32 %v4011_v62, %v3010_v17 }
 0x795   :  { %v4013_v38 = vpop.eup %4012 }
 0x796   :  { %v3015_v18 = vsel %vm3014_vm6, %v4011_v62, %v3011_v24  ;;  %v2461_v54 = vpop.xlane.xlu1 %2460  ;;  %v3023_v9 = vmul.f32 %v4013_v38, %v2459_v28  ;;  %vm3028_vm8 = vweird.f32 %v4013_v38 }
 0x797   :  { %v3020_v21 = vsel %vm3017_vm7, %v3019_v20, %v3015_v18  ;;  %4014 = vrcp.f32 %v2461_v54  ;;  %vm3029_vm10 = vmor %vm3027_vm9, %vm3028_vm8  ;;  %v3048_v42 = vand.u32 2147483648, %v2461_v54  ;;  %v3046_v63 = vand.u32 2147483647, %v2461_v54 }
 0x798   :  { %v3021_v32 = vmul.f32 %v3020_v21, %v5539_v50  ;;  %v3024_v44 = vsub.f32 1.0, %v3023_v9  ;;  %vm3042_vm0 = vweird.f32 %v2461_v54 }
 0x799   :  { %v3049_v5 = vor.u32 1.1754944e-38, %v3048_v42  ;;  %vm3047_vm14 = vcmp.eq.f32.partialorder %v3046_v63, 8.507059e+37 }
 0x79a   :  { %3237 = vst [vmem:[#allocation10 + $0x118] sm:$0xff] %v3021_v32  ;;  %v3025_v49 = vmul.f32 %v4013_v38, %v3024_v44 }
 0x79c   :  { %v3026_v23 = vadd.f32 %v4013_v38, %v3025_v49 }
 0x79d   :  { %v4015_v26 = vpop.eup %4014 }
 0x79e   :  { %v3038_v37 = vmul.f32 %v4015_v26, %v2461_v54  ;;  %v3030_v35 = vsel %vm3029_vm10, %v4013_v38, %v3026_v23  ;;  %v2463_v30 = vpop.xlane.xlu2 %2462  ;;  %vm3043_vm12 = vweird.f32 %v4015_v26 }
 0x79f   :  { %v3035_v33 = vsel %vm3032_vm11, %v3034_v47, %v3030_v35  ;;  %4016 = vrcp.f32 %v2463_v30  ;;  %vm3044_vm13 = vmor %vm3042_vm0, %vm3043_vm12  ;;  %v3061_v36 = vand.u32 2147483647, %v2463_v30  ;;  %vm3057_vm1 = vweird.f32 %v2463_v30 }
 0x7a0   :  { %v3039_v52 = vsub.f32 1.0, %v3038_v37  ;;  %v3036_v50 = vmul.f32 %v3035_v33, %v5546_v0  ;;  %v3063_v0 = vand.u32 2147483648, %v2463_v30 }
 0x7a1   :  { %vm3062_vm3 = vcmp.eq.f32.partialorder %v3061_v36, 8.507059e+37 }
 0x7a2   :  { %v3040_v25 = vmul.f32 %v4015_v26, %v3039_v52  ;;  %3238 = vst [vmem:[#allocation10 + $0x120] sm:$0xff] %v3036_v50  ;;  %v3064_v40 = vor.u32 1.1754944e-38, %v3063_v0 }
 0x7a4   :  { %v3041_v4 = vadd.f32 %v4015_v26, %v3040_v25 }
 0x7a5   :  { %v4017_v3 = vpop.eup %4016 }
 0x7a6   :  { %v3045_v48 = vsel %vm3044_vm13, %v4015_v26, %v3041_v4  ;;  %v3053_v11 = vmul.f32 %v4017_v3, %v2463_v30  ;;  %v2465_v43 = vpop.xlane.xlu0 %2464  ;;  %vm3058_vm15 = vweird.f32 %v4017_v3 }
 0x7a7   :  { %v3050_v2 = vsel %vm3047_vm14, %v3049_v5, %v3045_v48  ;;  %4018 = vrcp.f32 %v2465_v43  ;;  %vm3059_vm2 = vmor %vm3057_vm1, %vm3058_vm15  ;;  %v3078_v29 = vand.u32 2147483648, %v2465_v43  ;;  %v3076_v28 = vand.u32 2147483647, %v2465_v43 }
 0x7a8   :  { %v3051_v10 = vmul.f32 %v3050_v2, %v5553_v51  ;;  %v3054_v46 = vsub.f32 1.0, %v3053_v11  ;;  %vm3072_vm5 = vweird.f32 %v2465_v43 }
 0x7a9   :  { %v3079_v13 = vor.u32 1.1754944e-38, %v3078_v29  ;;  %vm3077_vm7 = vcmp.eq.f32.partialorder %v3076_v28, 8.507059e+37 }
 0x7aa   :  { %3239 = vst [vmem:[#allocation10 + $0x128] sm:$0xff] %v3051_v10  ;;  %v3055_v41 = vmul.f32 %v4017_v3, %v3054_v46 }
 0x7ac   :  { %v3056_v45 = vadd.f32 %v4017_v3, %v3055_v41 }
 0x7ad   :  { %v4019_v22 = vpop.eup %4018 }
 0x7ae   :  { %v3060_v60 = vsel %vm3059_vm2, %v4017_v3, %v3056_v45  ;;  %v2467_v56 = vpop.xlane.xlu1 %2466  ;;  %v3068_v62 = vmul.f32 %v4019_v22, %v2465_v43  ;;  %vm3073_vm4 = vweird.f32 %v4019_v22 }
 0x7af   :  { %v3065_v16 = vsel %vm3062_vm3, %v3064_v40, %v3060_v60  ;;  %4020 = vrcp.f32 %v2467_v56  ;;  %vm3074_vm6 = vmor %vm3072_vm5, %vm3073_vm4  ;;  %v3093_v20 = vand.u32 2147483648, %v2467_v56  ;;  %v3091_v54 = vand.u32 2147483647, %v2467_v56 }
 0x7b0   :  { %v3066_v51 = vmul.f32 %v3065_v16, %v5560_v53  ;;  %v3069_v7 = vsub.f32 1.0, %v3068_v62  ;;  %vm3087_vm9 = vweird.f32 %v2467_v56 }
 0x7b1   :  { %v3094_v32 = vor.u32 1.1754944e-38, %v3093_v20  ;;  %vm3092_vm11 = vcmp.eq.f32.partialorder %v3091_v54, 8.507059e+37 }
 0x7b2   :  { %3240 = vst [vmem:[#allocation10 + $0x130] sm:$0xff] %v3066_v51  ;;  %v3070_v8 = vmul.f32 %v4019_v22, %v3069_v7 }
 0x7b4   :  { %v3071_v55 = vadd.f32 %v4019_v22, %v3070_v8 }
 0x7b5   :  { %v4021_v27 = vpop.eup %4020 }
 0x7b6   :  { %v2469_v15 = vpop.xlane.xlu2 %2468  ;;  %v3083_v17 = vmul.f32 %v4021_v27, %v2467_v56  ;;  %v3075_v57 = vsel %vm3074_vm6, %v4019_v22, %v3071_v55  ;;  %vm3088_vm8 = vweird.f32 %v4021_v27 }
 0x7b7   :  { %4022 = vrcp.f32 %v2469_v15  ;;  %v3080_v24 = vsel %vm3077_vm7, %v3079_v13, %v3075_v57  ;;  %vm3089_vm10 = vmor %vm3087_vm9, %vm3088_vm8  ;;  %v3106_v37 = vand.u32 2147483647, %v2469_v15  ;;  %vm3102_vm0 = vweird.f32 %v2469_v15 }
 0x7b8   :  { %v3084_v38 = vsub.f32 1.0, %v3083_v17  ;;  %v3081_v53 = vmul.f32 %v3080_v24, %v5567_v59  ;;  %v3108_v59 = vand.u32 2147483648, %v2469_v15 }
 0x7b9   :  { %vm3107_vm14 = vcmp.eq.f32.partialorder %v3106_v37, 8.507059e+37 }
 0x7ba   :  { %v3085_v18 = vmul.f32 %v4021_v27, %v3084_v38  ;;  %3241 = vst [vmem:[#allocation10 + $0x138] sm:$0xff] %v3081_v53  ;;  %v3109_v33 = vor.u32 1.1754944e-38, %v3108_v59 }
 0x7bc   :  { %v3086_v9 = vadd.f32 %v4021_v27, %v3085_v18 }
 0x7bd   :  { %v4023_v21 = vpop.eup %4022 }
 0x7be   :  { %v3098_v44 = vmul.f32 %v4023_v21, %v2469_v15  ;;  %v3090_v34 = vsel %vm3089_vm10, %v4021_v27, %v3086_v9  ;;  %v2471_v49 = vpop.xlane.xlu0 %2470  ;;  %vm3103_vm12 = vweird.f32 %v4023_v21 }
 0x7bf   :  { %v3095_v58 = vsel %vm3092_vm11, %v3094_v32, %v3090_v34  ;;  %4024 = vrcp.f32 %v2471_v49  ;;  %vm3104_vm13 = vmor %vm3102_vm0, %vm3103_vm12  ;;  %v3121_v5 = vand.u32 2147483647, %v2471_v49  ;;  %vm3117_vm1 = vweird.f32 %v2471_v49 }
 0x7c0   :  { %v3099_v23 = vsub.f32 1.0, %v3098_v44  ;;  %v3096_v26 = vmul.f32 %v3095_v58, %v5574_v12  ;;  %v3123_v12 = vand.u32 2147483648, %v2471_v49 }
 0x7c1   :  { %vm3122_vm3 = vcmp.eq.f32.partialorder %v3121_v5, 8.507059e+37 }
 0x7c2   :  { %v3100_v47 = vmul.f32 %v4023_v21, %v3099_v23  ;;  %3242 = vst [vmem:[#allocation10 + $0x140] sm:$0xff] %v3096_v26  ;;  %v3124_v2 = vor.u32 1.1754944e-38, %v3123_v12 }
 0x7c4   :  { %v3101_v35 = vadd.f32 %v4023_v21, %v3100_v47 }
 0x7c5   :  { %v4025_v30 = vpop.eup %4024 }
 0x7c6   :  { %v3105_v52 = vsel %vm3104_vm13, %v4023_v21, %v3101_v35  ;;  %v2473_v50 = vpop.xlane.xlu1 %2472  ;;  %v3113_v42 = vmul.f32 %v4025_v30, %v2471_v49  ;;  %vm3118_vm15 = vweird.f32 %v4025_v30 }
 0x7c7   :  { %v3110_v25 = vsel %vm3107_vm14, %v3109_v33, %v3105_v52  ;;  %4026 = vrcp.f32 %v2473_v50  ;;  %vm3119_vm2 = vmor %vm3117_vm1, %vm3118_vm15  ;;  %v3138_v36 = vand.u32 2147483648, %v2473_v50  ;;  %v3136_v40 = vand.u32 2147483647, %v2473_v50 }
 0x7c8   :  { %v3111_v63 = vmul.f32 %v3110_v25, %v5581_v14  ;;  %v3114_v4 = vsub.f32 1.0, %v3113_v42  ;;  %vm3132_vm5 = vweird.f32 %v2473_v50 }
 0x7c9   :  { %v3139_v56 = vor.u32 1.1754944e-38, %v3138_v36  ;;  %vm3137_vm7 = vcmp.eq.f32.partialorder %v3136_v40, 8.507059e+37 }
 0x7ca   :  { %3243 = vst [vmem:[#allocation10 + $0x148] sm:$0xff] %v3111_v63  ;;  %v3115_v3 = vmul.f32 %v4025_v30, %v3114_v4 }
 0x7cc   :  { %v3116_v48 = vadd.f32 %v4025_v30, %v3115_v3 }
 0x7cd   :  { %v4027_v11 = vpop.eup %4026 }
 0x7ce   :  { %v3128_v43 = vmul.f32 %v4027_v11, %v2473_v50  ;;  %v3120_v10 = vsel %vm3119_vm2, %v4025_v30, %v3116_v48  ;;  %v2475_v46 = vpop.xlane.xlu2 %2474  ;;  %vm3133_vm4 = vweird.f32 %v4027_v11 }
 0x7cf   :  { %v3125_v0 = vsel %vm3122_vm3, %v3124_v2, %v3120_v10  ;;  %4028 = vrcp.f32 %v2475_v46  ;;  %vm3134_vm6 = vmor %vm3132_vm5, %vm3133_vm4  ;;  %v3151_v27 = vand.u32 2147483647, %v2475_v46  ;;  %vm3147_vm9 = vweird.f32 %v2475_v46 }
 0x7d0   :  { %v3129_v41 = vsub.f32 1.0, %v3128_v43  ;;  %v3126_v14 = vmul.f32 %v3125_v0, %v5588_v6  ;;  %v3153_v6 = vand.u32 2147483648, %v2475_v46 }
 0x7d1   :  { %vm3152_vm11 = vcmp.eq.f32.partialorder %v3151_v27, 8.507059e+37 }
 0x7d2   :  { %v3130_v45 = vmul.f32 %v4027_v11, %v3129_v41  ;;  %3244 = vst [vmem:[#allocation10 + $0x150] sm:$0xff] %v3126_v14  ;;  %v3154_v15 = vor.u32 1.1754944e-38, %v3153_v6 }
 0x7d4   :  { %v3131_v22 = vadd.f32 %v4027_v11, %v3130_v45 }
 0x7d5   :  { %v4029_v60 = vpop.eup %4028 }
 0x7d6   :  { %v3135_v16 = vsel %vm3134_vm6, %v4027_v11, %v3131_v22  ;;  %v3143_v62 = vmul.f32 %v4029_v60, %v2475_v46  ;;  %v2477_v51 = vpop.xlane.xlu0 %2476  ;;  %vm3148_vm8 = vweird.f32 %v4029_v60 }
 0x7d7   :  { %v3140_v7 = vsel %vm3137_vm7, %v3139_v56, %v3135_v16  ;;  %4030 = vrcp.f32 %v2477_v51  ;;  %vm3149_vm10 = vmor %vm3147_vm9, %vm3148_vm8  ;;  %v3166_v54 = vand.u32 2147483647, %v2477_v51  ;;  %vm3162_vm0 = vweird.f32 %v2477_v51 }
 0x7d8   :  { %v3141_v29 = vmul.f32 %v3140_v7, %v5595_v19  ;;  %v3144_v8 = vsub.f32 1.0, %v3143_v62  ;;  %v3168_v19 = vand.u32 2147483648, %v2477_v51 }
 0x7d9   :  { %vm3167_vm14 = vcmp.eq.f32.partialorder %v3166_v54, 8.507059e+37 }
 0x7da   :  { %3245 = vst [vmem:[#allocation10 + $0x158] sm:$0xff] %v3141_v29  ;;  %v3145_v28 = vmul.f32 %v4029_v60, %v3144_v8  ;;  %v3169_v21 = vor.u32 1.1754944e-38, %v3168_v19 }
 0x7dc   :  { %v3146_v55 = vadd.f32 %v4029_v60, %v3145_v28 }
 0x7dd   :  { %v4031_v13 = vpop.eup %4030 }
 0x7de   :  { %v3150_v17 = vsel %vm3149_vm10, %v4029_v60, %v3146_v55  ;;  %v3158_v57 = vmul.f32 %v4031_v13, %v2477_v51  ;;  %v2479_v38 = vpop.xlane.xlu1 %2478  ;;  %vm3163_vm12 = vweird.f32 %v4031_v13 }
 0x7df   :  { %v3155_v24 = vsel %vm3152_vm11, %v3154_v15, %v3150_v17  ;;  %4032 = vrcp.f32 %v2479_v38  ;;  %vm3164_vm13 = vmor %vm3162_vm0, %vm3163_vm12  ;;  %v3183_v26 = vand.u32 2147483648, %v2479_v38  ;;  %v3181_v47 = vand.u32 2147483647, %v2479_v38 }
 0x7e0   :  { %v3156_v53 = vmul.f32 %v3155_v24, %v5601_v61  ;;  %v3159_v20 = vsub.f32 1.0, %v3158_v57  ;;  %vm3177_vm1 = vweird.f32 %v2479_v38 }
 0x7e1   :  { %v3184_v30 = vor.u32 1.1754944e-38, %v3183_v26  ;;  %vm3182_vm3 = vcmp.eq.f32.partialorder %v3181_v47, 8.507059e+37 }
 0x7e2   :  { %3246 = vst [vmem:[#allocation10 + $0x160] sm:$0xff] %v3156_v53  ;;  %v3160_v18 = vmul.f32 %v4031_v13, %v3159_v20 }
 0x7e4   :  { %v3161_v9 = vadd.f32 %v4031_v13, %v3160_v18 }
 0x7e5   :  { %v4033_v32 = vpop.eup %4032 }
 0x7e6   :  { %v3165_v44 = vsel %vm3164_vm13, %v4031_v13, %v3161_v9  ;;  %v2481_v49 = vpop.xlane.xlu2 %2480  ;;  %v3173_v58 = vmul.f32 %v4033_v32, %v2479_v38  ;;  %vm3178_vm15 = vweird.f32 %v4033_v32 }
 0x7e7   :  { %v3170_v34 = vsel %vm3167_vm14, %v3169_v21, %v3165_v44  ;;  %4034 = vrcp.f32 %v2481_v49  ;;  %vm3179_vm2 = vmor %vm3177_vm1, %vm3178_vm15  ;;  %v3196_v4 = vand.u32 2147483647, %v2481_v49  ;;  %vm3192_vm5 = vweird.f32 %v2481_v49 }
 0x7e8   :  { %v3171_v23 = vmul.f32 %v3170_v34, %v5607_v1  ;;  %v3174_v61 = vsub.f32 1.0, %v3173_v58  ;;  %v3198_v1 = vand.u32 2147483648, %v2481_v49 }
 0x7e9   :  { %vm3197_vm7 = vcmp.eq.f32.partialorder %v3196_v4, 8.507059e+37 }
 0x7ea   :  { %3247 = vst [vmem:[#allocation10 + $0x168] sm:$0xff] %v3171_v23  ;;  %v3175_v59 = vmul.f32 %v4033_v32, %v3174_v61  ;;  %v3199_v3 = vor.u32 1.1754944e-38, %v3198_v1 }
 0x7ec   :  { %v3176_v37 = vadd.f32 %v4033_v32, %v3175_v59 }
 0x7ed   :  { %v4035_v35 = vpop.eup %4034 }
 0x7ee   :  { %v3188_v33 = vmul.f32 %v4035_v35, %v2481_v49  ;;  %v3180_v52 = vsel %vm3179_vm2, %v4033_v32, %v3176_v37  ;;  %vm3193_vm4 = vweird.f32 %v4035_v35 }
 0x7ef   :  { %v3185_v50 = vsel %vm3182_vm3, %v3184_v30, %v3180_v52  ;;  %vm3194_vm6 = vmor %vm3192_vm5, %vm3193_vm4 }
 0x7f0   :  { %v3189_v42 = vsub.f32 1.0, %v3188_v33  ;;  %v3186_v25 = vmul.f32 %v3185_v50, %v5616_v39 }
 0x7f2   :  { %v3190_v63 = vmul.f32 %v4035_v35, %v3189_v42  ;;  %3248 = vst [vmem:[#allocation10 + $0x170] sm:$0xff] %v3186_v25 }
 0x7f4   :  { %v3191_v12 = vadd.f32 %v4035_v35, %v3190_v63 }
 0x7f6   :  { %v3195_v5 = vsel %vm3194_vm6, %v4035_v35, %v3191_v12 }
 0x7f7   :  { %v3200_v48 = vsel %vm3197_vm7, %v3199_v3, %v3195_v5 }
 0x7f8   :  { %v3201_v39 = vmul.f32 %v3200_v48, %v5630_v31 }
 0x7fa   :  { %3249 = vst [vmem:[#allocation10 + $0x178] sm:$0xff] %v3201_v39 }
 0x7fb   :  { %3262 = dma.vmem_to_hbm [thread:$0]  %s3255_s24, 6144, %s3257_s27, [#allocation4], %s4175_s28, %s4175_s28, %s4176_s29  }
 0x7fc   :  { %4164 = dma.done.wait [#allocation4], 6144  }
 0x7fd   :  { %4165 = vsyncadd [#allocation4], 4294961152 }
 0x7fe   :  { %3267 = vsyncpa [#allocation3], 1 }
 0x7ff   :  { %3268 = vsyncpa [#allocation6], 1 }
 0x800   :  { %3269 = vsyncpa [#allocation9], 1 }
 0x801   :  { %3270 = vsyncpa [#allocation4], 1 }

</bundles_post_ra>
